<compile_context>
chip_gen: v5e
topology: v5e:2x2
jax: 0.10.0
libtpu: 0.0.40
codegen_flags: <defaults>
</compile_context>

<pallas_src>
import functools
import jax
import jax.numpy as jnp
from jax.experimental import pallas as pl
from jax.experimental.pallas import tpu as pltpu


# ------------------------------ in-kernel math ------------------------------ #

_SQRT_2_OVER_PI = 0.7978845608028654
_PAD_OFF = 8  # sublane-aligned column offset of the image inside the halo scratch


def _gelu(x):
    # tanh-form GELU (jnp.tanh -> EUP slot).  Differs from torch's exact
    # erf-GELU by <~1e-3 absolute; accepted by the perf review.
    return 0.5 * x * (1.0 + jnp.tanh(_SQRT_2_OVER_PI * (x + 0.044715 * x * x * x)))


def _depthwise3x3(t_hwc, w9c, xp_ref, H, W):
    """3x3 depthwise conv, padding=1, halo kept in a zero-bordered VMEM scratch.

    t_hwc: (H, W, C) f32 value; w9c: (9, C) f32 value (tap k = (k//3, k%3));
    xp_ref: VMEM scratch of shape (H + 2, W + _PAD_OFF + 1, C).
    """
    C = t_hwc.shape[-1]
    xp_ref[...] = jnp.zeros_like(xp_ref)                       # zero border each step
    xp_ref[1:H + 1, _PAD_OFF:_PAD_OFF + W, :] = t_hwc          # aligned interior store
    acc = jnp.zeros((H, W, C), jnp.float32)
    for k in range(9):
        dy, dx = k // 3, k % 3
        acc = acc + xp_ref[dy:dy + H,
                           _PAD_OFF - 1 + dx:_PAD_OFF - 1 + dx + W, :] * w9c[k]
    return acc


# ------------------------------ Pallas kernels ------------------------------ #

def _gst_attn_kernel(x_ref, wqkv_ref, wdw_ref, wproj_ref, temp_ref,
                     o_ref, xp_ref, *, H, W, heads):
    """Fused GST: qkv 1x1 conv -> dw3x3 -> per-head attention -> proj -> +x."""
    C = x_ref.shape[2]
    HW = H * W
    ch = C // heads
    x2 = x_ref[0]                                              # (HW, C) f32

    # 1x1 qkv conv (bf16 MXU operands, f32 accumulation)
    qkv = jnp.dot(x2.astype(jnp.bfloat16), wqkv_ref[...],
                  preferred_element_type=jnp.float32)          # (HW, 3C)

    # depthwise 3x3 conv (groups = 3C), halo handled in VMEM
    qkv = _depthwise3x3(qkv.reshape(H, W, 3 * C), wdw_ref[...],
                        xp_ref, H, W).reshape(HW, 3 * C)

    # per-head channel attention; contraction runs over HW rows so q/k/v are
    # consumed directly from the fused channels-last qkv tensor.
    wp = wproj_ref[...]                                        # (C, C) bf16
    y = jnp.zeros((HW, C), jnp.float32)
    for h in range(heads):
        q = qkv[:, h * ch:(h + 1) * ch]
        k = qkv[:, C + h * ch:C + (h + 1) * ch]
        v = qkv[:, 2 * C + h * ch:2 * C + (h + 1) * ch]
        # F.normalize(dim=-1): per-channel L2 norm over the spatial (HW) axis
        qn = q * jax.lax.rsqrt(
            jnp.maximum(jnp.sum(q * q, axis=0, keepdims=True), 1e-24))
        kn = k * jax.lax.rsqrt(
            jnp.maximum(jnp.sum(k * k, axis=0, keepdims=True), 1e-24))
        # s[c, d] = sum_n qn[n, c] * kn[n, d]
        s = jax.lax.dot_general(qn.astype(jnp.bfloat16), kn.astype(jnp.bfloat16),
                                (((0,), (0,)), ((), ())),
                                preferred_element_type=jnp.float32)     # (ch, ch)
        s = s * temp_ref[h]
        s = s - jnp.max(s, axis=-1, keepdims=True)
        e = jnp.exp(s)
        p = e * pl.reciprocal(jnp.sum(e, axis=-1, keepdims=True), approx=True)
        # out_rows[n, c] = sum_d v[n, d] * p[c, d]
        o_h = jax.lax.dot_general(v.astype(jnp.bfloat16), p.astype(jnp.bfloat16),
                                  (((1,), (1,)), ((), ())),
                                  preferred_element_type=jnp.float32)   # (HW, ch)
        # project_out folded per head: concat_h(o_h) @ Wp == sum_h o_h @ Wp_rows_h
        y = y + jnp.dot(o_h.astype(jnp.bfloat16), wp[h * ch:(h + 1) * ch, :],
                        preferred_element_type=jnp.float32)
    # fused residual add
    o_ref[0] = (y + x2).astype(o_ref.dtype)


def _ff_kernel(y_ref, g_ref, b_ref, w1_ref, wdw_ref, w2_ref,
               o_ref, xp_ref, *, H, W):
    """Fused PreNorm + FeedForward: LN -> 1x1 -> GELU -> dw3x3 -> GELU -> 1x1 -> +y."""
    C = y_ref.shape[2]
    HW = H * W
    y = y_ref[0]                                               # (HW, C) f32

    # LayerNorm over channels (nn.LayerNorm(dim))
    mu = jnp.mean(y, axis=-1, keepdims=True)
    yc = y - mu
    var = jnp.mean(yc * yc, axis=-1, keepdims=True)
    yn = yc * jax.lax.rsqrt(var + 1e-5) * g_ref[...] + b_ref[...]

    # 1x1 expansion conv + GELU
    t = _gelu(jnp.dot(yn.astype(jnp.bfloat16), w1_ref[...],
                      preferred_element_type=jnp.float32))     # (HW, 4C)
    Ce = t.shape[-1]

    # depthwise 3x3 conv + GELU
    t = _gelu(_depthwise3x3(t.reshape(H, W, Ce), wdw_ref[...],
                            xp_ref, H, W).reshape(HW, Ce))

    # 1x1 projection conv + fused residual add
    z = jnp.dot(t.astype(jnp.bfloat16), w2_ref[...],
                preferred_element_type=jnp.float32)            # (HW, C)
    o_ref[0] = (z + y).astype(o_ref.dtype)


# ------------------------------- module glue -------------------------------- #

def _gst_attention(x, p, *, H, W):
    """Fused attention branch + residual.  x: [B, H*W, C] -> [B, H*W, C]."""
    B, HW, C = x.shape
    heads = p["heads"]
    kern = functools.partial(_gst_attn_kernel, H=H, W=W, heads=heads)
    return pl.pallas_call(
        kern,
        out_shape=jax.ShapeDtypeStruct((B, HW, C), jnp.float32),
        grid_spec=pltpu.PrefetchScalarGridSpec(
            num_scalar_prefetch=0,
            grid=(B,),
            in_specs=[
                pl.BlockSpec((1, HW, C), lambda b: (b, 0, 0)),
                pl.BlockSpec((C, 3 * C), lambda b: (0, 0)),
                pl.BlockSpec((9, 3 * C), lambda b: (0, 0)),
                pl.BlockSpec((C, C), lambda b: (0, 0)),
                pl.BlockSpec(memory_space=pltpu.MemorySpace.SMEM),
            ],
            out_specs=pl.BlockSpec((1, HW, C), lambda b: (b, 0, 0)),
            scratch_shapes=[
                pltpu.VMEM((H + 2, W + _PAD_OFF + 1, 3 * C), jnp.float32)],
        ),
        compiler_params=pltpu.CompilerParams(
            dimension_semantics=("parallel",),
            vmem_limit_bytes=32 * 1024 * 1024),
    )(x, p["w_qkv"], p["w_qkv_dw"], p["w_proj"], p["temperature"])


def _feed_forward(y, p, *, H, W):
    """Fused PreNorm(LayerNorm)+FeedForward branch + residual. [B,H*W,C] -> same."""
    B, HW, C = y.shape
    kern = functools.partial(_ff_kernel, H=H, W=W)
    return pl.pallas_call(
        kern,
        out_shape=jax.ShapeDtypeStruct((B, HW, C), jnp.float32),
        grid_spec=pltpu.PrefetchScalarGridSpec(
            num_scalar_prefetch=0,
            grid=(B,),
            in_specs=[
                pl.BlockSpec((1, HW, C), lambda b: (b, 0, 0)),
                pl.BlockSpec((1, C), lambda b: (0, 0)),
                pl.BlockSpec((1, C), lambda b: (0, 0)),
                pl.BlockSpec((C, 4 * C), lambda b: (0, 0)),
                pl.BlockSpec((9, 4 * C), lambda b: (0, 0)),
                pl.BlockSpec((4 * C, C), lambda b: (0, 0)),
            ],
            out_specs=pl.BlockSpec((1, HW, C), lambda b: (b, 0, 0)),
            scratch_shapes=[
                pltpu.VMEM((H + 2, W + _PAD_OFF + 1, 4 * C), jnp.float32)],
        ),
        compiler_params=pltpu.CompilerParams(
            dimension_semantics=("parallel",),
            vmem_limit_bytes=32 * 1024 * 1024),
    )(y, p["ln_gamma"], p["ln_beta"], p["w_ff1"], p["w_ff_dw"], p["w_ff2"])


def gst_block_forward(x_nchw, params_list):
    """x: [b,c,h,w] -> out: [b,c,h,w]  (matches GST_block.forward)."""
    b, c, h, w = x_nchw.shape
    x = jnp.transpose(x_nchw, (0, 2, 3, 1)).reshape(b, h * w, c)   # NHWC rows
    # TODO(synk): the torch reference leaves x permuted (NHWC) after the FF line,
    # so for num_blocks > 1 its next attention sees a transposed tensor (only
    # type-checks when h == dim).  We implement the clean per-block semantics,
    # exact for num_blocks == 1.
    for p in params_list:
        x = _gst_attention(x, p, H=h, W=w)   # attn(x) + x      (fused residual)
        x = _feed_forward(x, p, H=h, W=w)    # ff(LN(x)) + x    (fused residual)
    return jnp.transpose(x.reshape(b, h, w, c), (0, 3, 1, 2))


# ------------------------------ parameter init ------------------------------ #

def init_params(key, dim, heads, num_blocks):
    params = []
    for i in range(num_blocks):
        keys = jax.random.split(jax.random.fold_in(key, i), 6)
        s = 0.1
        params.append(dict(
            heads=heads,
            # 1x1 convs stored as [Cin, Cout] matmul weights (transposed torch
            # weight), pre-cast to bf16 for the MXU fast path.
            w_qkv=(jax.random.normal(keys[0], (dim, 3 * dim), jnp.float32) * s
                   ).astype(jnp.bfloat16),
            # depthwise 3x3 weights: [9, C], tap-major (dy*3+dx); kept f32 (VPU)
            w_qkv_dw=jax.random.normal(keys[1], (9, 3 * dim), jnp.float32) * s,
            temperature=jnp.ones((heads,), jnp.float32),   # nn.Parameter(torch.ones)
            w_proj=(jax.random.normal(keys[2], (dim, dim), jnp.float32) * s
                    ).astype(jnp.bfloat16),
            ln_gamma=jnp.ones((1, dim), jnp.float32),      # nn.LayerNorm defaults
            ln_beta=jnp.zeros((1, dim), jnp.float32),
            w_ff1=(jax.random.normal(keys[3], (dim, 4 * dim), jnp.float32) * s
                   ).astype(jnp.bfloat16),
            w_ff_dw=jax.random.normal(keys[4], (9, 4 * dim), jnp.float32) * s,
            w_ff2=(jax.random.normal(keys[5], (4 * dim, dim), jnp.float32) * s
                   ).astype(jnp.bfloat16),
        ))
    return params


if __name__ == "__main__":
    key = jax.random.PRNGKey(0)
    b, dim, h, w = 2, 16, 16, 16
    heads, num_blocks = 2, 1

    x = jax.random.normal(jax.random.fold_in(key, 123), (b, dim, h, w), jnp.float32)
    params = init_params(key, dim, heads, num_blocks)

    out = gst_block_forward(x, params)
    out = jax.block_until_ready(out)

    assert out.shape == (b, dim, h, w), out.shape
    assert bool(jnp.all(jnp.isfinite(out)))
    print("KERNEL_OK")
</pallas_src>

<mosaic_0001>
module attributes {stable_mosaic.version = 11 : i64} {
  func.func @_gst_attn_kernel(%arg0: i32, %arg1: memref<1x256x16xf32, #tpu.memory_space<vmem>>, %arg2: memref<16x48xbf16, #tpu.memory_space<vmem>>, %arg3: memref<9x48xf32, #tpu.memory_space<vmem>>, %arg4: memref<16x16xbf16, #tpu.memory_space<vmem>>, %arg5: memref<2xf32, #tpu.memory_space<smem>>, %arg6: memref<1x256x16xf32, #tpu.memory_space<vmem>>, %arg7: memref<18x25x48xf32, #tpu.memory_space<vmem>>) attributes {dimension_semantics = [#tpu.dimension_semantics<parallel>], iteration_bounds = array<i64: 2>, scalar_prefetch = 0 : i64, scratch_operands = 1 : i64, tpu.core_type = #tpu.core_type<tc>, window_params = [{transform_indices = @transform_0, window_bounds = array<i64: 1, 256, 16>}, {pipeline_mode = #tpu.pipeline_mode<synchronous>, transform_indices = @transform_1, window_bounds = array<i64: 16, 48>}, {pipeline_mode = #tpu.pipeline_mode<synchronous>, transform_indices = @transform_2, window_bounds = array<i64: 9, 48>}, {pipeline_mode = #tpu.pipeline_mode<synchronous>, transform_indices = @transform_3, window_bounds = array<i64: 16, 16>}, {transform_indices = @transform_4, window_bounds = array<i64: 2>}, {transform_indices = @transform_5, window_bounds = array<i64: 1, 256, 16>}]} {
    %c0 = arith.constant 0 : index
    %c0_0 = arith.constant 0 : index
    %c0_1 = arith.constant 0 : index
    %0 = vector.load %arg1[%c0, %c0_0, %c0_1] : memref<1x256x16xf32, #tpu.memory_space<vmem>>, vector<1x256x16xf32>
    %1 = vector.shape_cast %0 : vector<1x256x16xf32> to vector<256x16xf32>
    %2 = arith.truncf %1 : vector<256x16xf32> to vector<256x16xbf16>
    %c0_2 = arith.constant 0 : index
    %c0_3 = arith.constant 0 : index
    %3 = vector.load %arg2[%c0_2, %c0_3] : memref<16x48xbf16, #tpu.memory_space<vmem>>, vector<16x48xbf16>
    %cst = arith.constant dense<0.000000e+00> : vector<256x48xf32>
    %4 = tpu.matmul %2, %3, %cst {dimension_numbers = #tpu.dot_dimension_numbers<[1], [0], [0], [1], [0, 0, 1, 1], [], []>} : vector<256x16xbf16>, vector<16x48xbf16>, vector<256x48xf32> -> vector<256x48xf32>
    %5 = vector.shape_cast %4 : vector<256x48xf32> to vector<16x16x48xf32>
    %c0_4 = arith.constant 0 : index
    %c0_5 = arith.constant 0 : index
    %6 = vector.load %arg3[%c0_4, %c0_5] : memref<9x48xf32, #tpu.memory_space<vmem>>, vector<9x48xf32>
    %cst_6 = arith.constant 0.000000e+00 : f32
    %7 = vector.broadcast %cst_6 : f32 to vector<18x25x48xf32>
    %c0_7 = arith.constant 0 : index
    %c0_8 = arith.constant 0 : index
    %c0_9 = arith.constant 0 : index
    %8 = vector.load %arg7[%c0_7, %c0_8, %c0_9] : memref<18x25x48xf32, #tpu.memory_space<vmem>>, vector<18x25x48xf32>
    tpu.vector_store %arg7[%c0_7, %c0_8, %c0_9], %7 {strides = array<i32>} : memref<18x25x48xf32, #tpu.memory_space<vmem>>, vector<18x25x48xf32>,
    %c1 = arith.constant 1 : index
    %c8 = arith.constant 8 : index
    %c0_10 = arith.constant 0 : index
    %9 = vector.load %arg7[%c1, %c8, %c0_10] : memref<18x25x48xf32, #tpu.memory_space<vmem>>, vector<16x16x48xf32>
    tpu.vector_store %arg7[%c1, %c8, %c0_10], %5 {strides = array<i32>} : memref<18x25x48xf32, #tpu.memory_space<vmem>>, vector<16x16x48xf32>,
    %cst_11 = arith.constant 0.000000e+00 : f32
    %10 = vector.broadcast %cst_11 : f32 to vector<16x16x48xf32>
    %c0_12 = arith.constant 0 : index
    %c7 = arith.constant 7 : index
    %c0_13 = arith.constant 0 : index
    %11 = vector.load %arg7[%c0_12, %c7, %c0_13] : memref<18x25x48xf32, #tpu.memory_space<vmem>>, vector<16x16x48xf32>
    %12 = vector.extract_strided_slice %6 {offsets = [0, 0], sizes = [1, 48], strides = [1, 1]} : vector<9x48xf32> to vector<1x48xf32>
    %13 = vector.shape_cast %12 : vector<1x48xf32> to vector<48xf32>
    %14 = vector.shape_cast %13 : vector<48xf32> to vector<1x1x48xf32>
    %15 = vector.broadcast %14 : vector<1x1x48xf32> to vector<16x16x48xf32>
    %16 = arith.mulf %11, %15 : vector<16x16x48xf32>
    %17 = arith.addf %10, %16 : vector<16x16x48xf32>
    %c0_14 = arith.constant 0 : index
    %c8_15 = arith.constant 8 : index
    %c0_16 = arith.constant 0 : index
    %18 = vector.load %arg7[%c0_14, %c8_15, %c0_16] : memref<18x25x48xf32, #tpu.memory_space<vmem>>, vector<16x16x48xf32>
    %19 = vector.extract_strided_slice %6 {offsets = [1, 0], sizes = [1, 48], strides = [1, 1]} : vector<9x48xf32> to vector<1x48xf32>
    %20 = vector.shape_cast %19 : vector<1x48xf32> to vector<48xf32>
    %21 = vector.shape_cast %20 : vector<48xf32> to vector<1x1x48xf32>
    %22 = vector.broadcast %21 : vector<1x1x48xf32> to vector<16x16x48xf32>
    %23 = arith.mulf %18, %22 : vector<16x16x48xf32>
    %24 = arith.addf %17, %23 : vector<16x16x48xf32>
    %c0_17 = arith.constant 0 : index
    %c9 = arith.constant 9 : index
    %c0_18 = arith.constant 0 : index
    %25 = vector.load %arg7[%c0_17, %c9, %c0_18] : memref<18x25x48xf32, #tpu.memory_space<vmem>>, vector<16x16x48xf32>
    %26 = vector.extract_strided_slice %6 {offsets = [2, 0], sizes = [1, 48], strides = [1, 1]} : vector<9x48xf32> to vector<1x48xf32>
    %27 = vector.shape_cast %26 : vector<1x48xf32> to vector<48xf32>
    %28 = vector.shape_cast %27 : vector<48xf32> to vector<1x1x48xf32>
    %29 = vector.broadcast %28 : vector<1x1x48xf32> to vector<16x16x48xf32>
    %30 = arith.mulf %25, %29 : vector<16x16x48xf32>
    %31 = arith.addf %24, %30 : vector<16x16x48xf32>
    %c1_19 = arith.constant 1 : index
    %c7_20 = arith.constant 7 : index
    %c0_21 = arith.constant 0 : index
    %32 = vector.load %arg7[%c1_19, %c7_20, %c0_21] : memref<18x25x48xf32, #tpu.memory_space<vmem>>, vector<16x16x48xf32>
    %33 = vector.extract_strided_slice %6 {offsets = [3, 0], sizes = [1, 48], strides = [1, 1]} : vector<9x48xf32> to vector<1x48xf32>
    %34 = vector.shape_cast %33 : vector<1x48xf32> to vector<48xf32>
    %35 = vector.shape_cast %34 : vector<48xf32> to vector<1x1x48xf32>
    %36 = vector.broadcast %35 : vector<1x1x48xf32> to vector<16x16x48xf32>
    %37 = arith.mulf %32, %36 : vector<16x16x48xf32>
    %38 = arith.addf %31, %37 : vector<16x16x48xf32>
    %c1_22 = arith.constant 1 : index
    %c8_23 = arith.constant 8 : index
    %c0_24 = arith.constant 0 : index
    %39 = vector.load %arg7[%c1_22, %c8_23, %c0_24] : memref<18x25x48xf32, #tpu.memory_space<vmem>>, vector<16x16x48xf32>
    %40 = vector.extract_strided_slice %6 {offsets = [4, 0], sizes = [1, 48], strides = [1, 1]} : vector<9x48xf32> to vector<1x48xf32>
    %41 = vector.shape_cast %40 : vector<1x48xf32> to vector<48xf32>
    %42 = vector.shape_cast %41 : vector<48xf32> to vector<1x1x48xf32>
    %43 = vector.broadcast %42 : vector<1x1x48xf32> to vector<16x16x48xf32>
    %44 = arith.mulf %39, %43 : vector<16x16x48xf32>
    %45 = arith.addf %38, %44 : vector<16x16x48xf32>
    %c1_25 = arith.constant 1 : index
    %c9_26 = arith.constant 9 : index
    %c0_27 = arith.constant 0 : index
    %46 = vector.load %arg7[%c1_25, %c9_26, %c0_27] : memref<18x25x48xf32, #tpu.memory_space<vmem>>, vector<16x16x48xf32>
    %47 = vector.extract_strided_slice %6 {offsets = [5, 0], sizes = [1, 48], strides = [1, 1]} : vector<9x48xf32> to vector<1x48xf32>
    %48 = vector.shape_cast %47 : vector<1x48xf32> to vector<48xf32>
    %49 = vector.shape_cast %48 : vector<48xf32> to vector<1x1x48xf32>
    %50 = vector.broadcast %49 : vector<1x1x48xf32> to vector<16x16x48xf32>
    %51 = arith.mulf %46, %50 : vector<16x16x48xf32>
    %52 = arith.addf %45, %51 : vector<16x16x48xf32>
    %c2 = arith.constant 2 : index
    %c7_28 = arith.constant 7 : index
    %c0_29 = arith.constant 0 : index
    %53 = vector.load %arg7[%c2, %c7_28, %c0_29] : memref<18x25x48xf32, #tpu.memory_space<vmem>>, vector<16x16x48xf32>
    %54 = vector.extract_strided_slice %6 {offsets = [6, 0], sizes = [1, 48], strides = [1, 1]} : vector<9x48xf32> to vector<1x48xf32>
    %55 = vector.shape_cast %54 : vector<1x48xf32> to vector<48xf32>
    %56 = vector.shape_cast %55 : vector<48xf32> to vector<1x1x48xf32>
    %57 = vector.broadcast %56 : vector<1x1x48xf32> to vector<16x16x48xf32>
    %58 = arith.mulf %53, %57 : vector<16x16x48xf32>
    %59 = arith.addf %52, %58 : vector<16x16x48xf32>
    %c2_30 = arith.constant 2 : index
    %c8_31 = arith.constant 8 : index
    %c0_32 = arith.constant 0 : index
    %60 = vector.load %arg7[%c2_30, %c8_31, %c0_32] : memref<18x25x48xf32, #tpu.memory_space<vmem>>, vector<16x16x48xf32>
    %61 = vector.extract_strided_slice %6 {offsets = [7, 0], sizes = [1, 48], strides = [1, 1]} : vector<9x48xf32> to vector<1x48xf32>
    %62 = vector.shape_cast %61 : vector<1x48xf32> to vector<48xf32>
    %63 = vector.shape_cast %62 : vector<48xf32> to vector<1x1x48xf32>
    %64 = vector.broadcast %63 : vector<1x1x48xf32> to vector<16x16x48xf32>
    %65 = arith.mulf %60, %64 : vector<16x16x48xf32>
    %66 = arith.addf %59, %65 : vector<16x16x48xf32>
    %c2_33 = arith.constant 2 : index
    %c9_34 = arith.constant 9 : index
    %c0_35 = arith.constant 0 : index
    %67 = vector.load %arg7[%c2_33, %c9_34, %c0_35] : memref<18x25x48xf32, #tpu.memory_space<vmem>>, vector<16x16x48xf32>
    %68 = vector.extract_strided_slice %6 {offsets = [8, 0], sizes = [1, 48], strides = [1, 1]} : vector<9x48xf32> to vector<1x48xf32>
    %69 = vector.shape_cast %68 : vector<1x48xf32> to vector<48xf32>
    %70 = vector.shape_cast %69 : vector<48xf32> to vector<1x1x48xf32>
    %71 = vector.broadcast %70 : vector<1x1x48xf32> to vector<16x16x48xf32>
    %72 = arith.mulf %67, %71 : vector<16x16x48xf32>
    %73 = arith.addf %66, %72 : vector<16x16x48xf32>
    %74 = vector.shape_cast %73 : vector<16x16x48xf32> to vector<256x48xf32>
    %c0_36 = arith.constant 0 : index
    %c0_37 = arith.constant 0 : index
    %75 = vector.load %arg4[%c0_36, %c0_37] : memref<16x16xbf16, #tpu.memory_space<vmem>>, vector<16x16xbf16>
    %cst_38 = arith.constant 0.000000e+00 : f32
    %76 = vector.broadcast %cst_38 : f32 to vector<256x16xf32>
    %77 = vector.extract_strided_slice %74 {offsets = [0, 0], sizes = [256, 8], strides = [1, 1]} : vector<256x48xf32> to vector<256x8xf32>
    %78 = vector.extract_strided_slice %74 {offsets = [0, 16], sizes = [256, 8], strides = [1, 1]} : vector<256x48xf32> to vector<256x8xf32>
    %79 = vector.extract_strided_slice %74 {offsets = [0, 32], sizes = [256, 8], strides = [1, 1]} : vector<256x48xf32> to vector<256x8xf32>
    %80 = arith.mulf %77, %77 : vector<256x8xf32>
    %cst_39 = arith.constant dense<0.000000e+00> : vector<8xf32>
    %81 = vector.multi_reduction <add>, %80, %cst_39 [0] : vector<256x8xf32> to vector<8xf32>
    %82 = vector.shape_cast %81 : vector<8xf32> to vector<1x8xf32>
    %cst_40 = arith.constant 1.000000e-24 : f32
    %83 = vector.broadcast %cst_40 : f32 to vector<1x8xf32>
    %84 = arith.maximumf %82, %83 : vector<1x8xf32>
    %85 = math.rsqrt %84 : vector<1x8xf32>
    %86 = vector.broadcast %85 : vector<1x8xf32> to vector<256x8xf32>
    %87 = arith.mulf %77, %86 : vector<256x8xf32>
    %88 = arith.mulf %78, %78 : vector<256x8xf32>
    %cst_41 = arith.constant dense<0.000000e+00> : vector<8xf32>
    %89 = vector.multi_reduction <add>, %88, %cst_41 [0] : vector<256x8xf32> to vector<8xf32>
    %90 = vector.shape_cast %89 : vector<8xf32> to vector<1x8xf32>
    %cst_42 = arith.constant 1.000000e-24 : f32
    %91 = vector.broadcast %cst_42 : f32 to vector<1x8xf32>
    %92 = arith.maximumf %90, %91 : vector<1x8xf32>
    %93 = math.rsqrt %92 : vector<1x8xf32>
    %94 = vector.broadcast %93 : vector<1x8xf32> to vector<256x8xf32>
    %95 = arith.mulf %78, %94 : vector<256x8xf32>
    %96 = arith.truncf %87 : vector<256x8xf32> to vector<256x8xbf16>
    %97 = arith.truncf %95 : vector<256x8xf32> to vector<256x8xbf16>
    %cst_43 = arith.constant dense<0.000000e+00> : vector<8x8xf32>
    %98 = tpu.matmul %96, %97, %cst_43 {dimension_numbers = #tpu.dot_dimension_numbers<[0], [0], [1], [1], [0, 1, 1, 1], [], []>} : vector<256x8xbf16>, vector<256x8xbf16>, vector<8x8xf32> -> vector<8x8xf32>
    %c0_44 = arith.constant 0 : index
    %99 = memref.load %arg5[%c0_44] : memref<2xf32, #tpu.memory_space<smem>>
    %100 = vector.broadcast %99 : f32 to vector<8x8xf32>
    %101 = arith.mulf %98, %100 : vector<8x8xf32>
    %cst_45 = arith.constant dense<0xFF800000> : vector<8xf32>
    %102 = vector.multi_reduction <maximumf>, %101, %cst_45 [1] : vector<8x8xf32> to vector<8xf32>
    %103 = vector.shape_cast %102 : vector<8xf32> to vector<8x1xf32>
    %104 = vector.broadcast %103 : vector<8x1xf32> to vector<8x8xf32>
    %105 = arith.subf %101, %104 : vector<8x8xf32>
    %106 = math.exp %105 : vector<8x8xf32>
    %cst_46 = arith.constant dense<0.000000e+00> : vector<8xf32>
    %107 = vector.multi_reduction <add>, %106, %cst_46 [1] : vector<8x8xf32> to vector<8xf32>
    %108 = vector.shape_cast %107 : vector<8xf32> to vector<8x1xf32>
    %109 = tpu.reciprocal %108 {approx = true} : vector<8x1xf32> -> vector<8x1xf32>
    %110 = vector.broadcast %109 : vector<8x1xf32> to vector<8x8xf32>
    %111 = arith.mulf %106, %110 : vector<8x8xf32>
    %112 = arith.truncf %79 : vector<256x8xf32> to vector<256x8xbf16>
    %113 = arith.truncf %111 : vector<8x8xf32> to vector<8x8xbf16>
    %cst_47 = arith.constant dense<0.000000e+00> : vector<256x8xf32>
    %114 = tpu.matmul %112, %113, %cst_47 {dimension_numbers = #tpu.dot_dimension_numbers<[1], [1], [0], [0], [0, 0, 1, 0], [], []>} : vector<256x8xbf16>, vector<8x8xbf16>, vector<256x8xf32> -> vector<256x8xf32>
    %115 = arith.truncf %114 : vector<256x8xf32> to vector<256x8xbf16>
    %116 = vector.extract_strided_slice %75 {offsets = [0, 0], sizes = [8, 16], strides = [1, 1]} : vector<16x16xbf16> to vector<8x16xbf16>
    %cst_48 = arith.constant dense<0.000000e+00> : vector<256x16xf32>
    %117 = tpu.matmul %115, %116, %cst_48 {dimension_numbers = #tpu.dot_dimension_numbers<[1], [0], [0], [1], [0, 0, 1, 1], [], []>} : vector<256x8xbf16>, vector<8x16xbf16>, vector<256x16xf32> -> vector<256x16xf32>
    %118 = arith.addf %76, %117 : vector<256x16xf32>
    %119 = vector.extract_strided_slice %74 {offsets = [0, 8], sizes = [256, 8], strides = [1, 1]} : vector<256x48xf32> to vector<256x8xf32>
    %120 = vector.extract_strided_slice %74 {offsets = [0, 24], sizes = [256, 8], strides = [1, 1]} : vector<256x48xf32> to vector<256x8xf32>
    %121 = vector.extract_strided_slice %74 {offsets = [0, 40], sizes = [256, 8], strides = [1, 1]} : vector<256x48xf32> to vector<256x8xf32>
    %122 = arith.mulf %119, %119 : vector<256x8xf32>
    %cst_49 = arith.constant dense<0.000000e+00> : vector<8xf32>
    %123 = vector.multi_reduction <add>, %122, %cst_49 [0] : vector<256x8xf32> to vector<8xf32>
    %124 = vector.shape_cast %123 : vector<8xf32> to vector<1x8xf32>
    %cst_50 = arith.constant 1.000000e-24 : f32
    %125 = vector.broadcast %cst_50 : f32 to vector<1x8xf32>
    %126 = arith.maximumf %124, %125 : vector<1x8xf32>
    %127 = math.rsqrt %126 : vector<1x8xf32>
    %128 = vector.broadcast %127 : vector<1x8xf32> to vector<256x8xf32>
    %129 = arith.mulf %119, %128 : vector<256x8xf32>
    %130 = arith.mulf %120, %120 : vector<256x8xf32>
    %cst_51 = arith.constant dense<0.000000e+00> : vector<8xf32>
    %131 = vector.multi_reduction <add>, %130, %cst_51 [0] : vector<256x8xf32> to vector<8xf32>
    %132 = vector.shape_cast %131 : vector<8xf32> to vector<1x8xf32>
    %cst_52 = arith.constant 1.000000e-24 : f32
    %133 = vector.broadcast %cst_52 : f32 to vector<1x8xf32>
    %134 = arith.maximumf %132, %133 : vector<1x8xf32>
    %135 = math.rsqrt %134 : vector<1x8xf32>
    %136 = vector.broadcast %135 : vector<1x8xf32> to vector<256x8xf32>
    %137 = arith.mulf %120, %136 : vector<256x8xf32>
    %138 = arith.truncf %129 : vector<256x8xf32> to vector<256x8xbf16>
    %139 = arith.truncf %137 : vector<256x8xf32> to vector<256x8xbf16>
    %cst_53 = arith.constant dense<0.000000e+00> : vector<8x8xf32>
    %140 = tpu.matmul %138, %139, %cst_53 {dimension_numbers = #tpu.dot_dimension_numbers<[0], [0], [1], [1], [0, 1, 1, 1], [], []>} : vector<256x8xbf16>, vector<256x8xbf16>, vector<8x8xf32> -> vector<8x8xf32>
    %c1_54 = arith.constant 1 : index
    %141 = memref.load %arg5[%c1_54] : memref<2xf32, #tpu.memory_space<smem>>
    %142 = vector.broadcast %141 : f32 to vector<8x8xf32>
    %143 = arith.mulf %140, %142 : vector<8x8xf32>
    %cst_55 = arith.constant dense<0xFF800000> : vector<8xf32>
    %144 = vector.multi_reduction <maximumf>, %143, %cst_55 [1] : vector<8x8xf32> to vector<8xf32>
    %145 = vector.shape_cast %144 : vector<8xf32> to vector<8x1xf32>
    %146 = vector.broadcast %145 : vector<8x1xf32> to vector<8x8xf32>
    %147 = arith.subf %143, %146 : vector<8x8xf32>
    %148 = math.exp %147 : vector<8x8xf32>
    %cst_56 = arith.constant dense<0.000000e+00> : vector<8xf32>
    %149 = vector.multi_reduction <add>, %148, %cst_56 [1] : vector<8x8xf32> to vector<8xf32>
    %150 = vector.shape_cast %149 : vector<8xf32> to vector<8x1xf32>
    %151 = tpu.reciprocal %150 {approx = true} : vector<8x1xf32> -> vector<8x1xf32>
    %152 = vector.broadcast %151 : vector<8x1xf32> to vector<8x8xf32>
    %153 = arith.mulf %148, %152 : vector<8x8xf32>
    %154 = arith.truncf %121 : vector<256x8xf32> to vector<256x8xbf16>
    %155 = arith.truncf %153 : vector<8x8xf32> to vector<8x8xbf16>
    %cst_57 = arith.constant dense<0.000000e+00> : vector<256x8xf32>
    %156 = tpu.matmul %154, %155, %cst_57 {dimension_numbers = #tpu.dot_dimension_numbers<[1], [1], [0], [0], [0, 0, 1, 0], [], []>} : vector<256x8xbf16>, vector<8x8xbf16>, vector<256x8xf32> -> vector<256x8xf32>
    %157 = arith.truncf %156 : vector<256x8xf32> to vector<256x8xbf16>
    %158 = vector.extract_strided_slice %75 {offsets = [8, 0], sizes = [8, 16], strides = [1, 1]} : vector<16x16xbf16> to vector<8x16xbf16>
    %cst_58 = arith.constant dense<0.000000e+00> : vector<256x16xf32>
    %159 = tpu.matmul %157, %158, %cst_58 {dimension_numbers = #tpu.dot_dimension_numbers<[1], [0], [0], [1], [0, 0, 1, 1], [], []>} : vector<256x8xbf16>, vector<8x16xbf16>, vector<256x16xf32> -> vector<256x16xf32>
    %160 = arith.addf %118, %159 : vector<256x16xf32>
    %161 = arith.addf %160, %1 : vector<256x16xf32>
    %c0_59 = arith.constant 0 : index
    %c0_60 = arith.constant 0 : index
    %c0_61 = arith.constant 0 : index
    %162 = vector.load %arg6[%c0_59, %c0_60, %c0_61] : memref<1x256x16xf32, #tpu.memory_space<vmem>>, vector<1x256x16xf32>
    %163 = vector.shape_cast %162 : vector<1x256x16xf32> to vector<256x16xf32>
    %164 = vector.shape_cast %161 : vector<256x16xf32> to vector<1x256x16xf32>
    tpu.vector_store %arg6[%c0_59, %c0_60, %c0_61], %164 {strides = array<i32>} : memref<1x256x16xf32, #tpu.memory_space<vmem>>, vector<1x256x16xf32>,
    return
  }
  func.func @transform_0(%arg0: i32) -> (i32, i32, i32) {
    %c0_i32 = arith.constant 0 : i32
    %c0_i32_0 = arith.constant 0 : i32
    %c0_i32_1 = arith.constant 0 : i32
    return %arg0, %c0_i32, %c0_i32_0 : i32, i32, i32
  }
  func.func @transform_1(%arg0: i32) -> (i32, i32) {
    %c0_i32 = arith.constant 0 : i32
    %c0_i32_0 = arith.constant 0 : i32
    %c0_i32_1 = arith.constant 0 : i32
    return %c0_i32, %c0_i32_0 : i32, i32
  }
  func.func @transform_2(%arg0: i32) -> (i32, i32) {
    %c0_i32 = arith.constant 0 : i32
    %c0_i32_0 = arith.constant 0 : i32
    %c0_i32_1 = arith.constant 0 : i32
    return %c0_i32, %c0_i32_0 : i32, i32
  }
  func.func @transform_3(%arg0: i32) -> (i32, i32) {
    %c0_i32 = arith.constant 0 : i32
    %c0_i32_0 = arith.constant 0 : i32
    %c0_i32_1 = arith.constant 0 : i32
    return %c0_i32, %c0_i32_0 : i32, i32
  }
  func.func @transform_4(%arg0: i32) -> i32 {
    %c0_i32 = arith.constant 0 : i32
    %c0_i32_0 = arith.constant 0 : i32
    return %c0_i32 : i32
  }
  func.func @transform_5(%arg0: i32) -> (i32, i32, i32) {
    %c0_i32 = arith.constant 0 : i32
    %c0_i32_0 = arith.constant 0 : i32
    %c0_i32_1 = arith.constant 0 : i32
    return %arg0, %c0_i32, %c0_i32_0 : i32, i32, i32
  }
}

</mosaic_0001>

<bundles_post_ra>
// kernel: tpu_custom_call.1
= control target key start
LH: loop header
LB: loop body
LE: loop exit
PB: predicated region body
PF: predicated region fallthrough
CT: control target
= control target key end

     0   :  { %10 = vsyncpa [#allocation4], 0  ;;  %s3412_s18 = smov 0   ;;  %s5439_s0 = inlined_call_operand.vmem [shape: f32[2,256,16], index: 0, kind: input, shape index: {}]   ;;  %s5440_s1 = inlined_call_operand.vmem [shape: bf16[16,48], index: 1, kind: input, shape index: {}]   ;;  %s5441_s2 = inlined_call_operand.vmem [shape: f32[9,48], index: 2, kind: input, shape index: {}]   ;;  %s5442_s3 = inlined_call_operand.vmem [shape: bf16[16,16], index: 3, kind: input, shape index: {}]   ;;  %s5443_s4 = inlined_call_operand.vmem [shape: f32[2], index: 4, kind: input, shape index: {}]   ;;  %s5444_s5 = inlined_call_operand.vmem [shape: f32[2,256,16], index: 5, kind: output, shape index: {}]  }
   0x1 LB: > { %s3125_s19 = sadd.s32 4294967295, %s3371_s18   ;;  %p3127_p0 = scmp.ge.s32.totalorder %s3371_s18, 1  ;;  %s3371_s18 = sphi %s3412_s18, %s16_s18  }
   0x2   : > { %p157_p1 = scmp.lt.s32.totalorder %s3371_s18, 3  ;;  %s178_s22 = sshll.u32 %s5443_s4, 4  ;;  %s179_s22 = int_to_ptr.vmem [resolvable:$true] %s178_s22 }
   0x3   : > { %p3271_p3 = scmp.eq.s32.totalorder %s3125_s19, 0  ;;  %s3373_s23 = smov [#allocation3]  }
   0x4   : > { %p158_p2 = pnand %p3127_p0, %p157_p1 }
   0x6   : > { %p3267_p4 = pneg %p158_p2  ;;  %199 = sbr.rel (%p158_p2) target bundleno = 1698 (0x6a2), region = 40 }
   0x8   : > { %p3268_p5 = pnand %p3271_p3, %p3267_p4 }
   0xa   : > { %3270 = dma.vmem_to_smem (!%p3268_p5), %s179_s22, 16, %s3373_s23, [#allocation4]  }
   0xb   : > { %3366 = dma.done.wait (%p3271_p3), [#allocation4], 16  }
   0xc   : > { %3368 = vsyncadd (%p3271_p3), [#allocation4], 4294967280 }
   0xd   : > { %206 = sfence }
   0xe   : > { %v3225_v0 = vld [vmem:[%s5440_s1] sm:$0xff]  ;;  %p229_p6 = scmp.lt.s32.totalorder %s3125_s19, 1  ;;  %vm296_vm0 = vcmask 130048   ;;  %vm436_vm1 = vcmask 392192   ;;  %v3374_v48 = vmov 0.0   ;;  %vm440_vm2 = vcmask 385024  }
   0xf   : > { %352 = vmatpush.bf16.msra.mxu0 %v3225_v0  ;;  %3226 = vmatpush.bf16.msra.mxu1 %v3225_v0  ;;  %437 = vst.msk [vmem:[#allocation2] sm:$0xff] %vm436_vm1, %v3374_v48  ;;  %v3614_v59 = vld [vmem:[%s5441_s2] sm:$0xff]  ;;  %vm1451_vm3 = vcmask 64512   ;;  %vm2179_vm4 = vcmask 261312   ;;  %vm1564_vm5 = vcmask 195712   ;;  %vm2066_vm6 = vcmask 130112  }
  0x10   : > { %s5612_s19 = smov (!%p229_p6, %s3125_s19), 1  ;;  %3227 = vmatpush.bf16.msra.mxu3 %v3225_v0  ;;  %438 = vst.msk [vmem:[#allocation2 + $0x8] sm:$0xff] %vm436_vm1, %v3374_v48  ;;  %v3623_v60 = vperm.slane %v3614_v59, 0  ;;  %v3626_v61 = vperm.slane %v3614_v59, 1  ;;  %s3375_s9 = smov 112  }
  0x11   : > { %s3223_s26 = sshll.u32 %s5612_s19, 8  ;;  %439 = vst.msk [vmem:[#allocation2 + $0x10] sm:$0xff] %vm436_vm1, %v3374_v48  ;;  %s3376_s10 = smov 120  }
  0x12   : > { %s3434_s29 = scalar_lea.vmem %s5439_s0, %s3223_s26  ;;  %442 = vst.msk [vmem:[#allocation2 + $0x20] sm:$0xff] %vm436_vm1, %v3374_v48  ;;  %s3377_s11 = smov 104  }
  0x13   : > { %v240_v1 = vld [vmem:[%s3434_s29] sm:$0xff]  ;;  %v241_v2 = vld [vmem:[%s3434_s29 + $0x8] sm:$0xff]  ;;  %v254_v3 = vld [vmem:[%s3434_s29 + $0x70] sm:$0xff]  ;;  %443 = vst.msk [vmem:[#allocation2 + $0x28] sm:$0xff] %vm436_vm1, %v3374_v48  ;;  %s3378_s12 = smov 96   ;;  %s1831_s13 = sld [smem:[#allocation3]] }
  0x14   : > { %v272_v4 = vpack.c.bf16 %v241_v2, %v240_v1  ;;  %v255_v5 = vld [vmem:[%s3434_s29 + $0x78] sm:$0xff]  ;;  %v260_v6 = vld [vmem:[%s3434_s29 + $0xa0] sm:$0xff]  ;;  %v261_v7 = vld [vmem:[%s3434_s29 + $0xa8] sm:$0xff]  ;;  %444 = vst.msk [vmem:[#allocation2 + $0x30] sm:$0xff] %vm436_vm1, %v3374_v48  ;;  %s3172_s14 = sld [smem:[#allocation3 + $0x1]]  ;;  %s3379_s15 = smov 88  }
  0x15   : > { %v279_v8 = vpack.c.bf16 %v255_v5, %v254_v3  ;;  %v282_v9 = vpack.c.bf16 %v261_v7, %v260_v6  ;;  %v242_v10 = vld [vmem:[%s3434_s29 + $0x10] sm:$0xff]  ;;  %v243_v11 = vld [vmem:[%s3434_s29 + $0x18] sm:$0xff]  ;;  %v256_v12 = vld [vmem:[%s3434_s29 + $0x80] sm:$0xff]  ;;  %446 = vst.msk [vmem:[#allocation2 + $0x40] sm:$0xff] %vm436_vm1, %v3374_v48  ;;  %v3639_v3 = vperm.slane %v3614_v59, 2  ;;  %s5324_s24 = scalar_lea.vmem %s5444_s5, %s3223_s26 }
  0x16   : > { %3140 = vmatmul.msk.bf16.vlgmr.msra.gmra.mxu0 %vm296_vm0, %v272_v4  ;;  %v257_v13 = vld [vmem:[%s3434_s29 + $0x88] sm:$0xff]  ;;  %v262_v14 = vld [vmem:[%s3434_s29 + $0xb0] sm:$0xff]  ;;  %v263_v15 = vld [vmem:[%s3434_s29 + $0xb8] sm:$0xff]  ;;  %v273_v16 = vpack.c.bf16 %v243_v11, %v242_v10  ;;  %447 = vst.msk [vmem:[#allocation2 + $0x48] sm:$0xff] %vm436_vm1, %v3374_v48 }
  0x17   : > { %3147 = vmatmul.msk.bf16.vlgmr.msra.gmra.mxu1 %vm296_vm0, %v279_v8  ;;  %3150 = vmatmul.msk.bf16.vlgmr.msra.gmra.mxu3 %vm296_vm0, %v282_v9  ;;  %v280_v17 = vpack.c.bf16 %v257_v13, %v256_v12  ;;  %v283_v18 = vpack.c.bf16 %v263_v15, %v262_v14  ;;  %v244_v19 = vld [vmem:[%s3434_s29 + $0x20] sm:$0xff]  ;;  %v245_v20 = vld [vmem:[%s3434_s29 + $0x28] sm:$0xff]  ;;  %v258_v21 = vld [vmem:[%s3434_s29 + $0x90] sm:$0xff]  ;;  %448 = vst.msk [vmem:[#allocation2 + $0x50] sm:$0xff] %vm436_vm1, %v3374_v48  ;;  %v3652_v13 = vperm.slane %v3614_v59, 3 }
  0x18   : > { %v259_v22 = vld [vmem:[%s3434_s29 + $0x98] sm:$0xff]  ;;  %v264_v23 = vld [vmem:[%s3434_s29 + $0xc0] sm:$0xff]  ;;  %v265_v24 = vld [vmem:[%s3434_s29 + $0xc8] sm:$0xff]  ;;  %v274_v25 = vpack.c.bf16 %v245_v20, %v244_v19  ;;  %450 = vst.msk [vmem:[#allocation2 + $0x60] sm:$0xff] %vm436_vm1, %v3374_v48 }
  0x19   : > { %v281_v26 = vpack.c.bf16 %v259_v22, %v258_v21  ;;  %v284_v27 = vpack.c.bf16 %v265_v24, %v264_v23  ;;  %v246_v28 = vld [vmem:[%s3434_s29 + $0x30] sm:$0xff]  ;;  %v247_v29 = vld [vmem:[%s3434_s29 + $0x38] sm:$0xff]  ;;  %v248_v34 = vld [vmem:[%s3434_s29 + $0x40] sm:$0xff]  ;;  %451 = vst.msk [vmem:[#allocation2 + $0x68] sm:$0xff] %vm436_vm1, %v3374_v48  ;;  %v3663_v22 = vperm.slane %v3614_v59, 4  ;;  %v3666_v23 = vperm.slane %v3614_v59, 5 }
  0x1a   : > { %v266_v30 = vld [vmem:[%s3434_s29 + $0xd0] sm:$0xff]  ;;  %v267_v31 = vld [vmem:[%s3434_s29 + $0xd8] sm:$0xff]  ;;  %v275_v32 = vpack.c.bf16 %v247_v29, %v246_v28  ;;  %v249_v35 = vld [vmem:[%s3434_s29 + $0x48] sm:$0xff]  ;;  %452 = vst.msk [vmem:[#allocation2 + $0x70] sm:$0xff] %vm436_vm1, %v3374_v48 }
  0x1b   : > { %v285_v33 = vpack.c.bf16 %v267_v31, %v266_v30  ;;  %v268_v36 = vld [vmem:[%s3434_s29 + $0xe0] sm:$0xff]  ;;  %v269_v37 = vld [vmem:[%s3434_s29 + $0xe8] sm:$0xff]  ;;  %v276_v38 = vpack.c.bf16 %v249_v35, %v248_v34  ;;  %v250_v40 = vld [vmem:[%s3434_s29 + $0x50] sm:$0xff]  ;;  %454 = vst.msk [vmem:[#allocation2 + $0x80] sm:$0xff] %vm436_vm1, %v3374_v48  ;;  %v3672_v30 = vperm.slane %v3614_v59, 6 }
  0x1c   : > { %v286_v39 = vpack.c.bf16 %v269_v37, %v268_v36  ;;  %v251_v41 = vld [vmem:[%s3434_s29 + $0x58] sm:$0xff]  ;;  %v270_v42 = vld [vmem:[%s3434_s29 + $0xf0] sm:$0xff]  ;;  %v252_v46 = vld [vmem:[%s3434_s29 + $0x60] sm:$0xff]  ;;  %455 = vst.msk [vmem:[#allocation2 + $0x88] sm:$0xff] %vm436_vm1, %v3374_v48 }
  0x1d   : > { %v271_v43 = vld [vmem:[%s3434_s29 + $0xf8] sm:$0xff]  ;;  %v277_v44 = vpack.c.bf16 %v251_v41, %v250_v40  ;;  %v253_v47 = vld [vmem:[%s3434_s29 + $0x68] sm:$0xff]  ;;  %456 = vst.msk [vmem:[#allocation2 + $0x90] sm:$0xff] %vm436_vm1, %v3374_v48  ;;  %v641_v5 = vld [vmem:[#allocation2 + $0x10] sm:$0xff] }
  0x1e   : > { %v287_v45 = vpack.c.bf16 %v271_v43, %v270_v42  ;;  %v278_v49 = vpack.c.bf16 %v253_v47, %v252_v46  ;;  %458 = vst.msk [vmem:[#allocation2 + $0xa0] sm:$0xff] %vm436_vm1, %v3374_v48  ;;  %v543_v62 = vld [vmem:[#allocation2 + $0x7] sm:$0xff]  ;;  %v544_v4 = vld [vmem:[#allocation2 + $0xf] sm:$0xff]  ;;  %v674_v10 = vmul.f32 %v3626_v61, %v641_v5  ;;  %v3688_v43 = vperm.slane %v3614_v59, 7 }
  0x1f   : > { %459 = vst.msk [vmem:[#allocation2 + $0xa8] sm:$0xff] %vm436_vm1, %v3374_v48  ;;  %v640_v63 = vld [vmem:[#allocation2 + $0x8] sm:$0xff]  ;;  %v576_v1 = vmul.f32 %v3623_v60, %v543_v62  ;;  %v577_v9 = vmul.f32 %v3623_v60, %v544_v4 }
  0x20   : > { %460 = vst.msk [vmem:[#allocation2 + $0xb0] sm:$0xff] %vm436_vm1, %v3374_v48  ;;  %v673_v2 = vmul.f32 %v3626_v61, %v640_v63  ;;  %v737_v7 = vld [vmem:[#allocation2 + $0x9] sm:$0xff]  ;;  %v435_v40 = vld [vmem:[%s5441_s2 + $0x8] sm:$0x1] }
  0x21   : > { %462 = vst.msk [vmem:[#allocation2 + $0xc0] sm:$0xff] %vm436_vm1, %v3374_v48  ;;  %v770_v12 = vmul.f32 %v3639_v3, %v737_v7 }
  0x22   : > { %463 = vst.msk [vmem:[#allocation2 + $0xc8] sm:$0xff] %vm436_vm1, %v3374_v48  ;;  %v705_v11 = vadd.f32 %v673_v2, %v576_v1 }
  0x23   : > { %464 = vst.msk [vmem:[#allocation2 + $0xd0] sm:$0xff] %vm436_vm1, %v3374_v48 }
  0x24   : > { %466 = vst.msk [vmem:[#allocation2 + $0xe0] sm:$0xff] %vm436_vm1, %v3374_v48  ;;  %v802_v19 = vadd.f32 %v770_v12, %v705_v11 }
  0x25   : > { %467 = vst.msk [vmem:[#allocation2 + $0xe8] sm:$0xff] %vm436_vm1, %v3374_v48 }
  0x26   : > { %3141 = vmatmul.msk.bf16.gmra.mxu0 %vm296_vm0, %v273_v16  ;;  %468 = vst.msk [vmem:[#allocation2 + $0xf0] sm:$0xff] %vm436_vm1, %v3374_v48  ;;  %v706_v16 = vadd.f32 %v674_v10, %v577_v9 }
  0x27   : > { %3148 = vmatmul.msk.bf16.gmra.mxu1 %vm296_vm0, %v280_v17  ;;  %3151 = vmatmul.msk.bf16.gmra.mxu3 %vm296_vm0, %v283_v18  ;;  %470 = vst.msk [vmem:[#allocation2 + $0x100] sm:$0xff] %vm436_vm1, %v3374_v48 }
  0x28   : > { %471 = vst.msk [vmem:[#allocation2 + $0x108] sm:$0xff] %vm436_vm1, %v3374_v48 }
  0x29   : > { %472 = vst.msk [vmem:[#allocation2 + $0x110] sm:$0xff] %vm436_vm1, %v3374_v48 }
  0x2a   : > { %474 = vst.msk [vmem:[#allocation2 + $0x120] sm:$0xff] %vm436_vm1, %v3374_v48 }
  0x2b   : > { %475 = vst.msk [vmem:[#allocation2 + $0x128] sm:$0xff] %vm436_vm1, %v3374_v48 }
  0x2c   : > { %476 = vst.msk [vmem:[#allocation2 + $0x130] sm:$0xff] %vm436_vm1, %v3374_v48 }
  0x2d   : > { %478 = vst.msk [vmem:[#allocation2 + $0x140] sm:$0xff] %vm436_vm1, %v3374_v48 }
  0x2e   : > { %479 = vst.msk [vmem:[#allocation2 + $0x148] sm:$0xff] %vm436_vm1, %v3374_v48 }
  0x2f   : > { %480 = vst.msk [vmem:[#allocation2 + $0x150] sm:$0xff] %vm436_vm1, %v3374_v48 }
  0x30   : > { %482 = vst.msk [vmem:[#allocation2 + $0x160] sm:$0xff] %vm436_vm1, %v3374_v48 }
  0x31   : > { %483 = vst.msk [vmem:[#allocation2 + $0x168] sm:$0xff] %vm436_vm1, %v3374_v48 }
  0x32   : > { %484 = vst.msk [vmem:[#allocation2 + $0x170] sm:$0xff] %vm436_vm1, %v3374_v48 }
  0x33   : > { %486 = vst.msk [vmem:[#allocation2 + $0x180] sm:$0xff] %vm436_vm1, %v3374_v48 }
  0x34   : > { %487 = vst.msk [vmem:[#allocation2 + $0x188] sm:$0xff] %vm436_vm1, %v3374_v48 }
  0x35   : > { %488 = vst.msk [vmem:[#allocation2 + $0x190] sm:$0xff] %vm436_vm1, %v3374_v48 }
  0x36   : > { %3142 = vmatmul.msk.bf16.gmra.mxu0 %vm296_vm0, %v274_v25  ;;  %490 = vst.msk [vmem:[#allocation2 + $0x1a0] sm:$0xff] %vm436_vm1, %v3374_v48 }
  0x37   : > { %3149 = vmatmul.msk.bf16.gmra.mxu1 %vm296_vm0, %v281_v26  ;;  %3152 = vmatmul.msk.bf16.gmra.mxu3 %vm296_vm0, %v284_v27  ;;  %491 = vst.msk [vmem:[#allocation2 + $0x1a8] sm:$0xff] %vm436_vm1, %v3374_v48 }
  0x38   : > { %492 = vst.msk [vmem:[#allocation2 + $0x1b0] sm:$0xff] %vm436_vm1, %v3374_v48 }
  0x39   : > { %494 = vst.msk [vmem:[#allocation2 + $0x1c0] sm:$0xff] %vm436_vm1, %v3374_v48 }
  0x3a   : > { %495 = vst.msk [vmem:[#allocation2 + $0x1c8] sm:$0xff] %vm436_vm1, %v3374_v48 }
  0x3b   : > { %496 = vst.msk [vmem:[#allocation2 + $0x1d0] sm:$0xff] %vm436_vm1, %v3374_v48 }
  0x3c   : > { %498 = vst.msk [vmem:[#allocation2 + $0x1e0] sm:$0xff] %vm436_vm1, %v3374_v48 }
  0x3d   : > { %499 = vst.msk [vmem:[#allocation2 + $0x1e8] sm:$0xff] %vm436_vm1, %v3374_v48 }
  0x3e   : > { %500 = vst.msk [vmem:[#allocation2 + $0x1f0] sm:$0xff] %vm436_vm1, %v3374_v48 }
  0x3f   : > { %502 = vst.msk [vmem:[#allocation2 + $0x200] sm:$0xff] %vm436_vm1, %v3374_v48 }
  0x40   : > { %503 = vst.msk [vmem:[#allocation2 + $0x208] sm:$0xff] %vm436_vm1, %v3374_v48 }
  0x41   : > { %504 = vst.msk [vmem:[#allocation2 + $0x210] sm:$0xff] %vm436_vm1, %v3374_v48 }
  0x42   : > { %506 = vst.msk [vmem:[#allocation2 + $0x220] sm:$0xff] %vm436_vm1, %v3374_v48 }
  0x43   : > { %507 = vst.msk [vmem:[#allocation2 + $0x228] sm:$0xff] %vm436_vm1, %v3374_v48 }
  0x44   : > { %508 = vst.msk [vmem:[#allocation2 + $0x230] sm:$0xff] %vm436_vm1, %v3374_v48 }
  0x45   : > { %441 = vst.msk [vmem:[#allocation2 + $0x18] sm:$0x1] %vm440_vm2, %v3374_v48 }
  0x46   : > { %3143 = vmatmul.msk.bf16.gmra.mxu0 %vm296_vm0, %v275_v32  ;;  %445 = vst.msk [vmem:[#allocation2 + $0x38] sm:$0x1] %vm440_vm2, %v3374_v48 }
  0x47   : > { %3153 = vmatmul.msk.bf16.gmra.mxu3 %vm296_vm0, %v285_v33  ;;  %449 = vst.msk [vmem:[#allocation2 + $0x58] sm:$0x1] %vm440_vm2, %v3374_v48 }
  0x48   : > { %453 = vst.msk [vmem:[#allocation2 + $0x78] sm:$0x1] %vm440_vm2, %v3374_v48 }
  0x49   : > { %457 = vst.msk [vmem:[#allocation2 + $0x98] sm:$0x1] %vm440_vm2, %v3374_v48 }
  0x4a   : > { %461 = vst.msk [vmem:[#allocation2 + $0xb8] sm:$0x1] %vm440_vm2, %v3374_v48 }
  0x4b   : > { %465 = vst.msk [vmem:[#allocation2 + $0xd8] sm:$0x1] %vm440_vm2, %v3374_v48 }
  0x4c   : > { %469 = vst.msk [vmem:[#allocation2 + $0xf8] sm:$0x1] %vm440_vm2, %v3374_v48  ;;  %v738_v14 = vld [vmem:[#allocation2 + $0x11] sm:$0xff] }
  0x4d   : > { %473 = vst.msk [vmem:[#allocation2 + $0x118] sm:$0x1] %vm440_vm2, %v3374_v48  ;;  %v771_v17 = vmul.f32 %v3639_v3, %v738_v14 }
  0x4e   : > { %477 = vst.msk [vmem:[#allocation2 + $0x138] sm:$0x1] %vm440_vm2, %v3374_v48 }
  0x4f   : > { %481 = vst.msk [vmem:[#allocation2 + $0x158] sm:$0x1] %vm440_vm2, %v3374_v48  ;;  %v803_v27 = vadd.f32 %v771_v17, %v706_v16 }
  0x50   : > { %485 = vst.msk [vmem:[#allocation2 + $0x178] sm:$0x1] %vm440_vm2, %v3374_v48 }
  0x51   : > { %489 = vst.msk [vmem:[#allocation2 + $0x198] sm:$0x1] %vm440_vm2, %v3374_v48 }
  0x52   : > { %493 = vst.msk [vmem:[#allocation2 + $0x1b8] sm:$0x1] %vm440_vm2, %v3374_v48 }
  0x53   : > { %497 = vst.msk [vmem:[#allocation2 + $0x1d8] sm:$0x1] %vm440_vm2, %v3374_v48 }
  0x54   : > { %501 = vst.msk [vmem:[#allocation2 + $0x1f8] sm:$0x1] %vm440_vm2, %v3374_v48 }
  0x55   : > { %505 = vst.msk [vmem:[#allocation2 + $0x218] sm:$0x1] %vm440_vm2, %v3374_v48 }
  0x56   : > { %3144 = vmatmul.msk.bf16.gmra.mxu0 %vm296_vm0, %v276_v38  ;;  %509 = vst.msk [vmem:[#allocation2 + $0x238] sm:$0x1] %vm440_vm2, %v3374_v48 }
  0x57   : > { %3154 = vmatmul.msk.bf16.gmra.mxu3 %vm296_vm0, %v286_v39 }
  0x66   : > { %3145 = vmatmul.msk.bf16.gmra.mxu0 %vm296_vm0, %v277_v44 }
  0x67   : > { %3155 = vmatmul.msk.bf16.gmra.mxu3 %vm296_vm0, %v287_v45 }
  0x76   : > { %3146 = vmatmul.msk.bf16.gmra.mxu0 %vm296_vm0, %v278_v49  ;;  %v3693_v49 = vperm.slane %v435_v40, 0 }
  0x93   : > { %v354_v50 = vpop.f32.mrf.mxu0 }
  0x94   : > { %511 = vst.msk [vmem:[#allocation2 + $0x28] sm:$0xff] %vm436_vm1, %v354_v50  ;;  %v389_v51 = vpop.f32.mrf.mxu1 }
  0x95   : > { %525 = vst.msk [vmem:[#allocation2 + $0x108] sm:$0xff] %vm436_vm1, %v389_v51 }
  0x9a   : > { %v404_v56 = vpop.f32.mrf.mxu3 }
  0x9b   : > { %v356_v52 = vpop.f32.mrf.mxu0  ;;  %v545_v15 = vld [vmem:[#allocation2 + $0x27] sm:$0xff]  ;;  %531 = vst.msk [vmem:[#allocation2 + $0x168] sm:$0xff] %vm436_vm1, %v404_v56 }
  0x9c   : > { %v391_v53 = vpop.f32.mrf.mxu1  ;;  %512 = vst.msk [vmem:[#allocation2 + $0x30] sm:$0xff] %vm436_vm1, %v356_v52  ;;  %v867_v20 = vmul.f32 %v3652_v13, %v545_v15  ;;  %v642_v25 = vld [vmem:[#allocation2 + $0x28] sm:$0xff]  ;;  %v578_v52 = vmul.f32 %v3623_v60, %v545_v15 }
  0x9d   : > { %526 = vst.msk [vmem:[#allocation2 + $0x110] sm:$0xff] %vm436_vm1, %v391_v53  ;;  %v964_v33 = vmul.f32 %v3663_v22, %v642_v25  ;;  %v559_v42 = vld [vmem:[#allocation2 + $0x107] sm:$0xff]  ;;  %v675_v53 = vmul.f32 %v3626_v61, %v642_v25 }
  0x9e   : > { %v899_v29 = vadd.f32 %v867_v20, %v802_v19  ;;  %v656_v46 = vld [vmem:[#allocation2 + $0x108] sm:$0xff]  ;;  %v3727_v25 = vmul.f32 %v3652_v13, %v559_v42 }
  0x9f   : > { %v707_v9 = vadd.f32 %v675_v53, %v578_v52 }
  0xa0   : > { %v996_v37 = vadd.f32 %v964_v33, %v899_v29  ;;  %5498 = vst [vmem:[#allocation7_spill] sm:$0xff] %v3727_v25 }
  0xa2   : > { %v406_v0 = vpop.f32.mrf.mxu3 }
  0xa3   : > { %v359_v54 = vpop.f32.mrf.mxu0  ;;  %v546_v21 = vld [vmem:[#allocation2 + $0x2f] sm:$0xff]  ;;  %532 = vst.msk [vmem:[#allocation2 + $0x170] sm:$0xff] %vm436_vm1, %v406_v0 }
  0xa4   : > { %v394_v55 = vpop.f32.mrf.mxu1  ;;  %513 = vst.msk [vmem:[#allocation2 + $0x48] sm:$0xff] %vm436_vm1, %v359_v54  ;;  %v739_v26 = vld [vmem:[#allocation2 + $0x29] sm:$0xff]  ;;  %v868_v28 = vmul.f32 %v3652_v13, %v546_v21  ;;  %v740_v44 = vld [vmem:[#allocation2 + $0x31] sm:$0xff]  ;;  %v592_v54 = vmul.f32 %v3623_v60, %v559_v42 }
  0xa5   : > { %527 = vst.msk [vmem:[#allocation2 + $0x128] sm:$0xff] %vm436_vm1, %v394_v55  ;;  %v643_v34 = vld [vmem:[#allocation2 + $0x30] sm:$0xff]  ;;  %v1061_v35 = vmul.f32 %v3666_v23, %v739_v26  ;;  %v1062_v55 = vmul.f32 %v3666_v23, %v740_v44  ;;  %v772_v10 = vmul.f32 %v3639_v3, %v739_v26  ;;  %v3730_v26 = vmul.f32 %v3663_v22, %v656_v46 }
  0xa6   : > { %v900_v36 = vadd.f32 %v868_v28, %v803_v27  ;;  %v965_v39 = vmul.f32 %v3663_v22, %v643_v34  ;;  %v676_v59 = vmul.f32 %v3626_v61, %v643_v34  ;;  %v560_v1 = vld [vmem:[#allocation2 + $0x10f] sm:$0xff]  ;;  %v3733_v27 = vmul.f32 %v3672_v30, %v559_v42 }
  0xa7   : > { %v1093_v45 = vadd.f32 %v1061_v35, %v996_v37  ;;  %v657_v4 = vld [vmem:[#allocation2 + $0x110] sm:$0xff]  ;;  %v593_v16 = vmul.f32 %v3623_v60, %v560_v1  ;;  %5499 = vst [vmem:[#allocation8_spill] sm:$0xff] %v3730_v26  ;;  %v773_v28 = vmul.f32 %v3639_v3, %v740_v44  ;;  %v804_v33 = vadd.f32 %v772_v10, %v707_v9 }
  0xa8   : > { %v997_v47 = vadd.f32 %v965_v39, %v900_v36  ;;  %v753_v5 = vld [vmem:[#allocation2 + $0x109] sm:$0xff]  ;;  %5500 = vst [vmem:[#allocation9_spill] sm:$0xff] %v3733_v27  ;;  %v754_v29 = vld [vmem:[#allocation2 + $0x111] sm:$0xff]  ;;  %v3790_v9 = vmul.f32 %v3688_v43, %v657_v4 }
  0xa9   : > { %v786_v19 = vmul.f32 %v3639_v3, %v753_v5  ;;  %v787_v40 = vmul.f32 %v3639_v3, %v754_v29  ;;  %v3793_v10 = vmul.f32 %v3693_v49, %v753_v5 }
  0xaa   : > { %v409_v18 = vpop.f32.mrf.mxu3  ;;  %v1094_v0 = vadd.f32 %v1062_v55, %v997_v47  ;;  %5508 = vst [vmem:[#allocation17_spill] sm:$0xff] %v3790_v9 }
  0xab   : > { %v361_v57 = vpop.f32.mrf.mxu0  ;;  %533 = vst.msk [vmem:[#allocation2 + $0x188] sm:$0xff] %vm436_vm1, %v409_v18  ;;  %v3675_v32 = vld [vmem:[#allocation2 + $0x47] sm:$0xff]  ;;  %v690_v18 = vmul.f32 %v3626_v61, %v657_v4 }
  0xac   : > { %v396_v58 = vpop.f32.mrf.mxu1  ;;  %514 = vst.msk [vmem:[#allocation2 + $0x50] sm:$0xff] %vm436_vm1, %v361_v57  ;;  %v1159_v38 = vmul.f32 %v3672_v30, %v3675_v32  ;;  %v3691_v48 = vld [vmem:[#allocation2 + $0x48] sm:$0xff]  ;;  %v689_v57 = vmul.f32 %v3626_v61, %v656_v46  ;;  %v869_v47 = vmul.f32 %v3652_v13, %v3675_v32 }
  0xad   : > { %528 = vst.msk [vmem:[#allocation2 + $0x130] sm:$0xff] %vm436_vm1, %v396_v58  ;;  %v579_v58 = vmul.f32 %v3623_v60, %v546_v21  ;;  %v1256_v62 = vmul.f32 %v3688_v43, %v3691_v48  ;;  %v561_v34 = vld [vmem:[#allocation2 + $0x127] sm:$0xff]  ;;  %v722_v39 = vadd.f32 %v690_v18, %v593_v16  ;;  %v966_v16 = vmul.f32 %v3663_v22, %v3691_v48 }
  0xae   : > { %v1191_v50 = vadd.f32 %v1159_v38, %v1093_v45  ;;  %v721_v14 = vadd.f32 %v689_v57, %v592_v54  ;;  %v3747_v38 = vmul.f32 %v3652_v13, %v560_v1  ;;  %v658_v42 = vld [vmem:[#allocation2 + $0x128] sm:$0xff]  ;;  %v580_v45 = vmul.f32 %v3623_v60, %v3675_v32  ;;  %5509 = vst [vmem:[#allocation18_spill] sm:$0xff] %v3793_v10 }
  0xaf   : > { %v708_v15 = vadd.f32 %v676_v59, %v579_v58  ;;  %v691_v57 = vmul.f32 %v3626_v61, %v658_v42  ;;  %v883_v58 = vmul.f32 %v3652_v13, %v561_v34 }
  0xb0   : > { %5503 = vst [vmem:[#allocation12_spill] sm:$0xff] %v3747_v38 }
  0xb1   : > { %v805_v37 = vadd.f32 %v773_v28, %v708_v15  ;;  %v901_v15 = vadd.f32 %v869_v47, %v804_v33  ;;  %v565_v28 = vld [vmem:[#allocation2 + $0x167] sm:$0xff] }
  0xb2   : > { %v411_v41 = vpop.f32.mrf.mxu3 }
  0xb3   : > { %v364_v6 = vpop.f32.mrf.mxu0  ;;  %534 = vst.msk [vmem:[#allocation2 + $0x190] sm:$0xff] %vm436_vm1, %v411_v41  ;;  %v3695_v51 = vld [vmem:[#allocation2 + $0x4f] sm:$0xff]  ;;  %v818_v41 = vadd.f32 %v786_v19, %v721_v14 }
  0xb4   : > { %v399_v8 = vpop.f32.mrf.mxu1  ;;  %515 = vst.msk [vmem:[#allocation2 + $0x68] sm:$0xff] %vm436_vm1, %v364_v6  ;;  %v3701_v56 = vld [vmem:[#allocation2 + $0x49] sm:$0xff]  ;;  %v1160_v2 = vmul.f32 %v3672_v30, %v3695_v51  ;;  %v1288_v6 = vadd.f32 %v1256_v62, %v1191_v50  ;;  %v3712_v7 = vld [vmem:[#allocation2 + $0x51] sm:$0xff]  ;;  %v594_v50 = vmul.f32 %v3623_v60, %v561_v34  ;;  %v3776_v62 = vmul.f32 %v3663_v22, %v657_v4 }
  0xb5   : > { %529 = vst.msk [vmem:[#allocation2 + $0x148] sm:$0xff] %vm436_vm1, %v399_v8  ;;  %v3708_v63 = vld [vmem:[#allocation2 + $0x50] sm:$0xff]  ;;  %v1353_v8 = vmul.f32 %v3693_v49, %v3701_v56  ;;  %v1354_v21 = vmul.f32 %v3693_v49, %v3712_v7  ;;  %v915_v19 = vadd.f32 %v883_v58, %v818_v41 }
  0xb6   : > { %v1192_v11 = vadd.f32 %v1160_v2, %v1094_v0  ;;  %v1257_v12 = vmul.f32 %v3688_v43, %v3708_v63  ;;  %5504 = vst [vmem:[#allocation13_spill] sm:$0xff] %v3776_v62  ;;  %v3779_v0 = vmul.f32 %v3666_v23, %v753_v5  ;;  %v3782_v2 = vmul.f32 %v3666_v23, %v754_v29  ;;  %v3800_v18 = vld [vmem:[#allocation2 + $0x12f] sm:$0xff]  ;;  %v567_v62 = vld [vmem:[#allocation2 + $0x187] sm:$0xff] }
  0xb7   : > { %v3720_v17 = vadd.f32 %v1353_v8, %v1288_v6  ;;  %v870_v6 = vmul.f32 %v3652_v13, %v3695_v51  ;;  %v3787_v8 = vmul.f32 %v3672_v30, %v560_v1  ;;  %v3802_v1 = vld [vmem:[#allocation2 + $0x130] sm:$0xff]  ;;  %v723_v4 = vadd.f32 %v691_v57, %v594_v50 }
  0xb8   : > { %v1289_v20 = vadd.f32 %v1257_v12, %v1192_v11  ;;  %5505 = vst [vmem:[#allocation14_spill] sm:$0xff] %v3779_v0  ;;  %v3796_v11 = vmul.f32 %v3693_v49, %v754_v29  ;;  %v819_v12 = vadd.f32 %v787_v40, %v722_v39  ;;  %v980_v5 = vmul.f32 %v3663_v22, %v658_v42  ;;  %v3827_v50 = vld [vmem:[#allocation2 + $0x131] sm:$0xff] }
  0xb9   : > { %5497 = vst [vmem:[#allocation6_spill] sm:$0xff] %v3720_v17  ;;  %v3744_v36 = vmul.f32 %v3720_v17, %v3720_v17  ;;  %v678_v29 = vmul.f32 %v3626_v61, %v3708_v63  ;;  %v902_v33 = vadd.f32 %v870_v6, %v805_v37  ;;  %v598_v40 = vmul.f32 %v3623_v60, %v565_v28 }
  0xba   : > { %v3740_v35 = vadd.f32 %v1354_v21, %v1289_v20  ;;  %5506 = vst [vmem:[#allocation15_spill] sm:$0xff] %v3782_v2  ;;  %v3806_v20 = vmul.f32 %v3672_v30, %v561_v34  ;;  %v662_v21 = vld [vmem:[#allocation2 + $0x168] sm:$0xff]  ;;  %v1063_v34 = vmul.f32 %v3666_v23, %v3701_v56  ;;  %v595_v41 = vmul.f32 %v3623_v60, %v3800_v18 }
  0xbb   : > { %v366_v24 = vpop.f32.mrf.mxu0  ;;  %v1452_v52 = vsel %vm1451_vm3, %v3744_v36, 0.0  ;;  %v2180_v54 = vsel %vm2179_vm4, %v3744_v36, 0.0  ;;  %5507 = vst [vmem:[#allocation16_spill] sm:$0xff] %v3787_v8  ;;  %v3815_v39 = vld [vmem:[#allocation2 + $0x67] sm:$0xff]  ;;  %v695_v47 = vmul.f32 %v3626_v61, %v662_v21  ;;  %v967_v37 = vmul.f32 %v3663_v22, %v3708_v63 }
  0xbc   : > { %v401_v31 = vpop.f32.mrf.mxu1  ;;  %516 = vst.msk [vmem:[#allocation2 + $0x70] sm:$0xff] %vm436_vm1, %v366_v24  ;;  %v3752_v44 = vmul.f32 %v3740_v35, %v3740_v35  ;;  %v1161_v57 = vmul.f32 %v3672_v30, %v3815_v39  ;;  %v774_v63 = vmul.f32 %v3639_v3, %v3701_v56  ;;  %v1064_v17 = vmul.f32 %v3666_v23, %v3712_v7 }
  0xbd   : > { %530 = vst.msk [vmem:[#allocation2 + $0x150] sm:$0xff] %vm436_vm1, %v401_v31  ;;  %v3738_v31 = vmul.f32 %v3688_v43, %v656_v46  ;;  %v677_v46 = vmul.f32 %v3626_v61, %v3691_v48  ;;  %v581_v48 = vmul.f32 %v3623_v60, %v3695_v51  ;;  %v998_v51 = vadd.f32 %v966_v16, %v901_v15 }
  0xbe   : > { %5502 = vst [vmem:[#allocation11_spill] sm:$0xff] %v3740_v35  ;;  %v1453_v53 = vsel %vm1451_vm3, %v3752_v44, 0.0  ;;  %v2181_v55 = vsel %vm2179_vm4, %v3752_v44, 0.0  ;;  %v999_v6 = vadd.f32 %v967_v37, %v902_v33  ;;  %v775_v16 = vmul.f32 %v3639_v3, %v3712_v7 }
  0xbf   : > { %5501 = vst [vmem:[#allocation10_spill] sm:$0xff] %v3738_v31  ;;  %v3771_v59 = vadd.f32 %v1453_v53, %v1452_v52  ;;  %v3773_v32 = vadd.f32 %v2181_v55, %v2180_v54  ;;  %v709_v14 = vadd.f32 %v677_v46, %v580_v45  ;;  %v755_v45 = vld [vmem:[#allocation2 + $0x129] sm:$0xff]  ;;  %v414_v46 = vpop.f32.mrf.mxu3  ;;  %v884_v52 = vmul.f32 %v3652_v13, %v3800_v18 }
  0xc0   : > { %5510 = vst [vmem:[#allocation19_spill] sm:$0xff] %v3796_v11  ;;  %v1012_v53 = vadd.f32 %v980_v5, %v915_v19  ;;  %v3833_v54 = vmul.f32 %v3652_v13, %v565_v28  ;;  %v3836_v55 = vmul.f32 %v3663_v22, %v662_v21  ;;  %v710_v58 = vadd.f32 %v678_v29, %v581_v48  ;;  %v3852_v29 = vld [vmem:[#allocation2 + $0x68] sm:$0xff] }
  0xc1   : > { %5511 = vst [vmem:[#allocation20_spill] sm:$0xff] %v3806_v20  ;;  %v788_v15 = vmul.f32 %v3639_v3, %v755_v45  ;;  %v1095_v19 = vadd.f32 %v1063_v34, %v998_v51  ;;  %v916_v11 = vadd.f32 %v884_v52, %v819_v12  ;;  %v981_v48 = vmul.f32 %v3663_v22, %v3802_v1 }
  0xc2   : > { %535 = vst.msk [vmem:[#allocation2 + $0x1a8] sm:$0xff] %vm436_vm1, %v414_v46  ;;  %v789_v46 = vmul.f32 %v3639_v3, %v3827_v50  ;;  %v1077_v56 = vmul.f32 %v3666_v23, %v755_v45  ;;  %v3855_v33 = vadd.f32 %v695_v47, %v598_v40  ;;  %v3858_v34 = vmul.f32 %v3672_v30, %v565_v28 }
  0xc3   : > { %v369_v24 = vpop.f32.mrf.mxu0  ;;  %v3863_v7 = vld [vmem:[#allocation2 + $0x6f] sm:$0xff]  ;;  %v3865_v12 = vadd.f32 %v774_v63, %v709_v14  ;;  %v3867_v51 = vadd.f32 %v775_v16, %v710_v58  ;;  %v1096_v37 = vadd.f32 %v1064_v17, %v999_v6  ;;  %v3869_v52 = vadd.f32 %v788_v15, %v723_v4 }
  0xc4   : > { %517 = vst.msk [vmem:[#allocation2 + $0x88] sm:$0xff] %vm436_vm1, %v369_v24  ;;  %v3809_v24 = vmul.f32 %v3688_v43, %v658_v42  ;;  %v692_v42 = vmul.f32 %v3626_v61, %v3802_v1  ;;  %v2067_v28 = vsel %vm2066_vm6, %v3744_v36, 0.0  ;;  %v1258_v40 = vmul.f32 %v3688_v43, %v3852_v29  ;;  %v3881_v14 = vld [vmem:[#allocation2 + $0x70] sm:$0xff] }
  0xc5   : > { %v1013_v47 = vadd.f32 %v981_v48, %v916_v11  ;;  %v1078_v17 = vmul.f32 %v3666_v23, %v3827_v50  ;;  %v3885_v4 = vadd.f32 %v1077_v56, %v1012_v53  ;;  %v1162_v58 = vmul.f32 %v3672_v30, %v3863_v7  ;;  %v3893_v15 = vld [vmem:[#allocation2 + $0x71] sm:$0xff] }
  0xc6   : > { %5512 = vst [vmem:[#allocation21_spill] sm:$0xff] %v3809_v24  ;;  %v724_v5 = vadd.f32 %v692_v42, %v595_v41  ;;  %v3861_v41 = vmul.f32 %v3688_v43, %v662_v21  ;;  %v1193_v42 = vadd.f32 %v1161_v57, %v1095_v19  ;;  %v3871_v24 = vld [vmem:[#allocation2 + $0x69] sm:$0xff]  ;;  %v2068_v63 = vsel %vm2066_vm6, %v3752_v44, 0.0  ;;  %v758_v38 = vld [vmem:[#allocation2 + $0x151] sm:$0xff] }
  0xc7   : > { %v663_v57 = vld [vmem:[#allocation2 + $0x170] sm:$0xff]  ;;  %v1355_v11 = vmul.f32 %v3693_v49, %v3871_v24  ;;  %v3899_v53 = vmul.f32 %v3672_v30, %v3800_v18  ;;  %v3903_v16 = vmul.f32 %v3688_v43, %v3802_v1  ;;  %v3908_v48 = vmul.f32 %v3693_v49, %v755_v45  ;;  %v416_v9 = vpop.f32.mrf.mxu3 }
  0xc8   : > { %v3877_v21 = vadd.f32 %v789_v46, %v724_v5  ;;  %v1290_v6 = vadd.f32 %v1258_v40, %v1193_v42  ;;  %v566_v19 = vld [vmem:[#allocation2 + $0x16f] sm:$0xff]  ;;  %v1194_v46 = vadd.f32 %v1162_v58, %v1096_v37  ;;  %v696_v42 = vmul.f32 %v3626_v61, %v663_v57  ;;  %536 = vst.msk [vmem:[#allocation2 + $0x1b0] sm:$0xff] %vm436_vm1, %v416_v9 }
  0xc9   : > { %5513 = vst [vmem:[#allocation22_spill] sm:$0xff] %v3899_v53  ;;  %v759_v5 = vld [vmem:[#allocation2 + $0x169] sm:$0xff]  ;;  %v599_v56 = vmul.f32 %v3623_v60, %v566_v19  ;;  %v760_v40 = vld [vmem:[#allocation2 + $0x171] sm:$0xff]  ;;  %v3916_v1 = vadd.f32 %v2068_v63, %v2067_v28  ;;  %v1356_v37 = vmul.f32 %v3693_v49, %v3893_v15  ;;  %v3921_v45 = vadd.f32 %v1078_v17, %v1013_v47 }
  0xca   : > { %5514 = vst [vmem:[#allocation23_spill] sm:$0xff] %v3903_v16  ;;  %v3912_v18 = vadd.f32 %v1355_v11, %v1290_v6  ;;  %v3925_v58 = vmul.f32 %v3693_v49, %v3827_v50  ;;  %v792_v6 = vmul.f32 %v3639_v3, %v759_v5  ;;  %v563_v11 = vld [vmem:[#allocation2 + $0x147] sm:$0xff]  ;;  %v793_v28 = vmul.f32 %v3639_v3, %v760_v40  ;;  %v564_v17 = vld [vmem:[#allocation2 + $0x14f] sm:$0xff] }
  0xcb   : > { %v371_v35 = vpop.f32.mrf.mxu0  ;;  %5515 = vst [vmem:[#allocation24_spill] sm:$0xff] %v3908_v48  ;;  %v3937_v9 = vmul.f32 %v3663_v22, %v663_v57  ;;  %v728_v50 = vadd.f32 %v696_v42, %v599_v56  ;;  %v3942_v63 = vmul.f32 %v3666_v23, %v759_v5  ;;  %v3958_v42 = vmul.f32 %v3672_v30, %v566_v19  ;;  %v660_v48 = vld [vmem:[#allocation2 + $0x148] sm:$0xff] }
  0xcc   : > { %518 = vst.msk [vmem:[#allocation2 + $0x90] sm:$0xff] %vm436_vm1, %v371_v35  ;;  %v1565_v35 = vsel %vm1564_vm5, %v3744_v36, 0.0  ;;  %v1566_v36 = vsel %vm1564_vm5, %v3752_v44, 0.0  ;;  %v1259_v44 = vmul.f32 %v3688_v43, %v3881_v14  ;;  %v886_v20 = vmul.f32 %v3652_v13, %v564_v17 }
  0xcd   : > { %5516 = vst [vmem:[#allocation25_spill] sm:$0xff] %v3912_v18  ;;  %v3914_v53 = vadd.f32 %v1566_v36, %v1565_v35  ;;  %v3930_v35 = vmul.f32 %v3912_v18, %v3912_v18  ;;  %v3934_v36 = vmul.f32 %v3652_v13, %v566_v19  ;;  %v3949_v18 = vmul.f32 %v3666_v23, %v760_v40  ;;  %v661_v19 = vld [vmem:[#allocation2 + $0x150] sm:$0xff] }
  0xce   : > { %v1291_v16 = vadd.f32 %v1259_v44, %v1194_v46  ;;  %5517 = vst [vmem:[#allocation26_spill] sm:$0xff] %v3925_v58  ;;  %v885_v58 = vmul.f32 %v3652_v13, %v563_v11  ;;  %v824_v8 = vadd.f32 %v792_v6, %v3855_v33  ;;  %v582_v2 = vmul.f32 %v3623_v60, %v3815_v39 }
  0xcf   : > { %v1455_v46 = vsel %vm1451_vm3, %v3930_v35, 0.0  ;;  %v2183_v44 = vsel %vm2179_vm4, %v3930_v35, 0.0  ;;  %5519 = vst [vmem:[#allocation28_spill] sm:$0xff] %v3949_v18  ;;  %v1175_v31 = vmul.f32 %v3672_v30, %v563_v11  ;;  %v3979_v33 = vmul.f32 %v3688_v43, %v663_v57 }
  0xd0   : > { %v3939_v47 = vadd.f32 %v1356_v37, %v1291_v16  ;;  %v1456_v56 = vadd.f32 %v1455_v46, %v3771_v59  ;;  %v871_v37 = vmul.f32 %v3652_v13, %v3815_v39  ;;  %v2184_v10 = vadd.f32 %v2183_v44, %v3773_v32 }
  0xd1   : > { %v679_v46 = vmul.f32 %v3626_v61, %v3852_v29  ;;  %v3982_v39 = vmul.f32 %v3693_v49, %v759_v5  ;;  %v917_v6 = vadd.f32 %v885_v58, %v3869_v52  ;;  %v982_v0 = vmul.f32 %v3663_v22, %v660_v48 }
  0xd2   : > { %5518 = vst [vmem:[#allocation27_spill] sm:$0xff] %v3939_v47  ;;  %v3954_v16 = vmul.f32 %v3939_v47, %v3939_v47  ;;  %v3987_v27 = vmul.f32 %v3693_v49, %v760_v40  ;;  %v903_v26 = vadd.f32 %v871_v37, %v3865_v12  ;;  %v968_v5 = vmul.f32 %v3663_v22, %v3852_v29 }
  0xd3   : > { %v374_v57 = vpop.f32.mrf.mxu0  ;;  %v596_v52 = vmul.f32 %v3623_v60, %v563_v11  ;;  %v693_v58 = vmul.f32 %v3626_v61, %v660_v48  ;;  %v711_v40 = vadd.f32 %v679_v46, %v582_v2  ;;  %v1207_v12 = vadd.f32 %v1175_v31, %v3885_v4  ;;  %v419_v46 = vpop.f32.mrf.mxu3 }
  0xd4   : > { %v1457_v47 = vsel %vm1451_vm3, %v3954_v16, 0.0  ;;  %v2185_v59 = vsel %vm2179_vm4, %v3954_v16, 0.0  ;;  %519 = vst.msk [vmem:[#allocation2 + $0xa8] sm:$0xff] %vm436_vm1, %v374_v57  ;;  %v889_v37 = vmul.f32 %v3652_v13, %v567_v62  ;;  %v1000_v25 = vadd.f32 %v968_v5, %v903_v26 }
  0xd5   : > { %v3974_v32 = vadd.f32 %v1457_v47, %v1456_v56  ;;  %v3976_v44 = vadd.f32 %v2185_v59, %v2184_v10  ;;  %v757_v47 = vld [vmem:[#allocation2 + $0x149] sm:$0xff]  ;;  %v918_v10 = vadd.f32 %v886_v20, %v3877_v21  ;;  %v983_v56 = vmul.f32 %v3663_v22, %v661_v19  ;;  %537 = vst.msk [vmem:[#allocation2 + $0x1c8] sm:$0xff] %vm436_vm1, %v419_v46 }
  0xd6   : > { %v3992_v59 = vadd.f32 %v793_v28, %v728_v50  ;;  %v1272_v20 = vmul.f32 %v3688_v43, %v660_v48  ;;  %v664_v21 = vld [vmem:[#allocation2 + $0x188] sm:$0xff]  ;;  %v1014_v28 = vadd.f32 %v982_v0, %v917_v6  ;;  %v600_v50 = vmul.f32 %v3623_v60, %v567_v62 }
  0xd7   : > { %5520 = vst [vmem:[#allocation29_spill] sm:$0xff] %v3974_v32  ;;  %v697_v29 = vmul.f32 %v3626_v61, %v664_v21  ;;  %v1079_v11 = vmul.f32 %v3666_v23, %v757_v47  ;;  %v1080_v32 = vmul.f32 %v3666_v23, %v758_v38  ;;  %v1176_v2 = vmul.f32 %v3672_v30, %v564_v17 }
  0xd8   : > { %5521 = vst [vmem:[#allocation30_spill] sm:$0xff] %v3976_v44  ;;  %v1015_v44 = vadd.f32 %v983_v56, %v918_v10  ;;  %v725_v31 = vadd.f32 %v693_v58, %v596_v52  ;;  %v986_v4 = vmul.f32 %v3663_v22, %v664_v21  ;;  %v597_v48 = vmul.f32 %v3623_v60, %v564_v17 }
  0xd9   : > { %v694_v0 = vmul.f32 %v3626_v61, %v661_v19  ;;  %v1304_v6 = vadd.f32 %v1272_v20, %v1207_v12  ;;  %v921_v57 = vadd.f32 %v889_v37, %v824_v8  ;;  %v4012_v18 = vmul.f32 %v3672_v30, %v567_v62 }
  0xda   : > { %v4015_v26 = vmul.f32 %v3688_v43, %v664_v21  ;;  %v4017_v10 = vadd.f32 %v697_v29, %v600_v50  ;;  %v872_v56 = vmul.f32 %v3652_v13, %v3863_v7  ;;  %v790_v5 = vmul.f32 %v3639_v3, %v757_v47 }
  0xdb   : > { %v1111_v17 = vadd.f32 %v1079_v11, %v1014_v28  ;;  %v583_v52 = vmul.f32 %v3623_v60, %v3863_v7  ;;  %v1112_v58 = vadd.f32 %v1080_v32, %v1015_v44  ;;  %v1208_v8 = vadd.f32 %v1176_v2, %v3921_v45  ;;  %v376_v12 = vpop.f32.mrf.mxu0 }
  0xdc   : > { %v1273_v62 = vmul.f32 %v3688_v43, %v661_v19  ;;  %v680_v20 = vmul.f32 %v3626_v61, %v3881_v14  ;;  %v776_v21 = vmul.f32 %v3639_v3, %v3871_v24  ;;  %v726_v37 = vadd.f32 %v694_v0, %v597_v48  ;;  %520 = vst.msk [vmem:[#allocation2 + $0xb0] sm:$0xff] %vm436_vm1, %v376_v12 }
  0xdd   : > { %v791_v50 = vmul.f32 %v3639_v3, %v758_v38  ;;  %v4032_v28 = vadd.f32 %v986_v4, %v921_v57  ;;  %v777_v7 = vmul.f32 %v3639_v3, %v3893_v15  ;;  %v1065_v45 = vmul.f32 %v3666_v23, %v3871_v24  ;;  %v568_v57 = vld [vmem:[#allocation2 + $0x18f] sm:$0xff] }
  0xde   : > { %v1369_v19 = vmul.f32 %v3693_v49, %v757_v47  ;;  %v904_v32 = vadd.f32 %v872_v56, %v3867_v51  ;;  %v969_v44 = vmul.f32 %v3663_v22, %v3881_v14  ;;  %v822_v29 = vadd.f32 %v790_v5, %v725_v31  ;;  %v4051_v14 = vld [vmem:[#allocation2 + $0x190] sm:$0xff]  ;;  %v421_v56 = vpop.f32.mrf.mxu3 }
  0xdf   : > { %v1209_v11 = vadd.f32 %v3858_v34, %v1111_v17  ;;  %v1066_v2 = vmul.f32 %v3666_v23, %v3893_v15  ;;  %v1210_v46 = vadd.f32 %v3958_v42, %v1112_v58  ;;  %v1305_v4 = vadd.f32 %v1273_v62, %v1208_v8  ;;  %538 = vst.msk [vmem:[#allocation2 + $0x1d0] sm:$0xff] %vm436_vm1, %v421_v56  ;;  %v4071_v62 = vld [vmem:[#allocation2 + $0x189] sm:$0xff] }
  0xe0   : > { %v1370_v48 = vmul.f32 %v3693_v49, %v758_v38  ;;  %v712_v0 = vadd.f32 %v680_v20, %v583_v52  ;;  %v4047_v24 = vadd.f32 %v776_v21, %v711_v40  ;;  %v1568_v51 = vsel %vm1564_vm5, %v3930_v35, 0.0  ;;  %v4062_v52 = vld [vmem:[#allocation2 + $0x87] sm:$0xff]  ;;  %v4140_v56 = vld [vmem:[#allocation2 + $0x90] sm:$0xff] }
  0xe1   : > { %v823_v47 = vadd.f32 %v791_v50, %v726_v37  ;;  %v1097_v31 = vadd.f32 %v1065_v45, %v1000_v25  ;;  %v4053_v34 = vadd.f32 %v1369_v19, %v1304_v6  ;;  %v601_v15 = vmul.f32 %v3623_v60, %v568_v57 }
  0xe2   : > { %v698_v42 = vmul.f32 %v3626_v61, %v4051_v14  ;;  %v1001_v38 = vadd.f32 %v969_v44, %v904_v32  ;;  %v2070_v40 = vsel %vm2066_vm6, %v3930_v35, 0.0  ;;  %v919_v5 = vadd.f32 %v3833_v54, %v822_v29  ;;  %v4073_v35 = vld [vmem:[#allocation2 + $0x191] sm:$0xff] }
  0xe3   : > { %5522 = vst [vmem:[#allocation31_spill] sm:$0xff] %v4053_v34  ;;  %v1306_v17 = vadd.f32 %v3861_v41, %v1209_v11  ;;  %v1569_v25 = vadd.f32 %v1568_v51, %v3914_v53  ;;  %v1570_v6 = vsel %vm1564_vm5, %v3954_v16, 0.0  ;;  %v1307_v58 = vadd.f32 %v3979_v33, %v1210_v46 }
  0xe4   : > { %v4069_v8 = vadd.f32 %v1370_v48, %v1305_v4  ;;  %v2072_v54 = vsel %vm2066_vm6, %v3954_v16, 0.0  ;;  %v920_v41 = vadd.f32 %v3934_v36, %v823_v47  ;;  %v794_v12 = vmul.f32 %v3639_v3, %v4071_v62  ;;  %v4117_v48 = vld [vmem:[#allocation2 + $0x8f] sm:$0xff] }
  0xe5   : > { %v795_v53 = vmul.f32 %v3639_v3, %v4073_v35  ;;  %v1435_v33 = vmul.f32 %v4053_v34, %v4053_v34  ;;  %v730_v20 = vadd.f32 %v698_v42, %v601_v15  ;;  %v890_v21 = vmul.f32 %v3652_v13, %v568_v57  ;;  %v4128_v47 = vld [vmem:[#allocation2 + $0x89] sm:$0xff] }
  0xe6   : > { %5523 = vst [vmem:[#allocation32_spill] sm:$0xff] %v4069_v8  ;;  %v1163_v37 = vmul.f32 %v3672_v30, %v4062_v52  ;;  %v4087_v50 = vadd.f32 %v777_v7, %v712_v0  ;;  %v2071_v16 = vadd.f32 %v2070_v40, %v3916_v1  ;;  %v1016_v36 = vadd.f32 %v3836_v55, %v919_v5  ;;  %v569_v34 = vld [vmem:[#allocation2 + $0x1a7] sm:$0xff] }
  0xe7   : > { %v4092_v45 = vadd.f32 %v3982_v39, %v1306_v17  ;;  %v1098_v19 = vadd.f32 %v1066_v2, %v1001_v38  ;;  %v4094_v32 = vadd.f32 %v1570_v6, %v1569_v25  ;;  %v4097_v44 = vadd.f32 %v3987_v27, %v1307_v58  ;;  %v4109_v39 = vld [vmem:[#allocation2 + $0x88] sm:$0xff]  ;;  %v379_v38 = vpop.f32.mrf.mxu0 }
  0xe8   : > { %v1436_v29 = vmul.f32 %v4069_v8, %v4069_v8  ;;  %v4101_v11 = vadd.f32 %v2072_v54, %v2071_v16  ;;  %v4104_v7 = vadd.f32 %v794_v12, %v4017_v10  ;;  %v987_v55 = vmul.f32 %v3663_v22, %v4051_v14  ;;  %521 = vst.msk [vmem:[#allocation2 + $0xc8] sm:$0xff] %vm436_vm1, %v379_v38 }
  0xe9   : > { %5524 = vst [vmem:[#allocation33_spill] sm:$0xff] %v4092_v45  ;;  %v1017_v1 = vadd.f32 %v3937_v9, %v920_v41  ;;  %v4112_v2 = vsel %vm1451_vm3, %v1435_v33, 0.0  ;;  %v4114_v27 = vadd.f32 %v795_v53, %v730_v20  ;;  %v922_v46 = vadd.f32 %v890_v21, %v3992_v59  ;;  %v4156_v41 = vld [vmem:[#allocation2 + $0x91] sm:$0xff] }
  0xea   : > { %5525 = vst [vmem:[#allocation34_spill] sm:$0xff] %v4097_v44  ;;  %v1195_v4 = vadd.f32 %v1163_v37, %v1097_v31  ;;  %v1437_v10 = vmul.f32 %v4092_v45, %v4092_v45  ;;  %v4122_v0 = vsel %vm1564_vm5, %v1435_v33, 0.0  ;;  %v4125_v9 = vsel %vm2066_vm6, %v1435_v33, 0.0 }
  0xeb   : > { %v1113_v51 = vadd.f32 %v3942_v63, %v1016_v36  ;;  %v1438_v15 = vmul.f32 %v4097_v44, %v4097_v44  ;;  %v4133_v59 = vsel %vm1451_vm3, %v1436_v29, 0.0  ;;  %v4136_v31 = vsel %vm2179_vm4, %v1435_v33, 0.0  ;;  %v5527_v63 = vld [vmem:[#allocation28_spill] sm:$0xff] }
  0xec   : > { %5526 = vst [vmem:[#allocation35_spill] sm:$0xff] %v4133_v59  ;;  %v1260_v42 = vmul.f32 %v3688_v43, %v4109_v39  ;;  %v4143_v40 = vsel %vm1564_vm5, %v1436_v29, 0.0  ;;  %v1114_v5 = vadd.f32 %v5527_v63, %v1017_v1  ;;  %v1180_v17 = vmul.f32 %v3672_v30, %v568_v57 }
  0xed   : > { %v1164_v25 = vmul.f32 %v3672_v30, %v4117_v48  ;;  %v4151_v6 = vsel %vm2066_vm6, %v1436_v29, 0.0  ;;  %v4154_v58 = vsel %vm2179_vm4, %v1436_v29, 0.0  ;;  %v1357_v12 = vmul.f32 %v3693_v49, %v4128_v47  ;;  %v424_v29 = vpop.f32.mrf.mxu3 }
  0xee   : > { %5528 = vst [vmem:[#allocation28_spill] sm:$0xff] %v4151_v6  ;;  %v1292_v54 = vadd.f32 %v1260_v42, %v1195_v4  ;;  %v4161_v53 = vsel %vm1451_vm3, %v1437_v10, 0.0  ;;  %v1211_v57 = vadd.f32 %v4012_v18, %v1113_v51  ;;  %v1261_v20 = vmul.f32 %v3688_v43, %v4140_v56 }
  0xef   : > { %5529 = vst [vmem:[#allocation36_spill] sm:$0xff] %v4154_v58  ;;  %v1196_v33 = vadd.f32 %v1164_v25, %v1098_v19  ;;  %v4167_v21 = vsel %vm1451_vm3, %v1438_v15, 0.0  ;;  %v4170_v37 = vsel %vm1564_vm5, %v1437_v10, 0.0  ;;  %v4173_v16 = vsel %vm1564_vm5, %v1438_v15, 0.0 }
  0xf0   : > { %5530 = vst [vmem:[#allocation37_spill] sm:$0xff] %v4161_v53  ;;  %v4175_v36 = vadd.f32 %v1357_v12, %v1292_v54  ;;  %v1212_v1 = vadd.f32 %v1180_v17, %v1114_v5  ;;  %v1277_v18 = vmul.f32 %v3688_v43, %v4051_v14  ;;  %v1358_v4 = vmul.f32 %v3693_v49, %v4156_v41 }
  0xf1   : > { %5531 = vst [vmem:[#allocation38_spill] sm:$0xff] %v4167_v21  ;;  %v1293_v19 = vadd.f32 %v1261_v20, %v1196_v33  ;;  %v4183_v51 = vsel %vm2066_vm6, %v1437_v10, 0.0  ;;  %v4186_v42 = vsel %vm2066_vm6, %v1438_v15, 0.0  ;;  %v4189_v38 = vsel %vm2179_vm4, %v1437_v10, 0.0  ;;  %v381_v33 = vpop.f32.mrf.mxu0 }
  0xf2   : > { %5532 = vst [vmem:[#allocation39_spill] sm:$0xff] %v4175_v36  ;;  %v4193_v63 = vmul.f32 %v4175_v36, %v4175_v36  ;;  %v4196_v14 = vsel %vm2179_vm4, %v1438_v15, 0.0  ;;  %v1308_v5 = vadd.f32 %v4015_v26, %v1211_v57  ;;  %v1373_v17 = vmul.f32 %v3693_v49, %v4071_v62 }
  0xf3   : > { %539 = vst.msk [vmem:[#allocation2 + $0x1e8] sm:$0xff] %vm436_vm1, %v424_v29  ;;  %v4201_v25 = vadd.f32 %v1358_v4, %v1293_v19  ;;  %v1083_v54 = vmul.f32 %v3666_v23, %v4071_v62  ;;  %v873_v10 = vmul.f32 %v3652_v13, %v4062_v52  ;;  %v1309_v20 = vadd.f32 %v1277_v18, %v1212_v1  ;;  %v5538_v29 = vld [vmem:[#allocation29_spill] sm:$0xff]  ;;  %v5539_v1 = vld [vmem:[#allocation30_spill] sm:$0xff] }
  0xf4   : > { %5533 = vst [vmem:[#allocation40_spill] sm:$0xff] %v4183_v51  ;;  %v1459_v12 = vsel %vm1451_vm3, %v4193_v63, 0.0  ;;  %v2187_v15 = vsel %vm2179_vm4, %v4193_v63, 0.0  ;;  %v1374_v26 = vmul.f32 %v3693_v49, %v4073_v35  ;;  %v1019_v19 = vadd.f32 %v987_v55, %v922_v46 }
  0xf5   : > { %5534 = vst [vmem:[#allocation41_spill] sm:$0xff] %v4186_v42  ;;  %v4215_v57 = vmul.f32 %v4201_v25, %v4201_v25  ;;  %v1460_v62 = vadd.f32 %v1459_v12, %v5538_v29  ;;  %v1084_v4 = vmul.f32 %v3666_v23, %v4073_v35  ;;  %v584_v8 = vmul.f32 %v3623_v60, %v4062_v52  ;;  %v666_v29 = vld [vmem:[#allocation2 + $0x1a8] sm:$0xff] }
  0xf6   : > { %5535 = vst [vmem:[#allocation42_spill] sm:$0xff] %v4189_v38  ;;  %v2188_v18 = vadd.f32 %v2187_v15, %v5539_v1  ;;  %v4224_v36 = vadd.f32 %v1373_v17, %v1308_v5  ;;  %v905_v46 = vadd.f32 %v873_v10, %v4047_v24  ;;  %v874_v35 = vmul.f32 %v3652_v13, %v4117_v48  ;;  %v426_v5 = vpop.f32.mrf.mxu3 }
  0xf7   : > { %5536 = vst [vmem:[#allocation43_spill] sm:$0xff] %v4196_v14  ;;  %v1461_v12 = vsel %vm1451_vm3, %v4215_v57, 0.0  ;;  %v2189_v55 = vsel %vm2179_vm4, %v4215_v57, 0.0  ;;  %v1115_v17 = vadd.f32 %v1083_v54, %v4032_v28  ;;  %v4240_v15 = vadd.f32 %v1374_v26, %v1309_v20  ;;  %v4296_v14 = vld [vmem:[#allocation2 + $0xaf] sm:$0xff] }
  0xf8   : > { %5537 = vst [vmem:[#allocation44_spill] sm:$0xff] %v4201_v25  ;;  %v681_v25 = vmul.f32 %v3626_v61, %v4109_v39  ;;  %v4235_v52 = vadd.f32 %v1461_v12, %v1460_v62  ;;  %v891_v1 = vmul.f32 %v3652_v13, %v569_v34  ;;  %v1181_v44 = vmul.f32 %v3672_v30, %v569_v34 }
  0xf9   : > { %522 = vst.msk [vmem:[#allocation2 + $0xd0] sm:$0xff] %vm436_vm1, %v381_v33  ;;  %v4237_v33 = vadd.f32 %v2189_v55, %v2188_v18  ;;  %v4245_v24 = vadd.f32 %v1084_v4, %v1019_v19  ;;  %v970_v10 = vmul.f32 %v3663_v22, %v4109_v39  ;;  %v602_v62 = vmul.f32 %v3623_v60, %v569_v34  ;;  %v4261_v19 = vld [vmem:[#allocation2 + $0xa7] sm:$0xff] }
  0xfa   : > { %5540 = vst [vmem:[#allocation29_spill] sm:$0xff] %v4224_v36  ;;  %v699_v18 = vmul.f32 %v3626_v61, %v666_v29  ;;  %v4253_v28 = vmul.f32 %v4224_v36, %v4224_v36  ;;  %v585_v54 = vmul.f32 %v3623_v60, %v4117_v48  ;;  %v682_v20 = vmul.f32 %v3626_v61, %v4140_v56  ;;  %v570_v36 = vld [vmem:[#allocation2 + $0x1af] sm:$0xff] }
  0xfb   : > { %5541 = vst [vmem:[#allocation30_spill] sm:$0xff] %v4240_v15  ;;  %v1067_v26 = vmul.f32 %v3666_v23, %v4128_v47  ;;  %v713_v39 = vadd.f32 %v681_v25, %v584_v8  ;;  %v1002_v4 = vadd.f32 %v970_v10, %v905_v46  ;;  %v988_v34 = vmul.f32 %v3663_v22, %v666_v29 }
  0xfc   : > { %540 = vst.msk [vmem:[#allocation2 + $0x1f0] sm:$0xff] %vm436_vm1, %v426_v5  ;;  %v906_v12 = vadd.f32 %v874_v35, %v4087_v50  ;;  %v4267_v55 = vmul.f32 %v4240_v15, %v4240_v15  ;;  %v923_v48 = vadd.f32 %v891_v1, %v4104_v7  ;;  %v1213_v5 = vadd.f32 %v1181_v44, %v1115_v17  ;;  %v384_v50 = vpop.f32.mrf.mxu0  ;;  %v667_v17 = vld [vmem:[#allocation2 + $0x1b0] sm:$0xff] }
  0xfd   : > { %5542 = vst [vmem:[#allocation45_spill] sm:$0xff] %v4253_v28  ;;  %v1278_v45 = vmul.f32 %v3688_v43, %v666_v29  ;;  %v731_v21 = vadd.f32 %v699_v18, %v602_v62  ;;  %v971_v53 = vmul.f32 %v3663_v22, %v4140_v56  ;;  %v892_v8 = vmul.f32 %v3652_v13, %v570_v36  ;;  %v763_v29 = vld [vmem:[#allocation2 + $0x1a9] sm:$0xff] }
  0xfe   : > { %5543 = vst [vmem:[#allocation46_spill] sm:$0xff] %v4267_v55  ;;  %v1165_v25 = vmul.f32 %v3672_v30, %v4261_v19  ;;  %v4278_v46 = vsel %vm1564_vm5, %v4253_v28, 0.0  ;;  %v714_v35 = vadd.f32 %v682_v20, %v585_v54  ;;  %v778_v44 = vmul.f32 %v3639_v3, %v4128_v47 }
  0xff   : > { %v1099_v7 = vadd.f32 %v1067_v26, %v1002_v4  ;;  %523 = vst.msk [vmem:[#allocation2 + $0xe8] sm:$0xff] %vm436_vm1, %v384_v50  ;;  %v1003_v56 = vadd.f32 %v971_v53, %v906_v12  ;;  %v603_v1 = vmul.f32 %v3623_v60, %v570_v36  ;;  %v700_v10 = vmul.f32 %v3626_v61, %v667_v17  ;;  %v650_v26 = vld [vmem:[#allocation2 + $0xa8] sm:$0xff]  ;;  %v764_v53 = vld [vmem:[#allocation2 + $0x1b1] sm:$0xff] }
 0x100   : > { %v796_v62 = vmul.f32 %v3639_v3, %v763_v29  ;;  %v4288_v18 = vsel %vm1564_vm5, %v4267_v55, 0.0  ;;  %v1020_v54 = vadd.f32 %v988_v34, %v923_v48  ;;  %v1310_v20 = vadd.f32 %v1278_v45, %v1213_v5  ;;  %v4303_v48 = vld [vmem:[#allocation2 + $0xa9] sm:$0xff] }
 0x101   : > { %v779_v47 = vmul.f32 %v3639_v3, %v4156_v41  ;;  %v1068_v4 = vmul.f32 %v3666_v23, %v4156_v41  ;;  %v924_v12 = vadd.f32 %v892_v8, %v4114_v27  ;;  %v989_v50 = vmul.f32 %v3663_v22, %v667_v17  ;;  %v4308_v8 = vld [vmem:[#allocation2 + $0xb0] sm:$0xff] }
 0x102   : > { %v1197_v15 = vadd.f32 %v1165_v25, %v1099_v7  ;;  %v810_v59 = vadd.f32 %v778_v44, %v713_v39  ;;  %v1572_v45 = vsel %vm1564_vm5, %v4193_v63, 0.0  ;;  %v797_v34 = vmul.f32 %v3639_v3, %v764_v53  ;;  %v429_v25 = vpop.f32.mrf.mxu3 }
 0x103   : > { %v4298_v55 = vadd.f32 %v779_v47, %v714_v35  ;;  %v1100_v5 = vadd.f32 %v1068_v4, %v1003_v56  ;;  %v732_v41 = vadd.f32 %v700_v10, %v603_v1  ;;  %v4305_v38 = vadd.f32 %v796_v62, %v731_v21  ;;  %541 = vst.msk [vmem:[#allocation2 + $0x208] sm:$0xff] %vm436_vm1, %v429_v25  ;;  %v4318_v10 = vld [vmem:[#allocation2 + $0xb1] sm:$0xff] }
 0x104   : > { %v1262_v27 = vmul.f32 %v3688_v43, %v650_v26  ;;  %v2074_v39 = vsel %vm2066_vm6, %v4193_v63, 0.0  ;;  %v1085_v35 = vmul.f32 %v3666_v23, %v763_v29  ;;  %v1086_v44 = vmul.f32 %v3666_v23, %v764_v53 }
 0x105   : > { %v1166_v7 = vmul.f32 %v3672_v30, %v4296_v14  ;;  %v1573_v21 = vadd.f32 %v1572_v45, %v4094_v32  ;;  %v1021_v56 = vadd.f32 %v989_v50, %v924_v12  ;;  %v1359_v62 = vmul.f32 %v3693_v49, %v4303_v48  ;;  %v386_v50 = vpop.f32.mrf.mxu0 }
 0x106   : > { %v1294_v1 = vadd.f32 %v1262_v27, %v1197_v15  ;;  %v1574_v63 = vsel %vm1564_vm5, %v4215_v57, 0.0  ;;  %v2076_v47 = vsel %vm2066_vm6, %v4215_v57, 0.0  ;;  %v1263_v42 = vmul.f32 %v3688_v43, %v4308_v8  ;;  %524 = vst.msk [vmem:[#allocation2 + $0xf0] sm:$0xff] %vm436_vm1, %v386_v50 }
 0x107   : > { %v1198_v4 = vadd.f32 %v1166_v7, %v1100_v5  ;;  %v2075_v25 = vadd.f32 %v2074_v39, %v4101_v11  ;;  %v4329_v32 = vadd.f32 %v797_v34, %v732_v41  ;;  %v1182_v15 = vmul.f32 %v3672_v30, %v570_v36 }
 0x108   : > { %v4332_v12 = vadd.f32 %v1359_v62, %v1294_v1  ;;  %v1117_v45 = vadd.f32 %v1085_v35, %v1020_v54  ;;  %v1375_v27 = vmul.f32 %v3693_v49, %v763_v29  ;;  %v1360_v57 = vmul.f32 %v3693_v49, %v4318_v10  ;;  %v571_v35 = vld [vmem:[#allocation2 + $0x1c7] sm:$0xff] }
 0x109   : > { %v1295_v58 = vadd.f32 %v1263_v42, %v1198_v4  ;;  %v4338_v5 = vadd.f32 %v1574_v63, %v1573_v21  ;;  %v4340_v7 = vadd.f32 %v2076_v47, %v2075_v25  ;;  %v875_v11 = vmul.f32 %v3652_v13, %v4261_v19 }
 0x10a   : > { %5544 = vst [vmem:[#allocation47_spill] sm:$0xff] %v4332_v12  ;;  %v4346_v36 = vmul.f32 %v4332_v12, %v4332_v12  ;;  %v4348_v54 = vadd.f32 %v1086_v44, %v1021_v56  ;;  %v1279_v42 = vmul.f32 %v3688_v43, %v667_v17  ;;  %v1376_v29 = vmul.f32 %v3693_v49, %v764_v53 }
 0x10b   : > { %v4352_v34 = vadd.f32 %v1360_v57, %v1295_v58  ;;  %v1214_v41 = vadd.f32 %v1182_v15, %v4245_v24  ;;  %v586_v39 = vmul.f32 %v3623_v60, %v4261_v19  ;;  %v4361_v44 = vadd.f32 %v1375_v27, %v1310_v20 }
 0x10c   : > { %v1463_v21 = vsel %vm1451_vm3, %v4346_v36, 0.0  ;;  %v2191_v1 = vsel %vm2179_vm4, %v4346_v36, 0.0  ;;  %v683_v17 = vmul.f32 %v3626_v61, %v650_v26  ;;  %v907_v53 = vadd.f32 %v875_v11, %v810_v59  ;;  %v4393_v11 = vld [vmem:[#allocation2 + $0xc7] sm:$0xff] }
 0x10d   : > { %5545 = vst [vmem:[#allocation48_spill] sm:$0xff] %v4352_v34  ;;  %v4366_v58 = vmul.f32 %v4352_v34, %v4352_v34  ;;  %v1464_v24 = vadd.f32 %v1463_v21, %v4235_v52  ;;  %v972_v19 = vmul.f32 %v3663_v22, %v650_v26  ;;  %v876_v56 = vmul.f32 %v3652_v13, %v4296_v14  ;;  %v668_v52 = vld [vmem:[#allocation2 + $0x1c8] sm:$0xff] }
 0x10e   : > { %5546 = vst [vmem:[#allocation49_spill] sm:$0xff] %v4361_v44  ;;  %v2192_v62 = vadd.f32 %v2191_v1, %v4237_v33  ;;  %v893_v63 = vmul.f32 %v3652_v13, %v571_v35  ;;  %v1183_v20 = vmul.f32 %v3672_v30, %v571_v35  ;;  %v1311_v25 = vadd.f32 %v1279_v42, %v1214_v41 }
 0x10f   : > { %v1465_v47 = vsel %vm1451_vm3, %v4366_v58, 0.0  ;;  %v2193_v4 = vsel %vm2179_vm4, %v4366_v58, 0.0  ;;  %v604_v59 = vmul.f32 %v3623_v60, %v571_v35  ;;  %v4386_v33 = vmul.f32 %v4361_v44, %v4361_v44 }
 0x110   : > { %v4380_v26 = vadd.f32 %v1465_v47, %v1464_v24  ;;  %v4382_v15 = vadd.f32 %v2193_v4, %v2192_v62  ;;  %v701_v50 = vmul.f32 %v3626_v61, %v668_v52  ;;  %v587_v27 = vmul.f32 %v3623_v60, %v4296_v14  ;;  %v4401_v14 = vld [vmem:[#allocation2 + $0x1cf] sm:$0xff] }
 0x111   : > { %5547 = vst [vmem:[#allocation50_spill] sm:$0xff] %v4386_v33  ;;  %v684_v57 = vmul.f32 %v3626_v61, %v4308_v8  ;;  %v715_v42 = vadd.f32 %v683_v17, %v586_v39  ;;  %v1004_v41 = vadd.f32 %v972_v19, %v907_v53  ;;  %v908_v35 = vadd.f32 %v876_v56, %v4298_v55 }
 0x112   : > { %v1069_v21 = vmul.f32 %v3666_v23, %v4303_v48  ;;  %v925_v1 = vadd.f32 %v893_v63, %v4305_v38  ;;  %v990_v24 = vmul.f32 %v3663_v22, %v668_v52  ;;  %v1215_v62 = vadd.f32 %v1183_v20, %v1117_v45 }
 0x113   : > { %v1280_v47 = vmul.f32 %v3688_v43, %v668_v52  ;;  %v4403_v4 = vadd.f32 %v1376_v29, %v1311_v25  ;;  %v973_v39 = vmul.f32 %v3663_v22, %v4308_v8  ;;  %v894_v55 = vmul.f32 %v3652_v13, %v4401_v14  ;;  %v4417_v29 = vld [vmem:[#allocation2 + $0x1d0] sm:$0xff]  ;;  %v431_v52 = vpop.f32.mrf.mxu3 }
 0x114   : > { %v1167_v17 = vmul.f32 %v3672_v30, %v4393_v11  ;;  %v4413_v38 = vsel %vm1564_vm5, %v4386_v33, 0.0  ;;  %v733_v45 = vadd.f32 %v701_v50, %v604_v59  ;;  %v716_v53 = vadd.f32 %v684_v57, %v587_v27  ;;  %v4423_v25 = vld [vmem:[#allocation2 + $0x1c9] sm:$0xff]  ;;  %542 = vst.msk [vmem:[#allocation2 + $0x210] sm:$0xff] %vm436_vm1, %v431_v52  ;;  %v4434_v57 = vld [vmem:[#allocation2 + $0x1d1] sm:$0xff] }
 0x115   : > { %5548 = vst [vmem:[#allocation51_spill] sm:$0xff] %v4413_v38  ;;  %v780_v19 = vmul.f32 %v3639_v3, %v4303_v48  ;;  %v1005_v56 = vadd.f32 %v973_v39, %v908_v35  ;;  %v1101_v63 = vadd.f32 %v1069_v21, %v1004_v41  ;;  %v605_v8 = vmul.f32 %v3623_v60, %v4401_v14  ;;  %v652_v50 = vld [vmem:[#allocation2 + $0xc8] sm:$0xff] }
 0x116   : > { %v702_v20 = vmul.f32 %v3626_v61, %v4417_v29  ;;  %v1022_v34 = vadd.f32 %v990_v24, %v925_v1  ;;  %v4425_v12 = vadd.f32 %v1280_v47, %v1215_v62  ;;  %v781_v59 = vmul.f32 %v3639_v3, %v4318_v10  ;;  %v556_v1 = vld [vmem:[#allocation2 + $0xcf] sm:$0xff] }
 0x117   : > { %v798_v48 = vmul.f32 %v3639_v3, %v4423_v25  ;;  %v1070_v27 = vmul.f32 %v3666_v23, %v4318_v10  ;;  %v926_v41 = vadd.f32 %v894_v55, %v4329_v32  ;;  %v991_v35 = vmul.f32 %v3663_v22, %v4417_v29  ;;  %v749_v52 = vld [vmem:[#allocation2 + $0xc9] sm:$0xff] }
 0x118   : > { %v1199_v21 = vadd.f32 %v1167_v17, %v1101_v63  ;;  %v812_v24 = vadd.f32 %v780_v19, %v715_v42  ;;  %v813_v62 = vadd.f32 %v781_v59, %v716_v53  ;;  %v1576_v47 = vsel %vm1564_vm5, %v4346_v36, 0.0  ;;  %v653_v55 = vld [vmem:[#allocation2 + $0xd0] sm:$0xff] }
 0x119   : > { %v799_v39 = vmul.f32 %v3639_v3, %v4434_v57  ;;  %v1102_v44 = vadd.f32 %v1070_v27, %v1005_v56  ;;  %v734_v10 = vadd.f32 %v702_v20, %v605_v8  ;;  %v1087_v33 = vmul.f32 %v3666_v23, %v4423_v25  ;;  %v750_v20 = vld [vmem:[#allocation2 + $0xd1] sm:$0xff] }
 0x11a   : > { %v1264_v32 = vmul.f32 %v3688_v43, %v652_v50  ;;  %v2078_v17 = vsel %vm2066_vm6, %v4346_v36, 0.0  ;;  %v4448_v42 = vadd.f32 %v798_v48, %v733_v45  ;;  %v1088_v53 = vmul.f32 %v3666_v23, %v4434_v57 }
 0x11b   : > { %v1168_v19 = vmul.f32 %v3672_v30, %v556_v1  ;;  %v1577_v63 = vadd.f32 %v1576_v47, %v4338_v5  ;;  %v1023_v56 = vadd.f32 %v991_v35, %v926_v41  ;;  %v1361_v59 = vmul.f32 %v3693_v49, %v749_v52 }
 0x11c   : > { %v1296_v8 = vadd.f32 %v1264_v32, %v1199_v21  ;;  %v1578_v27 = vsel %vm1564_vm5, %v4366_v58, 0.0  ;;  %v2080_v36 = vsel %vm2066_vm6, %v4366_v58, 0.0  ;;  %v1265_v48 = vmul.f32 %v3688_v43, %v653_v55 }
 0x11d   : > { %v1200_v45 = vadd.f32 %v1168_v19, %v1102_v44  ;;  %v2079_v51 = vadd.f32 %v2078_v17, %v4340_v7  ;;  %v4461_v6 = vadd.f32 %v799_v39, %v734_v10  ;;  %v4463_v28 = vadd.f32 %v1087_v33, %v1022_v34 }
 0x11e   : > { %v4465_v5 = vadd.f32 %v1361_v59, %v1296_v8  ;;  %v877_v41 = vmul.f32 %v3652_v13, %v4393_v11  ;;  %v878_v35 = vmul.f32 %v3652_v13, %v556_v1  ;;  %v1362_v47 = vmul.f32 %v3693_v49, %v750_v20 }
 0x11f   : > { %v1297_v21 = vadd.f32 %v1265_v48, %v1200_v45  ;;  %v1579_v58 = vadd.f32 %v1578_v27, %v1577_v63  ;;  %v4471_v44 = vadd.f32 %v2080_v36, %v2079_v51  ;;  %v4473_v32 = vadd.f32 %v1088_v53, %v1023_v56  ;;  %v557_v45 = vld [vmem:[#allocation2 + $0xe7] sm:$0xff] }
 0x120   : > { %5549 = vst [vmem:[#allocation52_spill] sm:$0xff] %v4465_v5  ;;  %v4477_v7 = vmul.f32 %v4465_v5, %v4465_v5  ;;  %v1184_v34 = vmul.f32 %v3672_v30, %v4401_v14  ;;  %v588_v33 = vmul.f32 %v3623_v60, %v4393_v11  ;;  %v685_v39 = vmul.f32 %v3626_v61, %v652_v50  ;;  %v654_v48 = vld [vmem:[#allocation2 + $0xe8] sm:$0xff] }
 0x121   : > { %v4484_v10 = vadd.f32 %v1362_v47, %v1297_v21  ;;  %v589_v17 = vmul.f32 %v3623_v60, %v556_v1  ;;  %v686_v51 = vmul.f32 %v3626_v61, %v653_v55  ;;  %v909_v63 = vadd.f32 %v877_v41, %v812_v24 }
 0x122   : > { %v1467_v53 = vsel %vm1451_vm3, %v4477_v7, 0.0  ;;  %v2195_v19 = vsel %vm2179_vm4, %v4477_v7, 0.0  ;;  %v910_v56 = vadd.f32 %v878_v35, %v813_v62  ;;  %v4499_v8 = vmul.f32 %v3688_v43, %v4417_v29 }
 0x123   : > { %5550 = vst [vmem:[#allocation53_spill] sm:$0xff] %v4484_v10  ;;  %v4494_v14 = vmul.f32 %v4484_v10, %v4484_v10  ;;  %v1468_v11 = vadd.f32 %v1467_v53, %v4380_v26  ;;  %v974_v1 = vmul.f32 %v3663_v22, %v652_v50  ;;  %v782_v59 = vmul.f32 %v3639_v3, %v749_v52 }
 0x124   : > { %v2196_v27 = vadd.f32 %v2195_v19, %v4382_v15  ;;  %v975_v36 = vmul.f32 %v3663_v22, %v653_v55  ;;  %v1071_v24 = vmul.f32 %v3666_v23, %v749_v52  ;;  %v717_v29 = vadd.f32 %v685_v39, %v588_v33  ;;  %v558_v39 = vld [vmem:[#allocation2 + $0xef] sm:$0xff] }
 0x125   : > { %v1469_v62 = vsel %vm1451_vm3, %v4494_v14, 0.0  ;;  %v2197_v26 = vsel %vm2179_vm4, %v4494_v14, 0.0  ;;  %v718_v41 = vadd.f32 %v686_v51, %v589_v17  ;;  %v4516_v15 = vmul.f32 %v3693_v49, %v4423_v25  ;;  %v655_v17 = vld [vmem:[#allocation2 + $0xf0] sm:$0xff] }
 0x126   : > { %v4510_v35 = vadd.f32 %v1469_v62, %v1468_v11  ;;  %v4512_v50 = vadd.f32 %v2197_v26, %v2196_v27  ;;  %v1006_v55 = vadd.f32 %v974_v1, %v909_v63  ;;  %v783_v52 = vmul.f32 %v3639_v3, %v750_v20  ;;  %v751_v1 = vld [vmem:[#allocation2 + $0xe9] sm:$0xff]  ;;  %v752_v62 = vld [vmem:[#allocation2 + $0xf1] sm:$0xff] }
 0x127   : > { %v1007_v21 = vadd.f32 %v975_v36, %v910_v56  ;;  %v814_v47 = vadd.f32 %v782_v59, %v717_v29  ;;  %v590_v53 = vmul.f32 %v3623_v60, %v557_v45  ;;  %v687_v19 = vmul.f32 %v3626_v61, %v654_v48 }
 0x128   : > { %v879_v33 = vmul.f32 %v3652_v13, %v557_v45  ;;  %v4524_v51 = vmul.f32 %v3693_v49, %v4434_v57  ;;  %v1072_v25 = vmul.f32 %v3666_v23, %v750_v20  ;;  %v1103_v11 = vadd.f32 %v1071_v24, %v1006_v55 }
 0x129   : > { %v1169_v63 = vmul.f32 %v3672_v30, %v557_v45  ;;  %v4529_v56 = vadd.f32 %v1184_v34, %v4348_v54  ;;  %v815_v59 = vadd.f32 %v783_v52, %v718_v41  ;;  %v1580_v27 = vsel %vm1564_vm5, %v4477_v7, 0.0 }
 0x12a   : > { %v911_v36 = vadd.f32 %v879_v33, %v814_v47  ;;  %v1104_v26 = vadd.f32 %v1072_v25, %v1007_v21  ;;  %v591_v57 = vmul.f32 %v3623_v60, %v558_v39  ;;  %v688_v10 = vmul.f32 %v3626_v61, %v655_v17 }
 0x12b   : > { %v1201_v29 = vadd.f32 %v1169_v63, %v1103_v11  ;;  %v719_v20 = vadd.f32 %v687_v19, %v590_v53  ;;  %v976_v24 = vmul.f32 %v3663_v22, %v654_v48  ;;  %v1266_v45 = vmul.f32 %v3688_v43, %v654_v48  ;;  %v5551_v48 = vld [vmem:[#allocation7_spill] sm:$0xff] }
 0x12c   : > { %v784_v54 = vmul.f32 %v3639_v3, %v751_v1  ;;  %v1581_v34 = vadd.f32 %v1580_v27, %v1579_v58  ;;  %v720_v41 = vadd.f32 %v688_v10, %v591_v57  ;;  %v785_v55 = vmul.f32 %v3639_v3, %v752_v62  ;;  %v5552_v57 = vld [vmem:[#allocation12_spill] sm:$0xff] }
 0x12d   : > { %v880_v52 = vmul.f32 %v3652_v13, %v558_v39  ;;  %v1008_v47 = vadd.f32 %v976_v24, %v911_v36  ;;  %v1298_v21 = vadd.f32 %v1266_v45, %v1201_v29  ;;  %v1073_v25 = vmul.f32 %v3666_v23, %v751_v1  ;;  %v5553_v24 = vld [vmem:[#allocation8_spill] sm:$0xff] }
 0x12e   : > { %v816_v33 = vadd.f32 %v784_v54, %v719_v20  ;;  %v817_v11 = vadd.f32 %v785_v55, %v720_v41  ;;  %v977_v53 = vmul.f32 %v3663_v22, %v655_v17  ;;  %v1170_v19 = vmul.f32 %v3672_v30, %v558_v39  ;;  %v5554_v54 = vld [vmem:[#allocation9_spill] sm:$0xff]  ;;  %v4554_v55 = vld [vmem:[#allocation2 + $0x1e7] sm:$0xff] }
 0x12f   : > { %v912_v63 = vadd.f32 %v880_v52, %v815_v59  ;;  %v1074_v58 = vmul.f32 %v3666_v23, %v752_v62  ;;  %v1105_v10 = vadd.f32 %v1073_v25, %v1008_v47  ;;  %v1363_v27 = vmul.f32 %v3693_v49, %v751_v1  ;;  %v5556_v52 = vld [vmem:[#allocation13_spill] sm:$0xff] }
 0x130   : > { %v913_v5 = vadd.f32 %v5551_v48, %v816_v33  ;;  %v914_v38 = vadd.f32 %v5552_v57, %v817_v11  ;;  %v1202_v29 = vadd.f32 %v1170_v19, %v1104_v26  ;;  %v1267_v20 = vmul.f32 %v3688_v43, %v655_v17  ;;  %v5557_v26 = vld [vmem:[#allocation14_spill] sm:$0xff]  ;;  %v5559_v19 = vld [vmem:[#allocation15_spill] sm:$0xff] }
 0x131   : > { %v1009_v36 = vadd.f32 %v977_v53, %v912_v63  ;;  %v1582_v59 = vsel %vm1564_vm5, %v4494_v14, 0.0  ;;  %v1203_v39 = vadd.f32 %v5554_v54, %v1105_v10  ;;  %v4552_v41 = vadd.f32 %v1363_v27, %v1298_v21  ;;  %v5558_v63 = vld [vmem:[#allocation10_spill] sm:$0xff]  ;;  %v5560_v10 = vld [vmem:[#allocation16_spill] sm:$0xff] }
 0x132   : > { %v1010_v45 = vadd.f32 %v5553_v24, %v913_v5  ;;  %v1011_v47 = vadd.f32 %v5556_v52, %v914_v38  ;;  %v1299_v33 = vadd.f32 %v1267_v20, %v1202_v29  ;;  %v1364_v25 = vmul.f32 %v3693_v49, %v752_v62  ;;  %v5562_v27 = vld [vmem:[#allocation20_spill] sm:$0xff]  ;;  %v5563_v57 = vld [vmem:[#allocation18_spill] sm:$0xff]  ;;  %v4576_v24 = vld [vmem:[#allocation2 + $0x1e8] sm:$0xff] }
 0x133   : > { %5555 = vst [vmem:[#allocation7_spill] sm:$0xff] %v4552_v41  ;;  %v1106_v1 = vadd.f32 %v1074_v58, %v1009_v36  ;;  %v4560_v17 = vmul.f32 %v3623_v60, %v4554_v55  ;;  %v1300_v5 = vadd.f32 %v5558_v63, %v1203_v39  ;;  %v1429_v21 = vmul.f32 %v4552_v41, %v4552_v41  ;;  %v4636_v41 = vld [vmem:[#allocation2 + $0x1e9] sm:$0xff] }
 0x134   : > { %v1107_v11 = vadd.f32 %v5557_v26, %v1010_v45  ;;  %v1583_v53 = vadd.f32 %v1582_v59, %v1581_v34  ;;  %v1108_v48 = vadd.f32 %v5559_v19, %v1011_v47  ;;  %v4568_v58 = vadd.f32 %v1364_v25, %v1299_v33  ;;  %v5565_v45 = vld [vmem:[#allocation22_spill] sm:$0xff]  ;;  %v5566_v34 = vld [vmem:[#allocation17_spill] sm:$0xff] }
 0x135   : > { %v1204_v38 = vadd.f32 %v5560_v10, %v1106_v1  ;;  %v4572_v36 = vadd.f32 %v5563_v57, %v1300_v5  ;;  %v1471_v29 = vsel %vm1451_vm3, %v1429_v21, 0.0  ;;  %v1584_v20 = vsel %vm1564_vm5, %v1429_v21, 0.0  ;;  %v5567_v1 = vld [vmem:[#allocation21_spill] sm:$0xff]  ;;  %v5569_v5 = vld [vmem:[#allocation19_spill] sm:$0xff] }
 0x136   : > { %5561 = vst [vmem:[#allocation12_spill] sm:$0xff] %v4568_v58  ;;  %v1205_v62 = vadd.f32 %v5562_v27, %v1107_v11  ;;  %v1206_v54 = vadd.f32 %v5565_v45, %v1108_v48  ;;  %v1430_v39 = vmul.f32 %v4568_v58, %v4568_v58  ;;  %v1472_v52 = vadd.f32 %v1471_v29, %v4510_v35  ;;  %v5568_v11 = vld [vmem:[#allocation23_spill] sm:$0xff] }
 0x137   : > { %5564 = vst [vmem:[#allocation8_spill] sm:$0xff] %v4572_v36  ;;  %v1301_v59 = vadd.f32 %v5566_v34, %v1204_v38  ;;  %v703_v47 = vmul.f32 %v3626_v61, %v4576_v24  ;;  %v1431_v25 = vmul.f32 %v4572_v36, %v4572_v36  ;;  %v1585_v26 = vadd.f32 %v1584_v20, %v1583_v53  ;;  %v5571_v38 = vld [vmem:[#allocation24_spill] sm:$0xff]  ;;  %v5573_v53 = vld [vmem:[#allocation26_spill] sm:$0xff] }
 0x138   : > { %v1302_v33 = vadd.f32 %v5567_v1, %v1205_v62  ;;  %v1303_v63 = vadd.f32 %v5568_v11, %v1206_v54  ;;  %v1473_v48 = vsel %vm1451_vm3, %v1430_v39, 0.0  ;;  %v1586_v10 = vsel %vm1564_vm5, %v1430_v39, 0.0 }
 0x139   : > { %v4590_v19 = vadd.f32 %v5569_v5, %v1301_v59  ;;  %v1474_v27 = vadd.f32 %v1473_v48, %v1472_v52  ;;  %v1475_v57 = vsel %vm1451_vm3, %v1431_v25, 0.0  ;;  %v1587_v62 = vadd.f32 %v1586_v10, %v1585_v26 }
 0x13a   : > { %v4595_v35 = vadd.f32 %v5571_v38, %v1302_v33  ;;  %v2082_v29 = vsel %vm2066_vm6, %v4477_v7, 0.0  ;;  %v4601_v20 = vadd.f32 %v5573_v53, %v1303_v63  ;;  %v1588_v54 = vsel %vm1564_vm5, %v1431_v25, 0.0 }
 0x13b   : > { %5570 = vst [vmem:[#allocation9_spill] sm:$0xff] %v4590_v19  ;;  %v1432_v45 = vmul.f32 %v4590_v19, %v4590_v19  ;;  %v895_v34 = vmul.f32 %v3652_v13, %v4554_v55  ;;  %v1476_v52 = vadd.f32 %v1475_v57, %v1474_v27  ;;  %v1589_v1 = vadd.f32 %v1588_v54, %v1587_v62  ;;  %v574_v27 = vld [vmem:[#allocation2 + $0x1ef] sm:$0xff] }
 0x13c   : > { %5572 = vst [vmem:[#allocation13_spill] sm:$0xff] %v4595_v35  ;;  %v4610_v59 = vmul.f32 %v4595_v35, %v4595_v35  ;;  %v2084_v7 = vsel %vm2066_vm6, %v4494_v14, 0.0  ;;  %v4616_v33 = vmul.f32 %v4601_v20, %v4601_v20  ;;  %v2083_v63 = vadd.f32 %v2082_v29, %v4471_v44  ;;  %v671_v54 = vld [vmem:[#allocation2 + $0x1f0] sm:$0xff] }
 0x13d   : > { %5574 = vst [vmem:[#allocation14_spill] sm:$0xff] %v4601_v20  ;;  %v1477_v26 = vsel %vm1451_vm3, %v1432_v45, 0.0  ;;  %v1590_v11 = vsel %vm1564_vm5, %v1432_v45, 0.0  ;;  %v992_v38 = vmul.f32 %v3663_v22, %v4576_v24  ;;  %v2086_v62 = vsel %vm2066_vm6, %v1429_v21, 0.0  ;;  %v4638_v19 = vld [vmem:[#allocation2 + $0x1f1] sm:$0xff] }
 0x13e   : > { %v1478_v5 = vadd.f32 %v1477_v26, %v1476_v52  ;;  %v1479_v48 = vsel %vm1451_vm3, %v4610_v59, 0.0  ;;  %v1591_v10 = vadd.f32 %v1590_v11, %v1589_v1  ;;  %v1481_v14 = vsel %vm1451_vm3, %v4616_v33, 0.0 }
 0x13f   : > { %v1592_v57 = vsel %vm1564_vm5, %v4610_v59, 0.0  ;;  %v927_v53 = vadd.f32 %v895_v34, %v4448_v42  ;;  %v2085_v44 = vadd.f32 %v2084_v7, %v2083_v63  ;;  %v607_v29 = vmul.f32 %v3623_v60, %v574_v27 }
 0x140   : > { %v1480_v52 = vadd.f32 %v1479_v48, %v1478_v5  ;;  %v704_v1 = vmul.f32 %v3626_v61, %v671_v54  ;;  %v2088_v26 = vsel %vm2066_vm6, %v1430_v39, 0.0  ;;  %v2199_v11 = vsel %vm2179_vm4, %v1429_v21, 0.0 }
 0x141   : > { %v2201_v58 = vsel %vm2179_vm4, %v1430_v39, 0.0  ;;  %v1593_v20 = vadd.f32 %v1592_v57, %v1591_v10  ;;  %v2087_v42 = vadd.f32 %v2086_v62, %v2085_v44  ;;  %v2200_v34 = vadd.f32 %v2199_v11, %v4512_v50  ;;  %v864_v44 = vld [vmem:[#allocation2 + $0x207] sm:$0xff] }
 0x142   : > { %v1482_v36 = vadd.f32 %v1481_v14, %v1480_v52  ;;  %v800_v60 = vmul.f32 %v3639_v3, %v4636_v41  ;;  %v801_v61 = vmul.f32 %v3639_v3, %v4638_v19  ;;  %v1594_v21 = vsel %vm1564_vm5, %v4616_v33, 0.0 }
 0x143   : > { %v2203_v39 = vsel %vm2179_vm4, %v1431_v25, 0.0  ;;  %v896_v7 = vmul.f32 %v3652_v13, %v574_v27  ;;  %v2089_v5 = vadd.f32 %v2088_v26, %v2087_v42  ;;  %v2202_v48 = vadd.f32 %v2201_v58, %v2200_v34  ;;  %v1251_v26 = vld [vmem:[#allocation2 + $0x208] sm:$0xff] }
 0x144   : > { %v4650_v63 = vadd.f32 %v4112_v2, %v1482_v36  ;;  %v2090_v50 = vsel %vm2066_vm6, %v1431_v25, 0.0  ;;  %v2205_v10 = vsel %vm2179_vm4, %v1432_v45, 0.0  ;;  %v735_v14 = vadd.f32 %v703_v47, %v4560_v17 }
 0x145   : > { %v736_v57 = vadd.f32 %v704_v1, %v607_v29  ;;  %v1024_v3 = vadd.f32 %v992_v38, %v927_v53  ;;  %v1185_v62 = vmul.f32 %v3672_v30, %v4554_v55  ;;  %v1595_v52 = vadd.f32 %v1594_v21, %v1593_v20  ;;  %v865_v53 = vld [vmem:[#allocation2 + $0x20f] sm:$0xff] }
 0x146   : > { %v2204_v11 = vadd.f32 %v2203_v39, %v2202_v48  ;;  %v2092_v35 = vsel %vm2066_vm6, %v1432_v45, 0.0  ;;  %v2207_v2 = vsel %vm2179_vm4, %v4610_v59, 0.0  ;;  %v832_v58 = vadd.f32 %v800_v60, %v735_v14  ;;  %v1252_v48 = vld [vmem:[#allocation2 + $0x210] sm:$0xff] }
 0x147   : > { %v897_v36 = vmul.f32 %v3652_v13, %v864_v44  ;;  %v928_v25 = vadd.f32 %v896_v7, %v4461_v6  ;;  %v993_v17 = vmul.f32 %v3663_v22, %v671_v54  ;;  %v2091_v47 = vadd.f32 %v2090_v50, %v2089_v5 }
 0x148   : > { %v2206_v38 = vadd.f32 %v2205_v10, %v2204_v11  ;;  %v1089_v55 = vmul.f32 %v3666_v23, %v4636_v41  ;;  %v2209_v20 = vsel %vm2179_vm4, %v4616_v33, 0.0  ;;  %v833_v45 = vadd.f32 %v801_v61, %v736_v57  ;;  %v1348_v57 = vld [vmem:[#allocation2 + $0x209] sm:$0xff] }
 0x149   : > { %v898_v29 = vmul.f32 %v3652_v13, %v865_v53  ;;  %v1282_v1 = vmul.f32 %v3688_v43, %v4576_v24  ;;  %v1597_v6 = vadd.f32 %v4122_v0, %v1595_v52  ;;  %v2093_v42 = vadd.f32 %v2092_v35, %v2091_v47 }
 0x14a   : > { %v2208_v34 = vadd.f32 %v2207_v2, %v2206_v38  ;;  %v1186_v60 = vmul.f32 %v3672_v30, %v574_v27  ;;  %v2094_v21 = vsel %vm2066_vm6, %v4610_v59, 0.0  ;;  %v929_v39 = vadd.f32 %v897_v36, %v832_v58  ;;  %v1156_v2 = vld [vmem:[#allocation2 + $0x227] sm:$0xff] }
 0x14b   : > { %v994_v7 = vmul.f32 %v1251_v26, %v3663_v22  ;;  %v1217_v61 = vadd.f32 %v1185_v62, %v4463_v28  ;;  %v1025_v5 = vadd.f32 %v993_v17, %v928_v25  ;;  %v1090_v13 = vmul.f32 %v3666_v23, %v4638_v19 }
 0x14c   : > { %v2210_v24 = vadd.f32 %v2209_v20, %v2208_v34  ;;  %v1121_v50 = vadd.f32 %v1089_v55, %v1024_v3  ;;  %v1283_v0 = vmul.f32 %v3688_v43, %v671_v54  ;;  %v930_v35 = vadd.f32 %v898_v29, %v833_v45  ;;  %v1253_v20 = vld [vmem:[#allocation2 + $0x228] sm:$0xff] }
 0x14d   : > { %v995_v27 = vmul.f32 %v1252_v48, %v3663_v22  ;;  %v1187_v10 = vmul.f32 %v3672_v30, %v864_v44  ;;  %v2095_v59 = vadd.f32 %v2094_v21, %v2093_v42  ;;  %v1599_v28 = vadd.f32 %v4143_v40, %v1597_v6  ;;  %v1254_v42 = vld [vmem:[#allocation2 + $0x230] sm:$0xff] }
 0x14e   : > { %v4682_v14 = vadd.f32 %v4136_v31, %v2210_v24  ;;  %v1218_v62 = vadd.f32 %v1186_v60, %v4473_v32  ;;  %v2096_v52 = vsel %vm2066_vm6, %v4616_v33, 0.0  ;;  %v1026_v3 = vadd.f32 %v994_v7, %v929_v39  ;;  %v1349_v31 = vld [vmem:[#allocation2 + $0x211] sm:$0xff] }
 0x14f   : > { %v1091_v54 = vmul.f32 %v1348_v57, %v3666_v23  ;;  %v4691_v22 = vadd.f32 %v4516_v15, %v4425_v12  ;;  %v1122_v44 = vadd.f32 %v1090_v13, %v1025_v5  ;;  %v1188_v11 = vmul.f32 %v3672_v30, %v865_v53  ;;  %v1157_v12 = vld [vmem:[#allocation2 + $0x22f] sm:$0xff] }
 0x150   : > { %v1601_v58 = vadd.f32 %v4170_v37, %v1599_v28  ;;  %v1313_v40 = vadd.f32 %v4499_v8, %v4529_v56  ;;  %v1314_v32 = vadd.f32 %v1282_v1, %v1217_v61  ;;  %v1027_v36 = vadd.f32 %v995_v27, %v930_v35  ;;  %v5575_v61 = vld [vmem:[#allocation51_spill] sm:$0xff]  ;;  %v1351_v27 = vld [vmem:[#allocation2 + $0x231] sm:$0xff] }
 0x151   : > { %v1092_v33 = vmul.f32 %v1349_v31, %v3666_v23  ;;  %v1219_v25 = vadd.f32 %v1187_v10, %v1121_v50  ;;  %v1284_v17 = vmul.f32 %v3688_v43, %v1251_v26  ;;  %v2097_v47 = vadd.f32 %v2096_v52, %v2095_v59  ;;  %v5576_v50 = vld [vmem:[#allocation45_spill] sm:$0xff]  ;;  %v5577_v59 = vld [vmem:[#allocation28_spill] sm:$0xff] }
 0x152   : > { %v1603_v15 = vadd.f32 %v4173_v16, %v1601_v58  ;;  %v1315_v38 = vadd.f32 %v1283_v0, %v1218_v62  ;;  %v1379_v53 = vmul.f32 %v3693_v49, %v4636_v41  ;;  %v1123_v55 = vadd.f32 %v1091_v54, %v1026_v3 }
 0x153   : > { %v1189_v37 = vmul.f32 %v3672_v30, %v1156_v2  ;;  %v1380_v8 = vmul.f32 %v3693_v49, %v4638_v19  ;;  %v1220_v56 = vadd.f32 %v1188_v11, %v1122_v44  ;;  %v1285_v23 = vmul.f32 %v3688_v43, %v1252_v48  ;;  %v5578_v11 = vld [vmem:[#allocation40_spill] sm:$0xff] }
 0x154   : > { %v1605_v45 = vadd.f32 %v4278_v46, %v1603_v15  ;;  %v4709_v29 = vmul.f32 %v4403_v4, %v4403_v4  ;;  %v4712_v16 = vadd.f32 %v4524_v51, %v1313_v40  ;;  %v1124_v41 = vadd.f32 %v1092_v33, %v1027_v36 }
 0x155   : > { %v1190_v1 = vmul.f32 %v3672_v30, %v1157_v12  ;;  %v1316_v26 = vadd.f32 %v1284_v17, %v1219_v25  ;;  %v2099_v6 = vadd.f32 %v4125_v9, %v2097_v47  ;;  %v1381_v19 = vmul.f32 %v3693_v49, %v1348_v57  ;;  %v1350_v9 = vld [vmem:[#allocation2 + $0x229] sm:$0xff]  ;;  %v5580_v47 = vld [vmem:[#allocation41_spill] sm:$0xff] }
 0x156   : > { %v1607_v34 = vadd.f32 %v4288_v18, %v1605_v45  ;;  %v4720_v46 = vmul.f32 %v4691_v22, %v4691_v22  ;;  %v4722_v60 = vadd.f32 %v1379_v53, %v1314_v32  ;;  %v1221_v21 = vadd.f32 %v1189_v37, %v1123_v55  ;;  %v5579_v32 = vld [vmem:[#allocation36_spill] sm:$0xff]  ;;  %v5582_v55 = vld [vmem:[#allocation35_spill] sm:$0xff]  ;;  %v5583_v37 = vld [vmem:[#allocation46_spill] sm:$0xff] }
 0x157   : > { %v1286_v51 = vmul.f32 %v3688_v43, %v1253_v20  ;;  %v4725_v39 = vadd.f32 %v1380_v8, %v1315_v38  ;;  %v1317_v30 = vadd.f32 %v1285_v23, %v1220_v56  ;;  %v1382_v7 = vmul.f32 %v3693_v49, %v1349_v31  ;;  %v5581_v38 = vld [vmem:[#allocation42_spill] sm:$0xff] }
 0x158   : > { %v1609_v5 = vadd.f32 %v5575_v61, %v1607_v34  ;;  %v1610_v18 = vsel %vm1564_vm5, %v4709_v29, 0.0  ;;  %v4733_v13 = vmul.f32 %v4712_v16, %v4712_v16  ;;  %v1222_v24 = vadd.f32 %v1190_v1, %v1124_v41  ;;  %v5584_v1 = vld [vmem:[#allocation43_spill] sm:$0xff]  ;;  %v5587_v61 = vld [vmem:[#allocation38_spill] sm:$0xff] }
 0x159   : > { %v1287_v48 = vmul.f32 %v3688_v43, %v1254_v42  ;;  %v1491_v0 = vsel %vm1451_vm3, %v5576_v50, 0.0  ;;  %v4738_v35 = vadd.f32 %v1381_v19, %v1316_v26  ;;  %v2101_v57 = vadd.f32 %v5577_v59, %v2099_v6  ;;  %v5585_v6 = vld [vmem:[#allocation37_spill] sm:$0xff]  ;;  %v5586_v42 = vld [vmem:[#allocation50_spill] sm:$0xff] }
 0x15a   : > { %v1611_v10 = vadd.f32 %v1610_v18, %v1609_v5  ;;  %v4743_v28 = vmul.f32 %v4722_v60, %v4722_v60  ;;  %v1318_v62 = vadd.f32 %v1286_v51, %v1221_v21  ;;  %v1383_v52 = vmul.f32 %v3693_v49, %v1350_v9 }
 0x15b   : > { %v1612_v3 = vsel %vm1564_vm5, %v4720_v46, 0.0  ;;  %v4750_v43 = vmul.f32 %v4725_v39, %v4725_v39  ;;  %v4752_v54 = vadd.f32 %v1382_v7, %v1317_v30  ;;  %v2103_v31 = vadd.f32 %v5578_v11, %v2101_v57 }
 0x15c   : > { %v1613_v44 = vadd.f32 %v1612_v3, %v1611_v10  ;;  %v1319_v2 = vadd.f32 %v1287_v48, %v1222_v24  ;;  %v1384_v58 = vmul.f32 %v3693_v49, %v1351_v27  ;;  %v1614_v40 = vsel %vm1564_vm5, %v4733_v13, 0.0 }
 0x15d   : > { %v2214_v36 = vadd.f32 %v5579_v32, %v4682_v14  ;;  %v2106_v33 = vsel %vm2066_vm6, %v5576_v50, 0.0  ;;  %v4764_v25 = vmul.f32 %v4738_v35, %v4738_v35  ;;  %v2105_v12 = vadd.f32 %v5580_v47, %v2103_v31 }
 0x15e   : > { %v1615_v17 = vadd.f32 %v1614_v40, %v1613_v44  ;;  %v4767_v15 = vadd.f32 %v1383_v52, %v1318_v62  ;;  %v1616_v49 = vsel %vm1564_vm5, %v4743_v28, 0.0  ;;  %v1486_v14 = vadd.f32 %v5582_v55, %v4650_v63 }
 0x15f   : > { %v2216_v53 = vadd.f32 %v5581_v38, %v2214_v36  ;;  %v2108_v8 = vsel %vm2066_vm6, %v5583_v37, 0.0  ;;  %v4778_v56 = vmul.f32 %v4752_v54, %v4752_v54  ;;  %v2107_v20 = vadd.f32 %v2106_v33, %v2105_v12 }
 0x160   : > { %v1617_v23 = vadd.f32 %v1616_v49, %v1615_v17  ;;  %v4780_v45 = vadd.f32 %v1384_v58, %v1319_v2  ;;  %v1618_v41 = vsel %vm1564_vm5, %v4750_v43, 0.0  ;;  %v1488_v19 = vadd.f32 %v5585_v6, %v1486_v14 }
 0x161   : > { %v2218_v26 = vadd.f32 %v5584_v1, %v2216_v53  ;;  %v2219_v63 = vsel %vm2179_vm4, %v5576_v50, 0.0  ;;  %v2110_v34 = vsel %vm2066_vm6, %v5586_v42, 0.0  ;;  %v2109_v51 = vadd.f32 %v2108_v8, %v2107_v20 }
 0x162   : > { %v1619_v21 = vadd.f32 %v1618_v41, %v1617_v23  ;;  %v4792_v30 = vmul.f32 %v4767_v15, %v4767_v15  ;;  %v1620_v7 = vsel %vm1564_vm5, %v4764_v25, 0.0  ;;  %v1490_v5 = vadd.f32 %v5587_v61, %v1488_v19 }
 0x163   : > { %v2220_v9 = vadd.f32 %v2219_v63, %v2218_v26  ;;  %v2221_v18 = vsel %vm2179_vm4, %v5583_v37, 0.0  ;;  %v2112_v24 = vsel %vm2066_vm6, %v4709_v29, 0.0  ;;  %v2111_v50 = vadd.f32 %v2110_v34, %v2109_v51 }
 0x164   : > { %v1621_v48 = vadd.f32 %v1620_v7, %v1619_v21  ;;  %v4803_v27 = vmul.f32 %v4780_v45, %v4780_v45  ;;  %v1622_v10 = vsel %vm1564_vm5, %v4778_v56, 0.0  ;;  %v1492_v57 = vadd.f32 %v1491_v0, %v1490_v5 }
 0x165   : > { %v2222_v59 = vadd.f32 %v2221_v18, %v2220_v9  ;;  %v1493_v62 = vsel %vm1451_vm3, %v5583_v37, 0.0  ;;  %v2223_v52 = vsel %vm2179_vm4, %v5586_v42, 0.0  ;;  %v2113_v44 = vadd.f32 %v2112_v24, %v2111_v50 }
 0x166   : > { %v1623_v3 = vadd.f32 %v1622_v10, %v1621_v48  ;;  %v1624_v11 = vsel %vm1564_vm5, %v4792_v30, 0.0  ;;  %v1494_v2 = vadd.f32 %v1493_v62, %v1492_v57  ;;  %v1495_v58 = vsel %vm1451_vm3, %v5586_v42, 0.0 }
 0x167   : > { %v2224_v31 = vadd.f32 %v2223_v52, %v2222_v59  ;;  %v2225_v40 = vsel %vm2179_vm4, %v4709_v29, 0.0  ;;  %v1626_v32 = vsel %vm1564_vm5, %v4803_v27, 0.0  ;;  %v2114_v36 = vsel %vm2066_vm6, %v4720_v46, 0.0 }
 0x168   : > { %v1625_v0 = vadd.f32 %v1624_v11, %v1623_v3  ;;  %v1496_v17 = vadd.f32 %v1495_v58, %v1494_v2  ;;  %v1497_v47 = vsel %vm1451_vm3, %v4709_v29, 0.0  ;;  %v2115_v49 = vadd.f32 %v2114_v36, %v2113_v44 }
 0x169   : > { %v2226_v33 = vadd.f32 %v2225_v40, %v2224_v31  ;;  %v1499_v53 = vsel %vm1451_vm3, %v4720_v46, 0.0  ;;  %v2116_v14 = vsel %vm2066_vm6, %v4733_v13, 0.0  ;;  %v2227_v37 = vsel %vm2179_vm4, %v4720_v46, 0.0 }
 0x16a   : > { %v1627_v12 = vadd.f32 %v1626_v32, %v1625_v0  ;;  %v1498_v38 = vadd.f32 %v1497_v47, %v1496_v17  ;;  %v2117_v8 = vadd.f32 %v2116_v14, %v2115_v49  ;;  %v1501_v41 = vsel %vm1451_vm3, %v4733_v13, 0.0 }
 0x16b   : > { %v2228_v23 = vadd.f32 %v2227_v37, %v2226_v33  ;;  %v2118_v1 = vsel %vm2066_vm6, %v4743_v28, 0.0  ;;  %v2229_v26 = vsel %vm2179_vm4, %v4733_v13, 0.0  ;;  %v1503_v42 = vsel %vm1451_vm3, %v4743_v28, 0.0 }
 0x16c   : > { %v1628_v55 = vrot.slane %v1627_v12, 4  ;;  %v1500_v20 = vadd.f32 %v1499_v53, %v1498_v38  ;;  %v2119_v6 = vadd.f32 %v2118_v1, %v2117_v8  ;;  %v2120_v34 = vsel %vm2066_vm6, %v4750_v43, 0.0 }
 0x16d   : > { %v2230_v19 = vadd.f32 %v2229_v26, %v2228_v23  ;;  %v2231_v21 = vsel %vm2179_vm4, %v4743_v28, 0.0  ;;  %v1505_v61 = vsel %vm1451_vm3, %v4750_v43, 0.0  ;;  %v2122_v5 = vsel %vm2066_vm6, %v4764_v25, 0.0 }
 0x16e   : > { %v1629_v29 = vadd.f32 %v1628_v55, %v1627_v12  ;;  %v1502_v63 = vadd.f32 %v1501_v41, %v1500_v20  ;;  %v2121_v51 = vadd.f32 %v2120_v34, %v2119_v6  ;;  %v2233_v18 = vsel %vm2179_vm4, %v4750_v43, 0.0  ;;  %v5588_v34 = vld [vmem:[#allocation13_spill] sm:$0xff] }
 0x16f   : > { %v2232_v7 = vadd.f32 %v2231_v21, %v2230_v19  ;;  %v1507_v10 = vsel %vm1451_vm3, %v4764_v25, 0.0  ;;  %v2124_v59 = vsel %vm2066_vm6, %v4778_v56, 0.0  ;;  %v2235_v57 = vsel %vm2179_vm4, %v4764_v25, 0.0 }
 0x170   : > { %v1630_v46 = vrot.slane %v1629_v29, 2  ;;  %v1504_v9 = vadd.f32 %v1503_v42, %v1502_v63  ;;  %v2123_v24 = vadd.f32 %v2122_v5, %v2121_v51  ;;  %v1509_v44 = vsel %vm1451_vm3, %v4778_v56, 0.0  ;;  %v5589_v51 = vld [vmem:[#allocation14_spill] sm:$0xff] }
 0x171   : > { %v2234_v48 = vadd.f32 %v2233_v18, %v2232_v7  ;;  %v2126_v11 = vsel %vm2066_vm6, %v4792_v30, 0.0  ;;  %v2237_v31 = vsel %vm2179_vm4, %v4778_v56, 0.0  ;;  %v1511_v0 = vsel %vm1451_vm3, %v4792_v30, 0.0 }
 0x172   : > { %v1631_v13 = vadd.f32 %v1630_v46, %v1629_v29  ;;  %v1506_v50 = vadd.f32 %v1505_v61, %v1504_v9  ;;  %v2125_v62 = vadd.f32 %v2124_v59, %v2123_v24  ;;  %v2128_v32 = vsel %vm2066_vm6, %v4803_v27, 0.0 }
 0x173   : > { %v2236_v52 = vadd.f32 %v2235_v57, %v2234_v48  ;;  %v2239_v36 = vsel %vm2179_vm4, %v4792_v30, 0.0  ;;  %v1513_v12 = vsel %vm1451_vm3, %v4803_v27, 0.0  ;;  %v2241_v56 = vsel %vm2179_vm4, %v4803_v27, 0.0 }
 0x174   : > { %v1632_v28 = vrot.slane %v1631_v13, 1  ;;  %v1508_v3 = vadd.f32 %v1507_v10, %v1506_v50  ;;  %v2127_v2 = vadd.f32 %v2126_v11, %v2125_v62  ;;  %vm2761_vm5 = vcmask 1043456  }
 0x175   : > { %v2238_v58 = vadd.f32 %v2237_v31, %v2236_v52 }
 0x176   : > { %v1633_v43 = vadd.f32 %v1632_v28, %v1631_v13  ;;  %v1510_v40 = vadd.f32 %v1509_v44, %v1508_v3  ;;  %v2129_v33 = vadd.f32 %v2128_v32, %v2127_v2 }
 0x177   : > { %v2240_v17 = vadd.f32 %v2239_v36, %v2238_v58  ;;  %v5591_v36 = vld [vmem:[#allocation9_spill] sm:$0xff] }
 0x178   : > { %v1634_v25 = vmax.f32 %v1633_v43, 1e-24  ;;  %v1512_v47 = vadd.f32 %v1511_v0, %v1510_v40  ;;  %v2130_v49 = vrot.slane %v2129_v33, 4 }
 0x179   : > { %v4869_v38 = vadd.f32 %v2241_v56, %v2240_v17 }
 0x17a   : > { %3298 = vrsqrt.f32 %v1634_v25  ;;  %v4871_v53 = vadd.f32 %v1513_v12, %v1512_v47  ;;  %v2131_v55 = vadd.f32 %v2130_v49, %v2129_v33  ;;  %vm1641_vm8 = vweird.f32 %v1634_v25 }
 0x17b   : > { %v2243_v17 = vrot.slane %v4869_v38, 4 }
 0x17c   : > { %v2132_v14 = vrot.slane %v2131_v55, 2 }
 0x17d   : > { %v2244_v49 = vadd.f32 %v2243_v17, %v4869_v38  ;;  %v5599_v17 = vld [vmem:[#allocation47_spill] sm:$0xff] }
 0x17e   : > { %v2133_v30 = vadd.f32 %v2132_v14, %v2131_v55 }
 0x180   : > { %v3299_v37 = vpop.eup %3298  ;;  %v2134_v20 = vrot.slane %v2133_v30, 1 }
 0x181   : > { %v1636_v8 = vmul.f32 %v3299_v37, %v1634_v25  ;;  %vm1642_vm7 = vweird.f32 %v3299_v37  ;;  %v5590_v25 = vld [vmem:[#allocation8_spill] sm:$0xff] }
 0x182   : > { %v2135_v29 = vadd.f32 %v2134_v20, %v2133_v30  ;;  %vm1643_vm9 = vmor %vm1641_vm8, %vm1642_vm7 }
 0x183   : > { %v1637_v23 = vmul.f32 %v3299_v37, %v1636_v8 }
 0x184   : > { %v2136_v26 = vmax.f32 %v2135_v29, 1e-24 }
 0x185   : > { %v1638_v41 = vmul.f32 0.5, %v1637_v23  ;;  %v2245_v23 = vrot.slane %v2244_v49, 2 }
 0x186   : > { %3300 = vrsqrt.f32 %v2136_v26  ;;  %vm2143_vm11 = vweird.f32 %v2136_v26 }
 0x187   : > { %v1639_v1 = vsub.f32 1.5, %v1638_v41 }
 0x189   : > { %v1640_v6 = vmul.f32 %v3299_v37, %v1639_v1  ;;  %v2246_v1 = vadd.f32 %v2245_v23, %v2244_v49  ;;  %v5601_v23 = vld [vmem:[#allocation33_spill] sm:$0xff] }
 0x18b   : > { %v4873_v27 = vsel %vm1643_vm9, %v3299_v37, %v1640_v6 }
 0x18c   : > { %v1675_v19 = vmul.f32 %v4873_v27, %v4767_v15  ;;  %v1676_v63 = vmul.f32 %v4873_v27, %v4780_v45  ;;  %v1673_v42 = vmul.f32 %v4873_v27, %v4738_v35  ;;  %v1674_v46 = vmul.f32 %v4873_v27, %v4752_v54  ;;  %v3301_v61 = vpop.eup %3300 }
 0x18d   : > { %v1659_v21 = vmul.f32 %v4873_v27, %v5588_v34  ;;  %v1660_v7 = vmul.f32 %v4873_v27, %v5589_v51  ;;  %v2138_v18 = vmul.f32 %v3301_v61, %v2136_v26  ;;  %vm2144_vm10 = vweird.f32 %v3301_v61  ;;  %v5592_v26 = vld [vmem:[#allocation7_spill] sm:$0xff] }
 0x18e   : > { %v1708_v9 = vpack.c.bf16 %v1676_v63, %v1675_v19  ;;  %v1707_v13 = vpack.c.bf16 %v1674_v46, %v1673_v42  ;;  %vm2145_vm12 = vmor %vm2143_vm11, %vm2144_vm10  ;;  %v1671_v2 = vmul.f32 %v4873_v27, %v4722_v60  ;;  %v1672_v58 = vmul.f32 %v4873_v27, %v4725_v39  ;;  %v5593_v19 = vld [vmem:[#allocation12_spill] sm:$0xff] }
 0x18f   : > { %v1700_v5 = vpack.c.bf16 %v1660_v7, %v1659_v21  ;;  %v2139_v24 = vmul.f32 %v3301_v61, %v2138_v18  ;;  %v1657_v32 = vmul.f32 %v4873_v27, %v5590_v25  ;;  %v1658_v33 = vmul.f32 %v4873_v27, %v5591_v36  ;;  %v5594_v21 = vld [vmem:[#allocation49_spill] sm:$0xff] }
 0x190   : > { %1787 = vrot.lane.b32.xlu0 %v1708_v9, %s3375_s9  ;;  %1785 = vrot.lane.b32.xlu1 %v1707_v13, %s3375_s9  ;;  %v1706_v47 = vpack.c.bf16 %v1672_v58, %v1671_v2  ;;  %v1669_v37 = vmul.f32 %v4873_v27, %v4691_v22  ;;  %v1670_v8 = vmul.f32 %v4873_v27, %v4712_v16  ;;  %v5597_v2 = vld [vmem:[#allocation29_spill] sm:$0xff] }
 0x191   : > { %1771 = vrot.lane.b32.xlu2 %v1700_v5, %s3375_s9  ;;  %v2140_v48 = vmul.f32 0.5, %v2139_v24  ;;  %v1699_v56 = vpack.c.bf16 %v1658_v33, %v1657_v32  ;;  %v1655_v6 = vmul.f32 %v4873_v27, %v5592_v26  ;;  %v1656_v63 = vmul.f32 %v4873_v27, %v5593_v19 }
 0x192   : > { %v1705_v41 = vpack.c.bf16 %v1670_v8, %v1669_v37  ;;  %v1667_v7 = vmul.f32 %v4873_v27, %v5594_v21  ;;  %v1668_v9 = vmul.f32 %v4873_v27, %v4403_v4  ;;  %v1665_v58 = vmul.f32 %v4873_v27, %v5597_v2 }
 0x193   : > { %v2141_v50 = vsub.f32 1.5, %v2140_v48  ;;  %v1698_v13 = vpack.c.bf16 %v1656_v63, %v1655_v6 }
 0x194   : > { %v1704_v18 = vpack.c.bf16 %v1668_v9, %v1667_v7 }
 0x195   : > { %v2142_v10 = vmul.f32 %v3301_v61, %v2141_v50 }
 0x197   : > { %v4890_v28 = vsel %vm2145_vm12, %v3301_v61, %v2142_v10  ;;  %v2247_v61 = vrot.slane %v2246_v1, 1  ;;  %v5595_v10 = vld [vmem:[#allocation52_spill] sm:$0xff] }
 0x198   : > { %v2177_v59 = vmul.f32 %v4890_v28, %v4767_v15  ;;  %v2178_v57 = vmul.f32 %v4890_v28, %v4780_v45  ;;  %v2175_v62 = vmul.f32 %v4890_v28, %v4738_v35  ;;  %v2176_v52 = vmul.f32 %v4890_v28, %v4752_v54 }
 0x199   : > { %v2161_v3 = vmul.f32 %v4890_v28, %v5588_v34  ;;  %v2162_v44 = vmul.f32 %v4890_v28, %v5589_v51  ;;  %v2173_v40 = vmul.f32 %v4890_v28, %v4722_v60  ;;  %v2174_v0 = vmul.f32 %v4890_v28, %v4725_v39 }
 0x19a   : > { %v2307_v43 = vpack.c.bf16 %v2178_v57, %v2177_v59  ;;  %v2306_v11 = vpack.c.bf16 %v2176_v52, %v2175_v62  ;;  %v2159_v55 = vmul.f32 %v4890_v28, %v5590_v25  ;;  %v2160_v14 = vmul.f32 %v4890_v28, %v5591_v36  ;;  %v5596_v57 = vld [vmem:[#allocation53_spill] sm:$0xff] }
 0x19b   : > { %v2299_v31 = vpack.c.bf16 %v2162_v44, %v2161_v3  ;;  %v2305_v12 = vpack.c.bf16 %v2174_v0, %v2173_v40  ;;  %v2171_v30 = vmul.f32 %v4890_v28, %v4691_v22  ;;  %v2172_v38 = vmul.f32 %v4890_v28, %v4712_v16  ;;  %v5598_v40 = vld [vmem:[#allocation30_spill] sm:$0xff] }
 0x19c   : > { %2370 = vrot.lane.b32.xlu0 %v2307_v43, %s3376_s10  ;;  %2368 = vrot.lane.b32.xlu1 %v2306_v11, %s3376_s10  ;;  %v2298_v20 = vpack.c.bf16 %v2160_v14, %v2159_v55  ;;  %v2157_v42 = vmul.f32 %v4890_v28, %v5592_v26  ;;  %v2158_v46 = vmul.f32 %v4890_v28, %v5593_v19 }
 0x19d   : > { %2354 = vrot.lane.b32.xlu2 %v2299_v31, %s3376_s10  ;;  %v2304_v29 = vpack.c.bf16 %v2172_v38, %v2171_v30  ;;  %v2248_v24 = vadd.f32 %v2247_v61, %v2246_v1  ;;  %v2169_v48 = vmul.f32 %v4890_v28, %v5594_v21  ;;  %v2170_v50 = vmul.f32 %v4890_v28, %v4403_v4  ;;  %v5603_v61 = vld [vmem:[#allocation39_spill] sm:$0xff] }
 0x19e   : > { %v2297_v5 = vpack.c.bf16 %v2158_v46, %v2157_v42  ;;  %v2155_v59 = vmul.f32 %v4890_v28, %v5595_v10  ;;  %v2156_v62 = vmul.f32 %v4890_v28, %v5596_v57  ;;  %v1653_v52 = vmul.f32 %v4873_v27, %v5595_v10 }
 0x19f   : > { %v1654_v3 = vmul.f32 %v4873_v27, %v5596_v57  ;;  %v2249_v44 = vmax.f32 %v2248_v24, 1e-24  ;;  %v2303_v43 = vpack.c.bf16 %v2170_v50, %v2169_v48  ;;  %v1666_v0 = vmul.f32 %v4873_v27, %v5598_v40  ;;  %v5605_v50 = vld [vmem:[#allocation31_spill] sm:$0xff] }
 0x1a0   : > { %v2296_v11 = vpack.c.bf16 %v2156_v62, %v2155_v59  ;;  %v2167_v32 = vmul.f32 %v4890_v28, %v5597_v2  ;;  %v2168_v33 = vmul.f32 %v4890_v28, %v5598_v40  ;;  %v2153_v30 = vmul.f32 %v4890_v28, %v5599_v17  ;;  %v5606_v62 = vld [vmem:[#allocation32_spill] sm:$0xff] }
 0x1a1   : > { %v1697_v31 = vpack.c.bf16 %v1654_v3, %v1653_v52  ;;  %3302 = vrsqrt.f32 %v2249_v44  ;;  %v1703_v49 = vpack.c.bf16 %v1666_v0, %v1665_v58  ;;  %v2165_v1 = vmul.f32 %v4890_v28, %v5601_v23 }
 0x1a2   : > { %v2302_v14 = vpack.c.bf16 %v2168_v33, %v2167_v32  ;;  %v2151_v24 = vmul.f32 %v4890_v28, %v5603_v61  ;;  %v1661_v59 = vmul.f32 %v4873_v27, %v5605_v50  ;;  %v1662_v52 = vmul.f32 %v4873_v27, %v5606_v62  ;;  %v5607_v33 = vld [vmem:[#allocation25_spill] sm:$0xff] }
 0x1a3   : > { %v2163_v0 = vmul.f32 %v4890_v28, %v5605_v50  ;;  %v2164_v32 = vmul.f32 %v4890_v28, %v5606_v62  ;;  %vm2256_vm14 = vweird.f32 %v2249_v44 }
 0x1a4   : > { %1783 = vrot.lane.b32.xlu0 %v1706_v47, %s3375_s9  ;;  %2366 = vrot.lane.b32.xlu1 %v2305_v12, %s3376_s10  ;;  %v1651_v47 = vmul.f32 %v4873_v27, %v5599_v17  ;;  %v5600_v12 = vld [vmem:[#allocation48_spill] sm:$0xff] }
 0x1a5   : > { %1769 = vrot.lane.b32.xlu2 %v1699_v56, %s3375_s9  ;;  %v1652_v56 = vmul.f32 %v4873_v27, %v5600_v12  ;;  %v2154_v38 = vmul.f32 %v4890_v28, %v5600_v12 }
 0x1a7   : > { %v3303_v55 = vpop.eup %3302  ;;  %v1696_v37 = vpack.c.bf16 %v1652_v56, %v1651_v47  ;;  %v2295_v42 = vpack.c.bf16 %v2154_v38, %v2153_v30  ;;  %v2149_v47 = vmul.f32 %v4890_v28, %v5607_v33  ;;  %v5608_v56 = vld [vmem:[#allocation27_spill] sm:$0xff] }
 0x1a8   : > { %v2251_v8 = vmul.f32 %v3303_v55, %v2249_v44  ;;  %vm2257_vm13 = vweird.f32 %v3303_v55 }
 0x1a9   : > { %vm2258_vm15 = vmor %vm2256_vm14, %vm2257_vm13 }
 0x1aa   : > { %v2252_v63 = vmul.f32 %v3303_v55, %v2251_v8  ;;  %v2300_v8 = vpack.c.bf16 %v2164_v32, %v2163_v0 }
 0x1ac   : > { %2352 = vrot.lane.b32.xlu0 %v2298_v20, %s3376_s10  ;;  %1781 = vrot.lane.b32.xlu1 %v1705_v41, %s3375_s9  ;;  %v1663_v20 = vmul.f32 %v4873_v27, %v5601_v23  ;;  %v5602_v41 = vld [vmem:[#allocation34_spill] sm:$0xff]  ;;  %v2253_v9 = vmul.f32 0.5, %v2252_v63  ;;  %v5610_v63 = vld [vmem:[#allocation11_spill] sm:$0xff] }
 0x1ad   : > { %2364 = vrot.lane.b32.xlu2 %v2304_v29, %s3376_s10  ;;  %v1664_v29 = vmul.f32 %v4873_v27, %v5602_v41  ;;  %v2166_v6 = vmul.f32 %v4890_v28, %v5602_v41 }
 0x1ae   : > { %v2254_v3 = vsub.f32 1.5, %v2253_v9 }
 0x1af   : > { %v1702_v46 = vpack.c.bf16 %v1664_v29, %v1663_v20  ;;  %v2301_v7 = vpack.c.bf16 %v2166_v6, %v2165_v1  ;;  %v5609_v6 = vld [vmem:[#allocation6_spill] sm:$0xff] }
 0x1b0   : > { %v2255_v58 = vmul.f32 %v3303_v55, %v2254_v3  ;;  %v2147_v44 = vmul.f32 %v4890_v28, %v5609_v6 }
 0x1b2   : > { %v5026_v30 = vsel %vm2258_vm15, %v3303_v55, %v2255_v58  ;;  %v2148_v55 = vmul.f32 %v4890_v28, %v5610_v63 }
 0x1b3   : > { %v2290_v29 = vmul.f32 %v5026_v30, %v4767_v15  ;;  %v2291_v1 = vmul.f32 %v5026_v30, %v4780_v45  ;;  %v2272_v0 = vmul.f32 %v5026_v30, %v5590_v25  ;;  %v2273_v32 = vmul.f32 %v5026_v30, %v5591_v36 }
 0x1b4   : > { %1767 = vrot.lane.b32.xlu0 %v1698_v13, %s3375_s9  ;;  %2350 = vrot.lane.b32.xlu1 %v2297_v5, %s3376_s10  ;;  %v1649_v13 = vmul.f32 %v4873_v27, %v5603_v61  ;;  %v5604_v5 = vld [vmem:[#allocation44_spill] sm:$0xff]  ;;  %v2292_v9 = vpack.c.bf16 %v2148_v55, %v2147_v44  ;;  %v2283_v44 = vmul.f32 %v5026_v30, %v4403_v4 }
 0x1b5   : > { %1779 = vrot.lane.b32.xlu2 %v1704_v18, %s3375_s9  ;;  %v1650_v18 = vmul.f32 %v4873_v27, %v5604_v5  ;;  %v2152_v48 = vmul.f32 %v4890_v28, %v5604_v5 }
 0x1bc   : > { %2362 = vrot.lane.b32.xlu0 %v2303_v43, %s3376_s10  ;;  %1765 = vrot.lane.b32.xlu1 %v1697_v31, %s3375_s9  ;;  %v1695_v43 = vpack.c.bf16 %v1650_v18, %v1649_v13  ;;  %v1701_v31 = vpack.c.bf16 %v1662_v52, %v1661_v59  ;;  %v2288_v18 = vmul.f32 %v5026_v30, %v4738_v35  ;;  %v1515_v52 = vrot.slane %v4871_v53, 4 }
 0x1bd   : > { %2348 = vrot.lane.b32.xlu2 %v2296_v11, %s3376_s10  ;;  %v2294_v11 = vpack.c.bf16 %v2152_v48, %v2151_v24  ;;  %v2286_v24 = vmul.f32 %v5026_v30, %v4722_v60  ;;  %v2274_v48 = vmul.f32 %v5026_v30, %v5588_v34  ;;  %v2275_v59 = vmul.f32 %v5026_v30, %v5589_v51 }
 0x1be   : > { %v1516_v58 = vadd.f32 %v1515_v52, %v4871_v53  ;;  %v2284_v53 = vmul.f32 %v5026_v30, %v4691_v22 }
 0x1c4   : > { %1777 = vrot.lane.b32.xlu0 %v1703_v49, %s3375_s9  ;;  %2360 = vrot.lane.b32.xlu1 %v2302_v14, %s3376_s10  ;;  %v2150_v49 = vmul.f32 %v4890_v28, %v5608_v56  ;;  %v1647_v14 = vmul.f32 %v4873_v27, %v5607_v33  ;;  %v2289_v28 = vmul.f32 %v5026_v30, %v4752_v54 }
 0x1c5   : > { %1763 = vrot.lane.b32.xlu2 %v1696_v37, %s3375_s9  ;;  %v1648_v37 = vmul.f32 %v4873_v27, %v5608_v56 }
 0x1c6   : > { %v2293_v38 = vpack.c.bf16 %v2150_v49, %v2149_v47  ;;  %v2270_v47 = vmul.f32 %v5026_v30, %v5592_v26  ;;  %v2271_v49 = vmul.f32 %v5026_v30, %v5593_v19 }
 0x1c7   : > { %v1694_v20 = vpack.c.bf16 %v1648_v37, %v1647_v14  ;;  %v2285_v14 = vmul.f32 %v5026_v30, %v4712_v16  ;;  %v1517_v37 = vrot.slane %v1516_v58, 2 }
 0x1cc   : > { %2346 = vrot.lane.b32.xlu0 %v2295_v42, %s3376_s10  ;;  %1775 = vrot.lane.b32.xlu1 %v1702_v46, %s3375_s9  ;;  %v1645_v42 = vmul.f32 %v4873_v27, %v5609_v6  ;;  %v1646_v46 = vmul.f32 %v4873_v27, %v5610_v63  ;;  %v2287_v27 = vmul.f32 %v5026_v30, %v4725_v39 }
 0x1cd   : > { %2358 = vrot.lane.b32.xlu2 %v2301_v7, %s3376_s10  ;;  %v2323_v7 = vpack.c.bf16 %v2291_v1, %v2290_v29  ;;  %v1518_v29 = vadd.f32 %v1517_v37, %v1516_v58  ;;  %v2282_v1 = vmul.f32 %v5026_v30, %v5594_v21  ;;  %v2278_v58 = vmul.f32 %v5026_v30, %v5601_v23 }
 0x1ce   : > { %v1693_v13 = vpack.c.bf16 %v1646_v46, %v1645_v42  ;;  %v2268_v42 = vmul.f32 %v5026_v30, %v5595_v10  ;;  %v2269_v46 = vmul.f32 %v5026_v30, %v5596_v57 }
 0x1d4   : > { %1761 = vrot.lane.b32.xlu0 %v1695_v43, %s3375_s9  ;;  %2344 = vrot.lane.b32.xlu1 %v2294_v11, %s3376_s10  ;;  %v2322_v43 = vpack.c.bf16 %v2289_v28, %v2288_v18  ;;  %v2321_v11 = vpack.c.bf16 %v2287_v27, %v2286_v24  ;;  %v2280_v28 = vmul.f32 %v5026_v30, %v5597_v2 }
 0x1d5   : > { %1773 = vrot.lane.b32.xlu2 %v1701_v31, %s3375_s9  ;;  %v2315_v31 = vpack.c.bf16 %v2275_v59, %v2274_v48  ;;  %v2281_v24 = vmul.f32 %v5026_v30, %v5598_v40  ;;  %v2266_v48 = vmul.f32 %v5026_v30, %v5599_v17  ;;  %v2267_v59 = vmul.f32 %v5026_v30, %v5600_v12 }
 0x1dc   : > { %2356 = vrot.lane.b32.xlu0 %v2300_v8, %s3376_s10  ;;  %1759 = vrot.lane.b32.xlu1 %v1694_v20, %s3375_s9  ;;  %v2314_v8 = vpack.c.bf16 %v2273_v32, %v2272_v0  ;;  %v2320_v20 = vpack.c.bf16 %v2285_v14, %v2284_v53  ;;  %v2279_v0 = vmul.f32 %v5026_v30, %v5602_v41 }
 0x1dd   : > { %2342 = vrot.lane.b32.xlu2 %v2293_v38, %s3376_s10  ;;  %v2313_v38 = vpack.c.bf16 %v2271_v49, %v2270_v47  ;;  %v2264_v32 = vmul.f32 %v5026_v30, %v5603_v61  ;;  %v2265_v47 = vmul.f32 %v5026_v30, %v5604_v5 }
 0x1de   : > { %v2317_v14 = vpack.c.bf16 %v2279_v0, %v2278_v58 }
 0x1df   : > { %v2310_v37 = vpack.c.bf16 %v2265_v47, %v2264_v32 }
 0x1e4   : > { %2466 = vrot.lane.b32.xlu0 %v2323_v7, %s3377_s11  ;;  %1757 = vrot.lane.b32.xlu1 %v1693_v13, %s3375_s9  ;;  %v1519_v7 = vrot.slane %v1518_v29, 1  ;;  %v2312_v13 = vpack.c.bf16 %v2269_v46, %v2268_v42 }
 0x1e5   : > { %2340 = vrot.lane.b32.xlu2 %v2292_v9, %s3376_s10  ;;  %v2319_v9 = vpack.c.bf16 %v2283_v44, %v2282_v1  ;;  %v2262_v44 = vmul.f32 %v5026_v30, %v5607_v33 }
 0x1e6   : > { %v1520_v18 = vadd.f32 %v1519_v7, %v1518_v29  ;;  %v2277_v29 = vmul.f32 %v5026_v30, %v5606_v62 }
 0x1eb   : > { %v1772_v3 = vpop.permute.xlu2 %1771 }
 0x1ec   : > { %1805 = vmatpush.bf16.msra.mxu1 %v1772_v3  ;;  %2464 = vrot.lane.b32.xlu0 %v2322_v43, %s3377_s11  ;;  %v1521_v3 = vmax.f32 %v1520_v18, 1e-24  ;;  %v2318_v43 = vpack.c.bf16 %v2281_v24, %v2280_v28  ;;  %v2260_v28 = vmul.f32 %v5026_v30, %v5609_v6  ;;  %v2261_v24 = vmul.f32 %v5026_v30, %v5610_v63 }
 0x1ed   : > { %2462 = vrot.lane.b32.xlu2 %v2321_v11, %s3377_s11  ;;  %2450 = vrot.lane.b32.xlu1 %v2315_v31, %s3377_s11  ;;  %v2311_v11 = vpack.c.bf16 %v2267_v59, %v2266_v48 }
 0x1ee   : > { %3304 = vrsqrt.f32 %v1521_v3  ;;  %v2308_v59 = vpack.c.bf16 %v2261_v24, %v2260_v28  ;;  %vm1528_vm2 = vweird.f32 %v1521_v3 }
 0x1f4   : > { %2448 = vrot.lane.b32.xlu0 %v2314_v8, %s3377_s11  ;;  %v3305_v49 = vpop.eup %3304 }
 0x1f5   : > { %2446 = vrot.lane.b32.xlu2 %v2313_v38, %s3377_s11  ;;  %2460 = vrot.lane.b32.xlu1 %v2320_v20, %s3377_s11  ;;  %v1523_v8 = vmul.f32 %v3305_v49, %v1521_v3  ;;  %v2276_v20 = vmul.f32 %v5026_v30, %v5605_v50  ;;  %vm1529_vm1 = vweird.f32 %v3305_v49 }
 0x1f6   : > { %vm1530_vm4 = vmor %vm1528_vm2, %vm1529_vm1 }
 0x1f7   : > { %v2355_v55 = vpop.permute.xlu2 %2354  ;;  %v1524_v42 = vmul.f32 %v3305_v49, %v1523_v8  ;;  %v2316_v46 = vpack.c.bf16 %v2277_v29, %v2276_v20 }
 0x1f8   : > { %3235 = vmatpush.lsf.bf16.msrb.mxu1 %v2355_v55  ;;  %v2263_v55 = vmul.f32 %v5026_v30, %v5608_v56 }
 0x1fa   : > { %v2309_v7 = vpack.c.bf16 %v2263_v55, %v2262_v44 }
 0x1fc   : > { %2458 = vrot.lane.b32.xlu0 %v2319_v9, %s3377_s11 }
 0x1fd   : > { %2444 = vrot.lane.b32.xlu2 %v2312_v13, %s3377_s11  ;;  %v1525_v13 = vmul.f32 0.5, %v1524_v42 }
 0x1ff   : > { %v1770_v27 = vpop.permute.xlu2 %1769  ;;  %v1526_v48 = vsub.f32 1.5, %v1525_v13 }
 0x200   : > { %1806 = vmatpush.bf16.msra.mxu1 %v1770_v27 }
 0x202   : > { %v1788_v52 = vpop.permute.xlu0 %1787  ;;  %v1786_v31 = vpop.permute.xlu1 %1785 }
 0x203   : > { %1818 = vmatpush.bf16.msra.mxu2 %v1788_v52  ;;  %v1527_v52 = vmul.f32 %v3305_v49, %v1526_v48 }
 0x204   : > { %2456 = vrot.lane.b32.xlu0 %v2318_v43, %s3377_s11 }
 0x205   : > { %2442 = vrot.lane.b32.xlu2 %v2311_v11, %s3377_s11  ;;  %v5123_v58 = vsel %vm1530_vm4, %v3305_v49, %v1527_v52 }
 0x206   : > { %v1532_v30 = vmul.f32 %v5123_v58, %v5609_v6  ;;  %v1533_v0 = vmul.f32 %v5123_v58, %v5610_v63  ;;  %v1548_v32 = vmul.f32 %v5123_v58, %v5605_v50  ;;  %v1549_v47 = vmul.f32 %v5123_v58, %v5606_v62 }
 0x207   : > { %1819 = vmatpush.bf16.msra.mxu2 %v1786_v31  ;;  %v2365_v53 = vpop.permute.xlu2 %2364  ;;  %v1534_v29 = vmul.f32 %v5123_v58, %v5607_v33  ;;  %v1550_v44 = vmul.f32 %v5123_v58, %v5601_v23  ;;  %v1551_v55 = vmul.f32 %v5123_v58, %v5602_v41  ;;  %v1536_v24 = vmul.f32 %v5123_v58, %v5603_v61 }
 0x208   : > { %v1677_v49 = vpack.c.bf16 %v1533_v0, %v1532_v30  ;;  %v1552_v48 = vmul.f32 %v5123_v58, %v5597_v2 }
 0x20c   : > { %2454 = vrot.lane.b32.xlu0 %v2317_v14, %s3377_s11 }
 0x20d   : > { %2440 = vrot.lane.b32.xlu2 %v2310_v37, %s3377_s11  ;;  %v1685_v37 = vpack.c.bf16 %v1549_v47, %v1548_v32 }
 0x20e   : > { %v2371_v38 = vpop.permute.xlu0 %2370  ;;  %v2369_v1 = vpop.permute.xlu1 %2368 }
 0x20f   : > { %3252 = vmatpush.lsf.bf16.msrb.mxu2 %v2371_v38  ;;  %v1780_v9 = vpop.permute.xlu2 %1779 }
 0x213   : > { %3253 = vmatpush.lsf.bf16.msrb.mxu2 %v2369_v1  ;;  %v1535_v1 = vmul.f32 %v5123_v58, %v5608_v56 }
 0x214   : > { %2452 = vrot.lane.b32.xlu0 %v2316_v46, %s3377_s11 }
 0x215   : > { %2438 = vrot.lane.b32.xlu2 %v2309_v7, %s3377_s11  ;;  %v1678_v7 = vpack.c.bf16 %v1535_v1, %v1534_v29  ;;  %v1541_v29 = vmul.f32 %v5123_v58, %v5596_v57  ;;  %v1556_v1 = vmul.f32 %v5123_v58, %v4691_v22 }
 0x216   : > { %v1784_v18 = vpop.permute.xlu0 %1783  ;;  %v2367_v27 = vpop.permute.xlu1 %2366 }
 0x217   : > { %1820 = vmatpush.bf16.msra.mxu2 %v1784_v18  ;;  %v2349_v43 = vpop.permute.xlu2 %2348 }
 0x21b   : > { %3254 = vmatpush.lsf.bf16.msrb.mxu2 %v2367_v27  ;;  %v1537_v27 = vmul.f32 %v5123_v58, %v5604_v5 }
 0x21c   : > { %2436 = vrot.lane.b32.xlu0 %v2308_v59, %s3377_s11  ;;  %v1553_v59 = vmul.f32 %v5123_v58, %v5598_v40 }
 0x21e   : > { %v2353_v11 = vpop.permute.xlu0 %2352  ;;  %v1782_v31 = vpop.permute.xlu1 %1781  ;;  %v1687_v30 = vpack.c.bf16 %v1553_v59, %v1552_v48  ;;  %v1560_v48 = vmul.f32 %v5123_v58, %v4738_v35  ;;  %v1561_v59 = vmul.f32 %v5123_v58, %v4752_v54 }
 0x21f   : > { %3255 = vmatpush.lsf.bf16.msrb.mxu2 %v2365_v53  ;;  %3236 = vmatpush.lsf.bf16.msrb.mxu1 %v2353_v11  ;;  %v1764_v14 = vpop.permute.xlu2 %1763 }
 0x223   : > { %1821 = vmatpush.bf16.msra.mxu2 %v1782_v31  ;;  %v1679_v31 = vpack.c.bf16 %v1537_v27, %v1536_v24  ;;  %v1544_v24 = vmul.f32 %v5123_v58, %v5590_v25  ;;  %v1545_v27 = vmul.f32 %v5123_v58, %v5591_v36 }
 0x226   : > { %v1768_v3 = vpop.permute.xlu0 %1767  ;;  %v2351_v53 = vpop.permute.xlu1 %2350 }
 0x227   : > { %1822 = vmatpush.bf16.msra.mxu2 %v1780_v9  ;;  %1807 = vmatpush.bf16.msra.mxu1 %v1768_v3  ;;  %v2359_v20 = vpop.permute.xlu2 %2358  ;;  %v1686_v9 = vpack.c.bf16 %v1551_v55, %v1550_v44  ;;  %v1538_v3 = vmul.f32 %v5123_v58, %v5599_v17  ;;  %v1557_v44 = vmul.f32 %v5123_v58, %v4712_v16 }
 0x22a   : > { %3288 = vxpose.binary.xlu1.c.b16.start [1/16] (narrow) %v1677_v49, %v1685_v37, 16  ;;  %v1555_v49 = vmul.f32 %v5123_v58, %v4403_v4 }
 0x22b   : > { %3237 = vmatpush.lsf.bf16.msrb.mxu1 %v2351_v53  ;;  %v1539_v53 = vmul.f32 %v5123_v58, %v5600_v12 }
 0x22e   : > { %v2363_v8 = vpop.permute.xlu0 %2362  ;;  %v1766_v38 = vpop.permute.xlu1 %1765 }
 0x22f   : > { %3238 = vmatpush.lsf.bf16.msrb.mxu1 %v2349_v43  ;;  %3256 = vmatpush.lsf.bf16.msrb.mxu2 %v2363_v8  ;;  %v1774_v13 = vpop.permute.xlu2 %1773  ;;  %v1680_v8 = vpack.c.bf16 %v1539_v53, %v1538_v3 }
 0x233   : > { %1808 = vmatpush.bf16.msra.mxu1 %v1766_v38 }
 0x236   : > { %v1778_v42 = vpop.permute.xlu0 %1777  ;;  %v2361_v46 = vpop.permute.xlu1 %2360 }
 0x237   : > { %1809 = vmatpush.bf16.msra.mxu1 %v1764_v14  ;;  %1823 = vmatpush.bf16.msra.mxu2 %v1778_v42  ;;  %v2343_v52 = vpop.permute.xlu2 %2342  ;;  %v1554_v14 = vmul.f32 %v5123_v58, %v5594_v21  ;;  %v1689_v42 = vpack.c.bf16 %v1557_v44, %v1556_v1 }
 0x239   : > { %v1688_v38 = vpack.c.bf16 %v1555_v49, %v1554_v14 }
 0x23a   : > { %3289 = vxpose.binary.xlu1.c.b16.cont [2/16] (narrow) %v1678_v7, %v1686_v9, 16  ;;  %v1543_v7 = vmul.f32 %v5123_v58, %v5593_v19  ;;  %v1558_v9 = vmul.f32 %v5123_v58, %v4722_v60 }
 0x23b   : > { %3257 = vmatpush.lsf.bf16.msrb.mxu2 %v2361_v46  ;;  %v1542_v46 = vmul.f32 %v5123_v58, %v5592_v26 }
 0x23e   : > { %v2347_v18 = vpop.permute.xlu0 %2346  ;;  %v1776_v28 = vpop.permute.xlu1 %1775 }
 0x23f   : > { %3258 = vmatpush.lsf.bf16.msrb.mxu2 %v2359_v20  ;;  %3239 = vmatpush.lsf.bf16.msrb.mxu1 %v2347_v18  ;;  %v2341_v47 = vpop.permute.xlu2 %2340  ;;  %v1540_v20 = vmul.f32 %v5123_v58, %v5595_v10  ;;  %v1682_v18 = vpack.c.bf16 %v1543_v7, %v1542_v46 }
 0x241   : > { %v1681_v55 = vpack.c.bf16 %v1541_v29, %v1540_v20 }
 0x243   : > { %1824 = vmatpush.bf16.msra.mxu2 %v1776_v28 }
 0x246   : > { %v1762_v43 = vpop.permute.xlu0 %1761  ;;  %v2345_v11 = vpop.permute.xlu1 %2344 }
 0x247   : > { %1825 = vmatpush.bf16.msra.mxu2 %v1774_v13  ;;  %1810 = vmatpush.bf16.msra.mxu1 %v1762_v43  ;;  %v1559_v13 = vmul.f32 %v5123_v58, %v4725_v39  ;;  %v1691_v43 = vpack.c.bf16 %v1561_v59, %v1560_v48  ;;  %v2463_v49 = vpop.permute.xlu2 %2462 }
 0x249   : > { %v1690_v28 = vpack.c.bf16 %v1559_v13, %v1558_v9  ;;  %v5191_v9 = vpack.c.bf16 %v5606_v62, %v5605_v50 }
 0x24a   : > { %3290 = vxpose.binary.xlu1.c.b16.cont [3/16] (narrow) %v1679_v31, %v1687_v30, 16  ;;  %v1547_v31 = vmul.f32 %v5123_v58, %v5589_v51  ;;  %v1562_v30 = vmul.f32 %v5123_v58, %v4767_v15 }
 0x24b   : > { %3240 = vmatpush.lsf.bf16.msrb.mxu1 %v2345_v11  ;;  %v1546_v11 = vmul.f32 %v5123_v58, %v5588_v34 }
 0x24e   : > { %v2357_v0 = vpop.permute.xlu0 %2356  ;;  %v1760_v32 = vpop.permute.xlu1 %1759 }
 0x24f   : > { %3241 = vmatpush.lsf.bf16.msrb.mxu1 %v2343_v52  ;;  %3259 = vmatpush.lsf.bf16.msrb.mxu2 %v2357_v0  ;;  %v1683_v52 = vpack.c.bf16 %v1545_v27, %v1544_v24  ;;  %v1563_v0 = vmul.f32 %v5123_v58, %v4780_v45  ;;  %v1832_v27 = vstv %s1831_s13 }
 0x251   : > { %3260 = vllmr.2.mxu2 }
 0x253   : > { %1811 = vmatpush.bf16.msra.mxu1 %v1760_v32  ;;  %v1684_v32 = vpack.c.bf16 %v1547_v31, %v1546_v11 }
 0x256   : > { %v1758_v37 = vpop.permute.xlu1 %1757  ;;  %v2467_v3 = vpop.permute.xlu0 %2466 }
 0x257   : > { %3242 = vmatpush.lsf.bf16.msrb.mxu1 %v2341_v47  ;;  %v1692_v47 = vpack.c.bf16 %v1563_v0, %v1562_v30  ;;  %v1846_v30 = vpack.c.bf16 %v5608_v56, %v5607_v33  ;;  %v2511_v0 = vstv %s3172_s14  ;;  %v1848_v33 = vpack.c.bf16 %v5600_v12, %v5599_v17 }
 0x258   : > { %v1849_v56 = vpack.c.bf16 %v5596_v57, %v5595_v10  ;;  %v1852_v17 = vpack.c.bf16 %v5589_v51, %v5588_v34  ;;  %v1854_v10 = vpack.c.bf16 %v5602_v41, %v5601_v23  ;;  %v1857_v34 = vpack.c.bf16 %v4712_v16, %v4691_v22 }
 0x259   : > { %3243 = vllmr.2.mxu1  ;;  %v1858_v57 = vpack.c.bf16 %v4725_v39, %v4722_v60  ;;  %v1860_v22 = vpack.c.bf16 %v4780_v45, %v4767_v15 }
 0x25a   : > { %3291 = vxpose.binary.xlu1.c.b16.cont [4/16] (narrow) %v1680_v8, %v1688_v38, 16  ;;  %v2447_v38 = vpop.permute.xlu2 %2446 }
 0x25b   : > { %1812 = vmatpush.bf16.msra.mxu1 %v1758_v37 }
 0x25e   : > { %v2465_v53 = vpop.permute.xlu0 %2464 }
 0x25f   : > { %v2451_v14 = vpop.permute.xlu1 %2450 }
 0x262   : > { %v2445_v1 = vpop.permute.xlu2 %2444 }
 0x266   : > { %v2449_v37 = vpop.permute.xlu0 %2448 }
 0x267   : > { %v2461_v8 = vpop.permute.xlu1 %2460 }
 0x26a   : > { %3292 = vxpose.binary.xlu1.c.b16.cont [5/16] (narrow) %v1681_v55, %v1689_v42, 16  ;;  %v2443_v58 = vpop.permute.xlu2 %2442 }
 0x26e   : > { %v2459_v20 = vpop.permute.xlu0 %2458 }
 0x272   : > { %v2441_v46 = vpop.permute.xlu2 %2440 }
 0x276   : > { %v2457_v44 = vpop.permute.xlu0 %2456 }
 0x27a   : > { %3293 = vxpose.binary.xlu1.c.b16.cont [6/16] (narrow) %v1682_v18, %v1690_v28, 16  ;;  %v2439_v13 = vpop.permute.xlu2 %2438 }
 0x27e   : > { %v2455_v42 = vpop.permute.xlu0 %2454 }
 0x286   : > { %v2453_v7 = vpop.permute.xlu0 %2452 }
 0x28a   : > { %3294 = vxpose.binary.xlu1.c.b16.cont [7/16] (narrow) %v1683_v52, %v1691_v43, 16  ;;  %v1845_v43 = vpack.c.bf16 %v5610_v63, %v5609_v6  ;;  %v1847_v6 = vpack.c.bf16 %v5604_v5, %v5603_v61  ;;  %v1850_v63 = vpack.c.bf16 %v5593_v19, %v5592_v26 }
 0x28b   : > { %v1851_v61 = vpack.c.bf16 %v5591_v36, %v5590_v25  ;;  %v1855_v26 = vpack.c.bf16 %v5598_v40, %v5597_v2  ;;  %v1856_v25 = vpack.c.bf16 %v4403_v4, %v5594_v21  ;;  %v1859_v4 = vpack.c.bf16 %v4752_v54, %v4738_v35 }
 0x28e   : > { %v2437_v18 = vpop.permute.xlu0 %2436 }
 0x29a   : > { %3295 = vxpose.binary.xlu1.c.b16.end [8/16] (narrow) %v1684_v32, %v1692_v47, 16 }
 0x2d6   : > { %v3296_v29 = vpop.trf.xlu1 }
 0x2d7   : > { %1826 = vmatmul.bf16.vlgmr.msra.gmra.mxu2 %v3296_v29 }
 0x2d8   : > { %2497 = vmatpush.bf16.msra.mxu2 %v2467_v3 }
 0x2dc   : > { %2498 = vmatpush.bf16.msra.mxu2 %v2465_v53 }
 0x2de   : > { %v3297_v55 = vpop.trf.xlu1 }
 0x2df   : > { %1813 = vmatmul.bf16.vlgmr.msra.gmra.mxu1 %v3297_v55 }
 0x2e0   : > { %2484 = vmatpush.bf16.msra.mxu1 %v2451_v14  ;;  %2499 = vmatpush.bf16.msra.mxu2 %v2463_v49 }
 0x2e4   : > { %2485 = vmatpush.bf16.msra.mxu1 %v2449_v37  ;;  %2500 = vmatpush.bf16.msra.mxu2 %v2461_v8 }
 0x2e8   : > { %2486 = vmatpush.bf16.msra.mxu1 %v2447_v38  ;;  %2501 = vmatpush.bf16.msra.mxu2 %v2459_v20 }
 0x2ec   : > { %2487 = vmatpush.bf16.msra.mxu1 %v2445_v1  ;;  %2502 = vmatpush.bf16.msra.mxu2 %v2457_v44 }
 0x2f0   : > { %2488 = vmatpush.bf16.msra.mxu1 %v2443_v58  ;;  %2503 = vmatpush.bf16.msra.mxu2 %v2455_v42 }
 0x2f4   : > { %2489 = vmatpush.bf16.msra.mxu1 %v2441_v46  ;;  %2504 = vmatpush.bf16.msra.mxu2 %v2453_v7 }
 0x2f5   : > { %1894 = vrot.lane.b32.xlu1 %v5191_v9, %s3378_s12 }
 0x2f7   : > { %3261 = vmatmul.lmr.bf16.vlgmr.msra.gmra.2.mxu2 }
 0x2f8   : > { %2490 = vmatpush.bf16.msra.mxu1 %v2439_v13  ;;  %v1417_v13 = vld [vmem:[%s5442_s3] sm:$0xf] }
 0x2fc   : > { %2491 = vmatpush.bf16.msra.mxu1 %v2437_v18  ;;  %v2903_v18 = vsel %vm2761_vm5, %v1417_v13, 0 }
 0x2fd   : > { %2912 = vmatpush.bf16.msrb.mxu0 %v2903_v18 }
 0x2ff   : > { %3244 = vmatmul.lmr.bf16.vlgmr.msra.gmra.2.mxu1  ;;  %3262 = vmatmul.lmr.bf16.gmra.2.mxu2 }
 0x307   : > { %3245 = vmatmul.lmr.bf16.gmra.2.mxu1 }
 0x35a   : > { %v1827_v28 = vpop.f32.mrf.mxu2 }
 0x35c   : > { %v1814_v24 = vpop.f32.mrf.mxu1 }
 0x35d   : > { %v1828_v50 = vadd.f32 %v1827_v28, %v1814_v24 }
 0x35f   : > { %v1833_v62 = vmul.f32 %v1832_v27, %v1828_v50 }
 0x361   : > { %v1834_v48 = vsel %vm1451_vm3, %v1833_v62, -inf }
 0x362   : > { %v1829_v59 = vpop.f32.mrf.mxu2  ;;  %1835 = vmax.xlane.f32.xlu0 %v1834_v48 }
 0x364   : > { %v1816_v52 = vpop.f32.mrf.mxu1 }
 0x367   : > { %v1895_v52 = vpop.permute.xlu1 %1894 }
 0x376   : > { %2525 = vrot.lane.b32.xlu0 %v1845_v43, %s3379_s15 }
 0x37a   : > { %v2506_v11 = vpop.f32.mrf.mxu2 }
 0x37c   : > { %v2493_v31 = vpop.f32.mrf.mxu1 }
 0x37d   : > { %v2507_v32 = vadd.f32 %v2506_v11, %v2493_v31 }
 0x37e   : > { %2527 = vrot.lane.b32.xlu0 %v1846_v30, %s3379_s15 }
 0x37f   : > { %v2512_v47 = vmul.f32 %v2511_v0, %v2507_v32 }
 0x381   : > { %v2513_v3 = vsel %vm1451_vm3, %v2512_v47, -inf }
 0x382   : > { %2514 = vmax.xlane.f32.xlu2 %v2513_v3  ;;  %v2508_v53 = vpop.f32.mrf.mxu2 }
 0x384   : > { %v2495_v14 = vpop.f32.mrf.mxu1 }
 0x386   : > { %1880 = vrot.lane.b32.xlu0 %v1846_v30, %s3378_s12 }
 0x38e   : > { %1882 = vrot.lane.b32.xlu0 %v1847_v6, %s3378_s12 }
 0x396   : > { %1884 = vrot.lane.b32.xlu0 %v1848_v33, %s3378_s12 }
 0x39e   : > { %1886 = vrot.lane.b32.xlu0 %v1849_v56, %s3378_s12 }
 0x3a6   : > { %1888 = vrot.lane.b32.xlu0 %v1850_v63, %s3378_s12 }
 0x3ae   : > { %1890 = vrot.lane.b32.xlu0 %v1851_v61, %s3378_s12 }
 0x3b6   : > { %1892 = vrot.lane.b32.xlu0 %v1852_v17, %s3378_s12 }
 0x3be   : > { %2543 = vrot.lane.b32.xlu0 %v1854_v10, %s3379_s15 }
 0x3c6   : > { %2545 = vrot.lane.b32.xlu0 %v1855_v26, %s3379_s15 }
 0x3ce   : > { %2547 = vrot.lane.b32.xlu0 %v1856_v25, %s3379_s15 }
 0x3d5   : > { %v1836_v51 = vpop.xlane.xlu0 %1835 }
 0x3d6   : > { %v1837_v36 = vsub.f32 %v1833_v62, %v1836_v51  ;;  %2549 = vrot.lane.b32.xlu0 %v1857_v34, %s3379_s15  ;;  %v1418_v62 = vld [vmem:[%s5442_s3 + $0x4] sm:$0xf] }
 0x3d7   : > { %v2763_v48 = vsel %vm2761_vm5, %v1418_v62, 0 }
 0x3d8   : > { %v1838_v19 = vmul.f32 1.442695, %v1837_v36  ;;  %2772 = vmatpush.bf16.msra.mxu2 %v2763_v48 }
 0x3da   : > { %3306 = vpow2.f32 %v1838_v19 }
 0x3de   : > { %2551 = vrot.lane.b32.xlu0 %v1858_v57, %s3379_s15 }
 0x3e0   : > { %v3307_v2 = vpop.eup %3306 }
 0x3e1   : > { %v1840_v40 = vsel %vm1451_vm3, %v3307_v2, 0.0 }
 0x3e2   : > { %1841 = vadd.xlane.f32.xlu2 %v1840_v40 }
 0x3e6   : > { %2553 = vrot.lane.b32.xlu0 %v1859_v4, %s3379_s15 }
 0x3e8   : > { %v2526_v5 = vpop.permute.xlu0 %2525 }
 0x3ee   : > { %2555 = vrot.lane.b32.xlu0 %v1860_v22, %s3379_s15 }
 0x3f0   : > { %v2528_v29 = vpop.permute.xlu0 %2527 }
 0x3f5   : > { %v2515_v16 = vpop.xlane.xlu2 %2514 }
 0x3f6   : > { %v2516_v21 = vsub.f32 %v2512_v47, %v2515_v16 }
 0x3f8   : > { %v2517_v12 = vmul.f32 1.442695, %v2516_v21  ;;  %v1881_v1 = vpop.permute.xlu0 %1880 }
 0x3fa   : > { %3308 = vpow2.f32 %v2517_v12 }
 0x400   : > { %v3309_v60 = vpop.eup %3308  ;;  %v1883_v44 = vpop.permute.xlu0 %1882 }
 0x401   : > { %v2519_v39 = vsel %vm1451_vm3, %v3309_v60, 0.0 }
 0x402   : > { %2520 = vadd.xlane.f32.xlu2 %v2519_v39 }
 0x408   : > { %v1885_v58 = vpop.permute.xlu0 %1884 }
 0x410   : > { %v1887_v46 = vpop.permute.xlu0 %1886 }
 0x41a   : > { %1878 = vrot.lane.b32.xlu2 %v1845_v43, %s3378_s12 }
 0x422   : > { %2529 = vrot.lane.b32.xlu2 %v1847_v6, %s3379_s15 }
 0x42a   : > { %2531 = vrot.lane.b32.xlu2 %v1848_v33, %s3379_s15 }
 0x432   : > { %2533 = vrot.lane.b32.xlu2 %v1849_v56, %s3379_s15 }
 0x43a   : > { %2535 = vrot.lane.b32.xlu2 %v1850_v63, %s3379_s15 }
 0x442   : > { %2537 = vrot.lane.b32.xlu2 %v1851_v61, %s3379_s15 }
 0x44a   : > { %2539 = vrot.lane.b32.xlu2 %v1852_v17, %s3379_s15 }
 0x452   : > { %2541 = vrot.lane.b32.xlu2 %v5191_v9, %s3379_s15  ;;  %v1889_v9 = vpop.permute.xlu0 %1888 }
 0x455   : > { %v1842_v35 = vpop.xlane.xlu2 %1841 }
 0x456   : > { %3310 = vrcp.f32 %v1842_v35 }
 0x45a   : > { %1896 = vrot.lane.b32.xlu2 %v1854_v10, %s3378_s12  ;;  %v1891_v24 = vpop.permute.xlu0 %1890 }
 0x45c   : > { %v3311_v54 = vpop.eup %3310 }
 0x45d   : > { %v1844_v15 = vmul.f32 %v3311_v54, %v3307_v2 }
 0x45f   : > { %v1861_v45 = vpack.c.bf16 %v1844_v15, %v1844_v15 }
 0x461   : > { %v1959_v23 = vsel %vm1451_vm3, %v1861_v45, 0 }
 0x462   : > { %1898 = vrot.lane.b32.xlu2 %v1855_v26, %s3378_s12  ;;  %1968 = vmatpush.bf16.xpose.msrb.mxu3 %v1959_v23  ;;  %v1893_v50 = vpop.permute.xlu0 %1892 }
 0x46a   : > { %1900 = vrot.lane.b32.xlu2 %v1856_v25, %s3378_s12  ;;  %v2544_v6 = vpop.permute.xlu0 %2543 }
 0x472   : > { %1902 = vrot.lane.b32.xlu2 %v1857_v34, %s3378_s12  ;;  %v2546_v25 = vpop.permute.xlu0 %2545 }
 0x475   : > { %v2521_v41 = vpop.xlane.xlu2 %2520 }
 0x476   : > { %3312 = vrcp.f32 %v2521_v41 }
 0x47a   : > { %1904 = vrot.lane.b32.xlu2 %v1858_v57, %s3378_s12 }
 0x47c   : > { %v3313_v49 = vpop.eup %3312 }
 0x47d   : > { %v1879_v37 = vpop.permute.xlu2 %1878  ;;  %v2523_v8 = vmul.f32 %v3313_v49, %v3309_v60 }
 0x47e   : > { %3156 = vmatmul.msk.bf16.vlgmr.msrb.gmra.mxu3 %vm1451_vm3, %v1879_v37 }
 0x47f   : > { %v2524_v38 = vpack.c.bf16 %v2523_v8, %v2523_v8 }
 0x481   : > { %v2606_v20 = vsel %vm1451_vm3, %v2524_v38, 0 }
 0x482   : > { %1906 = vrot.lane.b32.xlu2 %v1859_v4, %s3378_s12  ;;  %2615 = vmatpush.bf16.xpose.msra.mxu1 %v2606_v20  ;;  %v2548_v4 = vpop.permute.xlu0 %2547 }
 0x485   : > { %v2530_v55 = vpop.permute.xlu2 %2529 }
 0x489   : > { %3173 = vmatmul.msk.bf16.vlgmr.msra.gmra.mxu1 %vm1451_vm3, %v2526_v5 }
 0x48a   : > { %1908 = vrot.lane.b32.xlu2 %v1860_v22, %s3378_s12  ;;  %v2550_v54 = vpop.permute.xlu0 %2549 }
 0x48d   : > { %v2532_v42 = vpop.permute.xlu2 %2531 }
 0x48e   : > { %3157 = vmatmul.msk.bf16.gmra.mxu3 %vm1451_vm3, %v1881_v1 }
 0x492   : > { %v2552_v8 = vpop.permute.xlu0 %2551 }
 0x495   : > { %v2534_v7 = vpop.permute.xlu2 %2533 }
 0x499   : > { %3174 = vmatmul.msk.bf16.gmra.mxu1 %vm1451_vm3, %v2528_v29 }
 0x49d   : > { %v2536_v28 = vpop.permute.xlu2 %2535 }
 0x49e   : > { %3158 = vmatmul.msk.bf16.gmra.mxu3 %vm1451_vm3, %v1883_v44 }
 0x4a5   : > { %v2538_v27 = vpop.permute.xlu2 %2537 }
 0x4a9   : > { %3175 = vmatmul.msk.bf16.gmra.mxu1 %vm1451_vm3, %v2530_v55 }
 0x4ad   : > { %v2540_v59 = vpop.permute.xlu2 %2539 }
 0x4ae   : > { %3159 = vmatmul.msk.bf16.gmra.mxu3 %vm1451_vm3, %v1885_v58 }
 0x4b5   : > { %v2542_v11 = vpop.permute.xlu2 %2541 }
 0x4b9   : > { %3176 = vmatmul.msk.bf16.gmra.mxu1 %vm1451_vm3, %v2532_v42  ;;  %v2554_v42 = vpop.permute.xlu0 %2553 }
 0x4bd   : > { %v1897_v32 = vpop.permute.xlu2 %1896 }
 0x4be   : > { %3160 = vmatmul.msk.bf16.gmra.mxu3 %vm1451_vm3, %v1887_v46 }
 0x4c5   : > { %v1899_v63 = vpop.permute.xlu2 %1898 }
 0x4c9   : > { %3177 = vmatmul.msk.bf16.gmra.mxu1 %vm1451_vm3, %v2534_v7 }
 0x4cd   : > { %v1901_v36 = vpop.permute.xlu2 %1900 }
 0x4ce   : > { %3161 = vmatmul.msk.bf16.gmra.mxu3 %vm1451_vm3, %v1889_v9 }
 0x4d5   : > { %v1903_v21 = vpop.permute.xlu2 %1902 }
 0x4d9   : > { %3178 = vmatmul.msk.bf16.gmra.mxu1 %vm1451_vm3, %v2536_v28 }
 0x4dd   : > { %v1905_v23 = vpop.permute.xlu2 %1904 }
 0x4de   : > { %3162 = vmatmul.msk.bf16.gmra.mxu3 %vm1451_vm3, %v1891_v24 }
 0x4e5   : > { %v1907_v29 = vpop.permute.xlu2 %1906 }
 0x4e9   : > { %3179 = vmatmul.msk.bf16.gmra.mxu1 %vm1451_vm3, %v2538_v27  ;;  %v2556_v27 = vpop.permute.xlu0 %2555 }
 0x4ed   : > { %v1909_v9 = vpop.permute.xlu2 %1908 }
 0x4ee   : > { %3163 = vmatmul.msk.bf16.gmra.mxu3 %vm1451_vm3, %v1893_v50 }
 0x4f9   : > { %3180 = vmatmul.msk.bf16.gmra.mxu1 %vm1451_vm3, %v2540_v59 }
 0x4fe   : > { %3164 = vmatmul.msk.bf16.gmra.mxu3 %vm1451_vm3, %v1895_v52 }
 0x501   : > { %v1970_v43 = vpop.f32.mrf.mxu3 }
 0x506   : > { %v2617_v31 = vpop.f32.mrf.mxu1 }
 0x509   : > { %v1972_v30 = vpop.f32.mrf.mxu3  ;;  %3181 = vmatmul.msk.bf16.gmra.mxu1 %vm1451_vm3, %v2542_v11 }
 0x50a   : > { %v2050_v0 = vpack.c.bf16 %v1972_v30, %v1970_v43 }
 0x50c   : > { %3205 = vmatmul.msk.bf16.vlgmr.msrb.gmra.mxu0 %vm1451_vm3, %v2050_v0 }
 0x50e   : > { %3165 = vmatmul.msk.bf16.gmra.mxu3 %vm1451_vm3, %v1897_v32  ;;  %v2619_v47 = vpop.f32.mrf.mxu1 }
 0x50f   : > { %v2697_v3 = vpack.c.bf16 %v2619_v47, %v2617_v31 }
 0x511   : > { %v1975_v53 = vpop.f32.mrf.mxu3  ;;  %3189 = vmatmul.msk.bf16.vlgmr.msra.gmra.mxu2 %vm1451_vm3, %v2697_v3 }
 0x512   : > { %3228 = vmatpush.bf16.msra.mxu2 %v2903_v18 }
 0x516   : > { %v2622_v14 = vpop.f32.mrf.mxu1 }
 0x519   : > { %v1977_v33 = vpop.f32.mrf.mxu3  ;;  %3182 = vmatmul.msk.bf16.gmra.mxu1 %vm1451_vm3, %v2544_v6 }
 0x51a   : > { %v2051_v56 = vpack.c.bf16 %v1977_v33, %v1975_v53  ;;  %v3314_v33 = vld [vmem:[%s3434_s29] sm:$0xff] }
 0x51c   : > { %3206 = vmatmul.msk.bf16.gmra.mxu0 %vm1451_vm3, %v2051_v56 }
 0x51e   : > { %3166 = vmatmul.msk.bf16.gmra.mxu3 %vm1451_vm3, %v1899_v63  ;;  %v2624_v61 = vpop.f32.mrf.mxu1 }
 0x51f   : > { %v2698_v17 = vpack.c.bf16 %v2624_v61, %v2622_v14 }
 0x521   : > { %v1980_v10 = vpop.f32.mrf.mxu3  ;;  %3190 = vmatmul.msk.bf16.gmra.mxu2 %vm1451_vm3, %v2698_v17 }
 0x526   : > { %v2627_v26 = vpop.f32.mrf.mxu1 }
 0x529   : > { %v1982_v34 = vpop.f32.mrf.mxu3  ;;  %3183 = vmatmul.msk.bf16.gmra.mxu1 %vm1451_vm3, %v2546_v25 }
 0x52a   : > { %v2052_v51 = vpack.c.bf16 %v1982_v34, %v1980_v10  ;;  %v3315_v34 = vld [vmem:[%s3434_s29 + $0x8] sm:$0xff] }
 0x52c   : > { %3207 = vmatmul.msk.bf16.gmra.mxu0 %vm1451_vm3, %v2052_v51 }
 0x52e   : > { %3167 = vmatmul.msk.bf16.gmra.mxu3 %vm1451_vm3, %v1901_v36  ;;  %v2629_v19 = vpop.f32.mrf.mxu1 }
 0x52f   : > { %v2699_v57 = vpack.c.bf16 %v2629_v19, %v2627_v26 }
 0x531   : > { %v1985_v2 = vpop.f32.mrf.mxu3  ;;  %3191 = vmatmul.msk.bf16.gmra.mxu2 %vm1451_vm3, %v2699_v57 }
 0x536   : > { %v2632_v40 = vpop.f32.mrf.mxu1 }
 0x539   : > { %v1987_v22 = vpop.f32.mrf.mxu3  ;;  %3184 = vmatmul.msk.bf16.gmra.mxu1 %vm1451_vm3, %v2548_v4 }
 0x53a   : > { %v2053_v16 = vpack.c.bf16 %v1987_v22, %v1985_v2  ;;  %v3316_v22 = vld [vmem:[%s3434_s29 + $0x10] sm:$0xff] }
 0x53c   : > { %3208 = vmatmul.msk.bf16.gmra.mxu0 %vm1451_vm3, %v2053_v16 }
 0x53e   : > { %3168 = vmatmul.msk.bf16.gmra.mxu3 %vm1451_vm3, %v1903_v21  ;;  %v2634_v12 = vpop.f32.mrf.mxu1 }
 0x53f   : > { %v2700_v60 = vpack.c.bf16 %v2634_v12, %v2632_v40 }
 0x541   : > { %v1990_v39 = vpop.f32.mrf.mxu3  ;;  %3192 = vmatmul.msk.bf16.gmra.mxu2 %vm1451_vm3, %v2700_v60 }
 0x546   : > { %v2637_v35 = vpop.f32.mrf.mxu1 }
 0x549   : > { %v1992_v15 = vpop.f32.mrf.mxu3  ;;  %3185 = vmatmul.msk.bf16.gmra.mxu1 %vm1451_vm3, %v2550_v54 }
 0x54a   : > { %v2054_v45 = vpack.c.bf16 %v1992_v15, %v1990_v39  ;;  %v3317_v15 = vld [vmem:[%s3434_s29 + $0x18] sm:$0xff] }
 0x54c   : > { %3209 = vmatmul.msk.bf16.gmra.mxu0 %vm1451_vm3, %v2054_v45 }
 0x54e   : > { %3169 = vmatmul.msk.bf16.gmra.mxu3 %vm1451_vm3, %v1905_v23  ;;  %v2639_v41 = vpop.f32.mrf.mxu1 }
 0x54f   : > { %v2701_v5 = vpack.c.bf16 %v2639_v41, %v2637_v35 }
 0x551   : > { %v1995_v49 = vpop.f32.mrf.mxu3  ;;  %3193 = vmatmul.msk.bf16.gmra.mxu2 %vm1451_vm3, %v2701_v5 }
 0x556   : > { %v2642_v37 = vpop.f32.mrf.mxu1 }
 0x559   : > { %v1997_v38 = vpop.f32.mrf.mxu3  ;;  %3186 = vmatmul.msk.bf16.gmra.mxu1 %vm1451_vm3, %v2552_v8 }
 0x55a   : > { %v2055_v20 = vpack.c.bf16 %v1997_v38, %v1995_v49  ;;  %v3318_v38 = vld [vmem:[%s3434_s29 + $0x20] sm:$0xff] }
 0x55c   : > { %3210 = vmatmul.msk.bf16.gmra.mxu0 %vm1451_vm3, %v2055_v20 }
 0x55e   : > { %3170 = vmatmul.msk.bf16.gmra.mxu3 %vm1451_vm3, %v1907_v29  ;;  %v2644_v1 = vpop.f32.mrf.mxu1 }
 0x55f   : > { %v2702_v44 = vpack.c.bf16 %v2644_v1, %v2642_v37 }
 0x561   : > { %v2000_v55 = vpop.f32.mrf.mxu3  ;;  %3194 = vmatmul.msk.bf16.gmra.mxu2 %vm1451_vm3, %v2702_v44 }
 0x566   : > { %v2647_v58 = vpop.f32.mrf.mxu1 }
 0x569   : > { %v2002_v46 = vpop.f32.mrf.mxu3  ;;  %3187 = vmatmul.msk.bf16.gmra.mxu1 %vm1451_vm3, %v2554_v42 }
 0x56a   : > { %v2056_v7 = vpack.c.bf16 %v2002_v46, %v2000_v55  ;;  %v3319_v46 = vld [vmem:[%s3434_s29 + $0x28] sm:$0xff] }
 0x56c   : > { %3211 = vmatmul.msk.bf16.gmra.mxu0 %vm1451_vm3, %v2056_v7 }
 0x56e   : > { %3171 = vmatmul.msk.bf16.gmra.mxu3 %vm1451_vm3, %v1909_v9  ;;  %v2649_v13 = vpop.f32.mrf.mxu1 }
 0x56f   : > { %v2703_v18 = vpack.c.bf16 %v2649_v13, %v2647_v58 }
 0x571   : > { %v2005_v28 = vpop.f32.mrf.mxu3  ;;  %3195 = vmatmul.msk.bf16.gmra.mxu2 %vm1451_vm3, %v2703_v18 }
 0x576   : > { %v2652_v24 = vpop.f32.mrf.mxu1 }
 0x579   : > { %v2007_v50 = vpop.f32.mrf.mxu3  ;;  %3188 = vmatmul.msk.bf16.gmra.mxu1 %vm1451_vm3, %v2556_v27 }
 0x57a   : > { %v2057_v62 = vpack.c.bf16 %v2007_v50, %v2005_v28  ;;  %v3320_v50 = vld [vmem:[%s3434_s29 + $0x30] sm:$0xff] }
 0x57c   : > { %3212 = vmatmul.msk.bf16.gmra.mxu0 %vm1451_vm3, %v2057_v62 }
 0x57e   : > { %v2654_v48 = vpop.f32.mrf.mxu1 }
 0x57f   : > { %v2704_v59 = vpack.c.bf16 %v2654_v48, %v2652_v24 }
 0x581   : > { %v2010_v52 = vpop.f32.mrf.mxu3  ;;  %3196 = vmatmul.msk.bf16.gmra.mxu2 %vm1451_vm3, %v2704_v59 }
 0x586   : > { %v2657_v43 = vpop.f32.mrf.mxu1 }
 0x589   : > { %v2012_v11 = vpop.f32.mrf.mxu3  ;;  %v2914_v31 = vpop.f32.mrf.mxu0 }
 0x58a   : > { %v2058_v30 = vpack.c.bf16 %v2012_v11, %v2010_v52 }
 0x58c   : > { %3213 = vmatmul.msk.bf16.gmra.mxu0 %vm1451_vm3, %v2058_v30  ;;  %v3321_v30 = vld [vmem:[%s3434_s29 + $0x38] sm:$0xff] }
 0x58e   : > { %v2659_v0 = vpop.f32.mrf.mxu1 }
 0x58f   : > { %v2705_v32 = vpack.c.bf16 %v2659_v0, %v2657_v43 }
 0x591   : > { %v2015_v47 = vpop.f32.mrf.mxu3  ;;  %3197 = vmatmul.msk.bf16.gmra.mxu2 %vm1451_vm3, %v2705_v32  ;;  %v2916_v3 = vpop.f32.mrf.mxu0 }
 0x594   : > { %v2774_v53 = vpop.f32.mrf.mxu2 }
 0x595   : > { %v2915_v14 = vadd.f32 %v2914_v31, %v2774_v53 }
 0x596   : > { %v2662_v6 = vpop.f32.mrf.mxu1 }
 0x597   : > { %v2994_v56 = vadd.f32 %v3314_v33, %v2915_v14  ;;  %v3322_v33 = vld [vmem:[%s3434_s29 + $0x40] sm:$0xff] }
 0x599   : > { %3026 = vst.msk [vmem:[%s5324_s24] sm:$0xff] %vm296_vm0, %v2994_v56  ;;  %v2017_v63 = vpop.f32.mrf.mxu3  ;;  %v2919_v61 = vpop.f32.mrf.mxu0 }
 0x59a   : > { %v2059_v17 = vpack.c.bf16 %v2017_v63, %v2015_v47 }
 0x59c   : > { %v2776_v10 = vpop.f32.mrf.mxu2  ;;  %3214 = vmatmul.msk.bf16.gmra.mxu0 %vm1451_vm3, %v2059_v17 }
 0x59d   : > { %v2917_v26 = vadd.f32 %v2916_v3, %v2776_v10 }
 0x59e   : > { %v2664_v25 = vpop.f32.mrf.mxu1 }
 0x59f   : > { %v2995_v51 = vadd.f32 %v3315_v34, %v2917_v26  ;;  %v2706_v36 = vpack.c.bf16 %v2664_v25, %v2662_v6  ;;  %v3323_v34 = vld [vmem:[%s3434_s29 + $0x48] sm:$0xff] }
 0x5a1   : > { %3027 = vst.msk [vmem:[%s5324_s24 + $0x8] sm:$0xff] %vm296_vm0, %v2995_v51  ;;  %v2020_v19 = vpop.f32.mrf.mxu3  ;;  %3198 = vmatmul.msk.bf16.gmra.mxu2 %vm1451_vm3, %v2706_v36  ;;  %v2921_v57 = vpop.f32.mrf.mxu0 }
 0x5a4   : > { %v2779_v2 = vpop.f32.mrf.mxu2 }
 0x5a5   : > { %v2920_v40 = vadd.f32 %v2919_v61, %v2779_v2 }
 0x5a6   : > { %v2667_v4 = vpop.f32.mrf.mxu1 }
 0x5a7   : > { %v2996_v16 = vadd.f32 %v3316_v22, %v2920_v40  ;;  %v3324_v22 = vld [vmem:[%s3434_s29 + $0x50] sm:$0xff] }
 0x5a9   : > { %3028 = vst.msk [vmem:[%s5324_s24 + $0x10] sm:$0xff] %vm296_vm0, %v2996_v16  ;;  %v2022_v21 = vpop.f32.mrf.mxu3  ;;  %v2924_v12 = vpop.f32.mrf.mxu0 }
 0x5aa   : > { %v2060_v60 = vpack.c.bf16 %v2022_v21, %v2020_v19 }
 0x5ac   : > { %v2781_v39 = vpop.f32.mrf.mxu2  ;;  %3215 = vmatmul.msk.bf16.gmra.mxu0 %vm1451_vm3, %v2060_v60 }
 0x5ad   : > { %v2922_v35 = vadd.f32 %v2921_v57, %v2781_v39 }
 0x5ae   : > { %v2669_v54 = vpop.f32.mrf.mxu1 }
 0x5af   : > { %v2997_v45 = vadd.f32 %v3317_v15, %v2922_v35  ;;  %v2707_v23 = vpack.c.bf16 %v2669_v54, %v2667_v4  ;;  %v3325_v15 = vld [vmem:[%s3434_s29 + $0x58] sm:$0xff] }
 0x5b1   : > { %3029 = vst.msk [vmem:[%s5324_s24 + $0x18] sm:$0xff] %vm296_vm0, %v2997_v45  ;;  %v2025_v41 = vpop.f32.mrf.mxu3  ;;  %3199 = vmatmul.msk.bf16.gmra.mxu2 %vm1451_vm3, %v2707_v23  ;;  %v2926_v5 = vpop.f32.mrf.mxu0 }
 0x5b4   : > { %v2784_v49 = vpop.f32.mrf.mxu2 }
 0x5b5   : > { %v2925_v37 = vadd.f32 %v2924_v12, %v2784_v49 }
 0x5b6   : > { %v2672_v8 = vpop.f32.mrf.mxu1 }
 0x5b7   : > { %v2998_v20 = vadd.f32 %v3318_v38, %v2925_v37 }
 0x5b9   : > { %3030 = vst.msk [vmem:[%s5324_s24 + $0x20] sm:$0xff] %vm296_vm0, %v2998_v20  ;;  %v2027_v29 = vpop.f32.mrf.mxu3  ;;  %v2929_v1 = vpop.f32.mrf.mxu0 }
 0x5ba   : > { %v2061_v44 = vpack.c.bf16 %v2027_v29, %v2025_v41 }
 0x5bc   : > { %v2786_v55 = vpop.f32.mrf.mxu2  ;;  %3216 = vmatmul.msk.bf16.gmra.mxu0 %vm1451_vm3, %v2061_v44 }
 0x5bd   : > { %v2927_v58 = vadd.f32 %v2926_v5, %v2786_v55  ;;  %v3327_v55 = vld [vmem:[%s3434_s29 + $0x68] sm:$0xff] }
 0x5be   : > { %v2674_v42 = vpop.f32.mrf.mxu1 }
 0x5bf   : > { %v2999_v7 = vadd.f32 %v3319_v46, %v2927_v58  ;;  %v2708_v9 = vpack.c.bf16 %v2674_v42, %v2672_v8  ;;  %v3326_v8 = vld [vmem:[%s3434_s29 + $0x60] sm:$0xff] }
 0x5c1   : > { %3031 = vst.msk [vmem:[%s5324_s24 + $0x28] sm:$0xff] %vm296_vm0, %v2999_v7  ;;  %v2030_v13 = vpop.f32.mrf.mxu3  ;;  %3200 = vmatmul.msk.bf16.gmra.mxu2 %vm1451_vm3, %v2708_v9  ;;  %v2931_v18 = vpop.f32.mrf.mxu0 }
 0x5c4   : > { %v2789_v28 = vpop.f32.mrf.mxu2 }
 0x5c5   : > { %v2930_v24 = vadd.f32 %v2929_v1, %v2789_v28 }
 0x5c6   : > { %v2677_v27 = vpop.f32.mrf.mxu1 }
 0x5c7   : > { %v3000_v62 = vadd.f32 %v3320_v50, %v2930_v24 }
 0x5c9   : > { %3032 = vst.msk [vmem:[%s5324_s24 + $0x30] sm:$0xff] %vm296_vm0, %v3000_v62  ;;  %v2032_v48 = vpop.f32.mrf.mxu3  ;;  %v2934_v59 = vpop.f32.mrf.mxu0 }
 0x5ca   : > { %v2062_v52 = vpack.c.bf16 %v2032_v48, %v2030_v13 }
 0x5cc   : > { %v2791_v43 = vpop.f32.mrf.mxu2  ;;  %3217 = vmatmul.msk.bf16.gmra.mxu0 %vm1451_vm3, %v2062_v52 }
 0x5cd   : > { %v2932_v11 = vadd.f32 %v2931_v18, %v2791_v43  ;;  %v3328_v18 = vld [vmem:[%s3434_s29 + $0x70] sm:$0xff] }
 0x5ce   : > { %v2679_v31 = vpop.f32.mrf.mxu1 }
 0x5cf   : > { %v3001_v0 = vadd.f32 %v3321_v30, %v2932_v11  ;;  %v2709_v32 = vpack.c.bf16 %v2679_v31, %v2677_v27  ;;  %v3330_v30 = vld [vmem:[%s3434_s29 + $0x80] sm:$0xff] }
 0x5d1   : > { %3033 = vst.msk [vmem:[%s5324_s24 + $0x38] sm:$0xff] %vm296_vm0, %v3001_v0  ;;  %v2035_v47 = vpop.f32.mrf.mxu3  ;;  %3201 = vmatmul.msk.bf16.gmra.mxu2 %vm1451_vm3, %v2709_v32  ;;  %v2936_v3 = vpop.f32.mrf.mxu0 }
 0x5d4   : > { %v2794_v53 = vpop.f32.mrf.mxu2 }
 0x5d5   : > { %v2935_v14 = vadd.f32 %v2934_v59, %v2794_v53  ;;  %v3329_v59 = vld [vmem:[%s3434_s29 + $0x78] sm:$0xff]  ;;  %v3331_v53 = vld [vmem:[%s3434_s29 + $0x88] sm:$0xff] }
 0x5d6   : > { %v2682_v6 = vpop.f32.mrf.mxu1 }
 0x5d7   : > { %v3002_v56 = vadd.f32 %v3322_v33, %v2935_v14 }
 0x5d9   : > { %3034 = vst.msk [vmem:[%s5324_s24 + $0x40] sm:$0xff] %vm296_vm0, %v3002_v56  ;;  %v2037_v63 = vpop.f32.mrf.mxu3  ;;  %v2939_v61 = vpop.f32.mrf.mxu0 }
 0x5da   : > { %v2063_v17 = vpack.c.bf16 %v2037_v63, %v2035_v47  ;;  %v3332_v63 = vld [vmem:[%s3434_s29 + $0x90] sm:$0xff] }
 0x5dc   : > { %v2796_v10 = vpop.f32.mrf.mxu2  ;;  %3218 = vmatmul.msk.bf16.gmra.mxu0 %vm1451_vm3, %v2063_v17 }
 0x5dd   : > { %v2937_v26 = vadd.f32 %v2936_v3, %v2796_v10 }
 0x5de   : > { %v2684_v25 = vpop.f32.mrf.mxu1 }
 0x5df   : > { %v3003_v51 = vadd.f32 %v3323_v34, %v2937_v26  ;;  %v2710_v36 = vpack.c.bf16 %v2684_v25, %v2682_v6  ;;  %v3333_v25 = vld [vmem:[%s3434_s29 + $0x98] sm:$0xff] }
 0x5e1   : > { %3035 = vst.msk [vmem:[%s5324_s24 + $0x48] sm:$0xff] %vm296_vm0, %v3003_v51  ;;  %v2040_v19 = vpop.f32.mrf.mxu3  ;;  %3202 = vmatmul.msk.bf16.gmra.mxu2 %vm1451_vm3, %v2710_v36  ;;  %v2941_v57 = vpop.f32.mrf.mxu0 }
 0x5e4   : > { %v2799_v2 = vpop.f32.mrf.mxu2 }
 0x5e5   : > { %v2940_v40 = vadd.f32 %v2939_v61, %v2799_v2 }
 0x5e6   : > { %v2687_v4 = vpop.f32.mrf.mxu1 }
 0x5e7   : > { %v3004_v16 = vadd.f32 %v3324_v22, %v2940_v40 }
 0x5e9   : > { %3036 = vst.msk [vmem:[%s5324_s24 + $0x50] sm:$0xff] %vm296_vm0, %v3004_v16  ;;  %v2042_v21 = vpop.f32.mrf.mxu3  ;;  %v2944_v12 = vpop.f32.mrf.mxu0  ;;  %v3335_v16 = vld [vmem:[%s3434_s29 + $0xa8] sm:$0xff] }
 0x5ea   : > { %v2064_v60 = vpack.c.bf16 %v2042_v21, %v2040_v19 }
 0x5ec   : > { %v2801_v39 = vpop.f32.mrf.mxu2  ;;  %3219 = vmatmul.msk.bf16.gmra.mxu0 %vm1451_vm3, %v2064_v60 }
 0x5ed   : > { %v2942_v35 = vadd.f32 %v2941_v57, %v2801_v39  ;;  %v3334_v57 = vld [vmem:[%s3434_s29 + $0xa0] sm:$0xff] }
 0x5ee   : > { %v2689_v54 = vpop.f32.mrf.mxu1 }
 0x5ef   : > { %v3005_v45 = vadd.f32 %v3325_v15, %v2942_v35  ;;  %v2711_v23 = vpack.c.bf16 %v2689_v54, %v2687_v4  ;;  %v3336_v35 = vld [vmem:[%s3434_s29 + $0xb0] sm:$0xff] }
 0x5f1   : > { %3037 = vst.msk [vmem:[%s5324_s24 + $0x58] sm:$0xff] %vm296_vm0, %v3005_v45  ;;  %3203 = vmatmul.msk.bf16.gmra.mxu2 %vm1451_vm3, %v2711_v23  ;;  %v2946_v41 = vpop.f32.mrf.mxu0  ;;  %v2045_v7 = vpop.f32.mrf.mxu3 }
 0x5f4   : > { %v2804_v5 = vpop.f32.mrf.mxu2 }
 0x5f5   : > { %v2945_v49 = vadd.f32 %v2944_v12, %v2804_v5 }
 0x5f6   : > { %v2692_v37 = vpop.f32.mrf.mxu1 }
 0x5f7   : > { %v3006_v38 = vadd.f32 %v3326_v8, %v2945_v49 }
 0x5f9   : > { %3038 = vst.msk [vmem:[%s5324_s24 + $0x60] sm:$0xff] %vm296_vm0, %v3006_v38  ;;  %v2949_v20 = vpop.f32.mrf.mxu0  ;;  %v2047_v27 = vpop.f32.mrf.mxu3  ;;  %v3338_v38 = vld [vmem:[%s3434_s29 + $0xc0] sm:$0xff] }
 0x5fa   : > { %v2065_v48 = vpack.c.bf16 %v2047_v27, %v2045_v7  ;;  %v3340_v7 = vld [vmem:[%s3434_s29 + $0xd0] sm:$0xff] }
 0x5fc   : > { %v2806_v29 = vpop.f32.mrf.mxu2 }
 0x5fd   : > { %v2947_v1 = vadd.f32 %v2946_v41, %v2806_v29  ;;  %v3337_v41 = vld [vmem:[%s3434_s29 + $0xb8] sm:$0xff] }
 0x5fe   : > { %v2694_v44 = vpop.f32.mrf.mxu1 }
 0x5ff   : > { %v3007_v58 = vadd.f32 %v3327_v55, %v2947_v1  ;;  %v2712_v42 = vpack.c.bf16 %v2694_v44, %v2692_v37  ;;  %v3339_v55 = vld [vmem:[%s3434_s29 + $0xc8] sm:$0xff] }
 0x601   : > { %3039 = vst.msk [vmem:[%s5324_s24 + $0x68] sm:$0xff] %vm296_vm0, %v3007_v58  ;;  %3204 = vmatmul.msk.bf16.gmra.mxu2 %vm1451_vm3, %v2712_v42  ;;  %v2951_v46 = vpop.f32.mrf.mxu0 }
 0x604   : > { %v2809_v9 = vpop.f32.mrf.mxu2 }
 0x605   : > { %v2950_v13 = vadd.f32 %v2949_v20, %v2809_v9 }
 0x607   : > { %v3008_v28 = vadd.f32 %v3328_v18, %v2950_v13 }
 0x609   : > { %3040 = vst.msk [vmem:[%s5324_s24 + $0x70] sm:$0xff] %vm296_vm0, %v3008_v28  ;;  %v2954_v24 = vpop.f32.mrf.mxu0 }
 0x60c   : > { %v2811_v50 = vpop.f32.mrf.mxu2 }
 0x60d   : > { %v2952_v62 = vadd.f32 %v2951_v46, %v2811_v50 }
 0x60f   : > { %v3009_v52 = vadd.f32 %v3329_v59, %v2952_v62  ;;  %v3342_v59 = vld [vmem:[%s3434_s29 + $0xe0] sm:$0xff] }
 0x611   : > { %3041 = vst.msk [vmem:[%s5324_s24 + $0x78] sm:$0xff] %vm296_vm0, %v3009_v52  ;;  %v2956_v43 = vpop.f32.mrf.mxu0  ;;  %3220 = vmatmul.msk.bf16.vlgmr.msra.gmra.mxu2 %vm1451_vm3, %v2065_v48 }
 0x614   : > { %v2814_v11 = vpop.f32.mrf.mxu2 }
 0x615   : > { %v2955_v31 = vadd.f32 %v2954_v24, %v2814_v11  ;;  %v3341_v24 = vld [vmem:[%s3434_s29 + $0xd8] sm:$0xff] }
 0x617   : > { %v3010_v0 = vadd.f32 %v3330_v30, %v2955_v31  ;;  %v3343_v30 = vld [vmem:[%s3434_s29 + $0xe8] sm:$0xff] }
 0x619   : > { %3042 = vst.msk [vmem:[%s5324_s24 + $0x80] sm:$0xff] %vm296_vm0, %v3010_v0  ;;  %v2959_v32 = vpop.f32.mrf.mxu0 }
 0x61c   : > { %v2816_v47 = vpop.f32.mrf.mxu2 }
 0x61d   : > { %v2957_v3 = vadd.f32 %v2956_v43, %v2816_v47 }
 0x61f   : > { %v3011_v14 = vadd.f32 %v3331_v53, %v2957_v3 }
 0x621   : > { %3043 = vst.msk [vmem:[%s5324_s24 + $0x88] sm:$0xff] %vm296_vm0, %v3011_v14  ;;  %v2961_v6 = vpop.f32.mrf.mxu0  ;;  %v3344_v14 = vld [vmem:[%s3434_s29 + $0xf0] sm:$0xff] }
 0x624   : > { %v2819_v33 = vpop.f32.mrf.mxu2 }
 0x625   : > { %v2960_v56 = vadd.f32 %v2959_v32, %v2819_v33 }
 0x627   : > { %v3012_v61 = vadd.f32 %v3332_v63, %v2960_v56  ;;  %v3345_v63 = vld [vmem:[%s3434_s29 + $0xf8] sm:$0xff] }
 0x629   : > { %3044 = vst.msk [vmem:[%s5324_s24 + $0x90] sm:$0xff] %vm296_vm0, %v3012_v61  ;;  %v2964_v17 = vpop.f32.mrf.mxu0 }
 0x62c   : > { %v2821_v10 = vpop.f32.mrf.mxu2 }
 0x62d   : > { %v2962_v26 = vadd.f32 %v2961_v6, %v2821_v10 }
 0x62f   : > { %v3013_v34 = vadd.f32 %v3333_v25, %v2962_v26 }
 0x631   : > { %3045 = vst.msk [vmem:[%s5324_s24 + $0x98] sm:$0xff] %vm296_vm0, %v3013_v34  ;;  %v2966_v51 = vpop.f32.mrf.mxu0 }
 0x634   : > { %v2824_v36 = vpop.f32.mrf.mxu2 }
 0x635   : > { %v2965_v19 = vadd.f32 %v2964_v17, %v2824_v36 }
 0x637   : > { %v3014_v2 = vadd.f32 %v3334_v57, %v2965_v19 }
 0x639   : > { %3046 = vst.msk [vmem:[%s5324_s24 + $0xa0] sm:$0xff] %vm296_vm0, %v3014_v2  ;;  %v2969_v40 = vpop.f32.mrf.mxu0 }
 0x63c   : > { %v2826_v4 = vpop.f32.mrf.mxu2 }
 0x63d   : > { %v2967_v22 = vadd.f32 %v2966_v51, %v2826_v4 }
 0x63f   : > { %v3015_v21 = vadd.f32 %v3335_v16, %v2967_v22 }
 0x641   : > { %3047 = vst.msk [vmem:[%s5324_s24 + $0xa8] sm:$0xff] %vm296_vm0, %v3015_v21  ;;  %v2971_v12 = vpop.f32.mrf.mxu0 }
 0x644   : > { %v2829_v60 = vpop.f32.mrf.mxu2 }
 0x645   : > { %v2970_v39 = vadd.f32 %v2969_v40, %v2829_v60 }
 0x647   : > { %v3016_v54 = vadd.f32 %v3336_v35, %v2970_v39 }
 0x649   : > { %3048 = vst.msk [vmem:[%s5324_s24 + $0xb0] sm:$0xff] %vm296_vm0, %v3016_v54  ;;  %v2974_v15 = vpop.f32.mrf.mxu0 }
 0x64c   : > { %v2831_v45 = vpop.f32.mrf.mxu2 }
 0x64d   : > { %v2972_v23 = vadd.f32 %v2971_v12, %v2831_v45 }
 0x64f   : > { %v3017_v5 = vadd.f32 %v3337_v41, %v2972_v23 }
 0x651   : > { %3049 = vst.msk [vmem:[%s5324_s24 + $0xb8] sm:$0xff] %vm296_vm0, %v3017_v5  ;;  %v2976_v49 = vpop.f32.mrf.mxu0 }
 0x654   : > { %v2834_v37 = vpop.f32.mrf.mxu2 }
 0x655   : > { %v2975_v8 = vadd.f32 %v2974_v15, %v2834_v37 }
 0x657   : > { %v3018_v20 = vadd.f32 %v3338_v38, %v2975_v8 }
 0x659   : > { %3050 = vst.msk [vmem:[%s5324_s24 + $0xc0] sm:$0xff] %vm296_vm0, %v3018_v20  ;;  %v2979_v44 = vpop.f32.mrf.mxu0 }
 0x65c   : > { %v2836_v29 = vpop.f32.mrf.mxu2 }
 0x65d   : > { %v2977_v1 = vadd.f32 %v2976_v49, %v2836_v29 }
 0x65f   : > { %v3019_v58 = vadd.f32 %v3339_v55, %v2977_v1 }
 0x661   : > { %3051 = vst.msk [vmem:[%s5324_s24 + $0xc8] sm:$0xff] %vm296_vm0, %v3019_v58  ;;  %v2981_v13 = vpop.f32.mrf.mxu0 }
 0x664   : > { %v2839_v42 = vpop.f32.mrf.mxu2 }
 0x665   : > { %v2980_v46 = vadd.f32 %v2979_v44, %v2839_v42 }
 0x667   : > { %v3020_v9 = vadd.f32 %v3340_v7, %v2980_v46 }
 0x669   : > { %3052 = vst.msk [vmem:[%s5324_s24 + $0xd0] sm:$0xff] %vm296_vm0, %v3020_v9  ;;  %v2984_v50 = vpop.f32.mrf.mxu0 }
 0x66c   : > { %v2841_v18 = vpop.f32.mrf.mxu2 }
 0x66d   : > { %v2982_v28 = vadd.f32 %v2981_v13, %v2841_v18 }
 0x66f   : > { %v3021_v27 = vadd.f32 %v3341_v24, %v2982_v28 }
 0x671   : > { %3053 = vst.msk [vmem:[%s5324_s24 + $0xd8] sm:$0xff] %vm296_vm0, %v3021_v27  ;;  %v2986_v43 = vpop.f32.mrf.mxu0 }
 0x674   : > { %v2844_v62 = vpop.f32.mrf.mxu2 }
 0x675   : > { %v2985_v48 = vadd.f32 %v2984_v50, %v2844_v62 }
 0x677   : > { %v3022_v52 = vadd.f32 %v3342_v59, %v2985_v48 }
 0x679   : > { %3054 = vst.msk [vmem:[%s5324_s24 + $0xe0] sm:$0xff] %vm296_vm0, %v3022_v52 }
 0x67c   : > { %v2846_v11 = vpop.f32.mrf.mxu2 }
 0x67d   : > { %v2987_v31 = vadd.f32 %v2986_v43, %v2846_v11 }
 0x67f   : > { %v3023_v0 = vadd.f32 %v3343_v30, %v2987_v31 }
 0x681   : > { %3055 = vst.msk [vmem:[%s5324_s24 + $0xe8] sm:$0xff] %vm296_vm0, %v3023_v0 }
 0x684   : > { %v2849_v32 = vpop.f32.mrf.mxu2 }
 0x68c   : > { %v2851_v47 = vpop.f32.mrf.mxu2 }
 0x694   : > { %v2989_v3 = vpop.f32.mrf.mxu2 }
 0x695   : > { %v2990_v53 = vadd.f32 %v2989_v3, %v2849_v32 }
 0x697   : > { %v3024_v6 = vadd.f32 %v3344_v14, %v2990_v53 }
 0x699   : > { %3056 = vst.msk [vmem:[%s5324_s24 + $0xf0] sm:$0xff] %vm296_vm0, %v3024_v6 }
 0x69c   : > { %v2991_v33 = vpop.f32.mrf.mxu2 }
 0x69d   : > { %v2992_v56 = vadd.f32 %v2991_v33, %v2851_v47 }
 0x69f   : > { %v3025_v61 = vadd.f32 %v3345_v63, %v2992_v56 }
 0x6a1   : > { %3057 = vst.msk [vmem:[%s5324_s24 + $0xf8] sm:$0xff] %vm296_vm0, %v3025_v61 }
 0x6a2 PF: > { %s16_s18 = sadd.s32 1, %s3371_s18  }
 0x6a3   : > { %p13_p7 = scmp.ge.s32.totalorder %s16_s18, 4  }
 0x6a5   :  { %15 = sbr.rel (!%p13_p7) target bundleno = 1 (0x1), region = 77 }
 0x6aa   :  { %3079 = vsyncpa [#allocation4], 1 }
 0x6ab   :  { %3081 = vsyncpa [#allocation4 + $0x1], 1 }

</bundles_post_ra>
